<compile_context>
chip_gen: v6e
topology: v6e:2x2x1
jax: 0.10.0
libtpu: 0.0.40
codegen_flags: <defaults>
</compile_context>

<pallas_src>
import jax
import jax.numpy as jnp
from jax.experimental import pallas as pl
from jax.experimental.pallas import tpu as pltpu

_MIB = 1024 * 1024


# --------------------------------------------------------------------------- #
# Kernel
# --------------------------------------------------------------------------- #
def _attention_kernel(enc_ref, att2_ref, we_ref, wa_ref, mask_ref,
                      z_ref, alpha_ref):
    Bt, P, E = enc_ref.shape
    A = we_ref.shape[1]

    enc = enc_ref[...]                                        # (Bt, P, E) bf16

    # encoder projection: flatten (Bt, P) into a real M dim for the MXU.
    # P is padded to a multiple of 128 in the wrapper, so this reshape is a
    # pure view at the (sublane, lane) tiling level (no relayout copy).
    att1 = jnp.dot(enc.reshape(Bt * P, E), we_ref[...],
                   preferred_element_type=jnp.float32).reshape(Bt, P, A)

    # decoder projection + both Linear biases were folded into att2 (wrapper).
    # Elementwise chain stays in f32 (v5e VPU/EUP have no bf16 support).
    h = jnp.maximum(att1 + att2_ref[...][:, None, :], 0.0)    # (Bt, P, A) f32

    # att layer has N=1 -> VPU multiply + lane reduce (keeps the MXU free and
    # the scores lane-dense).  The scalar att bias shifts every score equally
    # and cancels in the softmax, so it is omitted (alpha and z unchanged).
    # Padded pixel lanes get a -1e30 additive mask -> exactly zero probability.
    e = jnp.sum(h * wa_ref[...], axis=-1) + mask_ref[...]     # (Bt, P) f32

    # softmax over the (lane-dense) pixel axis.
    m = jnp.max(e, axis=-1, keepdims=True)                    # (Bt, 1)
    p = jnp.exp(e - m)                                        # (Bt, P)
    s = jnp.sum(p, axis=-1, keepdims=True)                    # (Bt, 1)
    r = pl.reciprocal(s, approx=True)                         # EUP slot
    r = r * (2.0 - s * r)                                      # Newton -> ~f32 exact
    alpha = p * r                                             # (Bt, P) f32

    # attention-weighted encoding as a batched matmul on the otherwise idle
    # MXU (on v5e a VPU mul + sublane reduce may win for tiny Bt; keep matmul).
    z3 = jnp.einsum('bqp,bpe->bqe', alpha.astype(enc.dtype)[:, None, :], enc,
                    preferred_element_type=jnp.float32)       # (Bt, 1, E)

    z_ref[...] = z3.reshape(Bt, E)
    alpha_ref[...] = alpha


# --------------------------------------------------------------------------- #
# Tiling / VMEM heuristics
# --------------------------------------------------------------------------- #
def _vmem_capacity_bytes():
    try:
        return int(pltpu.get_tpu_info().vmem_capacity_bytes)
    except Exception:
        return 64 * _MIB          # conservative: v7x per-TensorCore VMEM


def _vmem_footprint_bytes(bt, p_pad, e, a, enc_bytes=2):
    """Rough per-grid-step VMEM footprint for a batch tile of size `bt`."""
    fixed = e * a * enc_bytes + (a + p_pad) * 4       # resident weights / mask
    per_b = (
        2 * p_pad * e * enc_bytes                     # enc block (double-buffered)
        + 2 * a * 4                                   # att2 block
        + 2 * e * 4 + 2 * p_pad * 4                   # z / alpha output blocks
        + 2 * p_pad * a * 4                           # att1 / relu f32 intermediates
        + 6 * p_pad * 4 + 2 * e * 4                   # softmax temps, z temp
    )
    return fixed + bt * per_b


def _choose_batch_tile(B, p_pad, e, a, budget_bytes, enc_bytes=2):
    fixed = _vmem_footprint_bytes(0, p_pad, e, a, enc_bytes)
    per_b = max(1, _vmem_footprint_bytes(1, p_pad, e, a, enc_bytes) - fixed)
    bt = int(max(1, (budget_bytes - fixed) // per_b))
    bt = min(bt, B)
    if bt < B:
        # leading (sublane) dim of the 2-D output blocks must be a multiple of
        # 8 (or span the whole batch) and must divide B exactly.
        bt = (bt // 8) * 8
        while bt >= 8 and B % bt != 0:
            bt -= 8
        if bt < 8:
            # smallest legal tile; the scoped-vmem limit is raised accordingly.
            bt = 8 if B % 8 == 0 else B
    if bt == B and B % 16 == 0:
        bt = B // 2               # >= 2 grid steps so both v7x TCs get work
    return bt


# --------------------------------------------------------------------------- #
# Wrapper
# --------------------------------------------------------------------------- #
def attention_forward(encoder_out, decoder_hidden, params, *, batch_tile=None):
    """encoder_out: (B, P, E) f32, decoder_hidden: (B, D) f32."""
    B, P, E = encoder_out.shape
    we, be, wd, bd, wa, ba = params     # (E,A),(1,A),(D,A),(1,A),(A,1),(1,1)
    A = we.shape[1]
    del ba    # uniform shift of the scores; cancels in the softmax

    # ---- hoisted prep (runs once in XLA, outside the kernel) ----------------
    att2_all = (decoder_hidden @ wd + bd + be).astype(jnp.float32)    # (B, A)
    wa_row = wa.reshape(1, A).astype(jnp.float32)

    enc_dtype = jnp.bfloat16
    enc_bytes = jnp.dtype(enc_dtype).itemsize
    p_pad = ((P + 127) // 128) * 128                  # lane-dense pixel axis
    enc_p = jnp.pad(encoder_out.astype(enc_dtype),
                    ((0, 0), (0, p_pad - P), (0, 0)))
    we_b = we.astype(enc_dtype)
    mask_row = jnp.where(jnp.arange(p_pad) < P, 0.0, -1e30
                         ).astype(jnp.float32).reshape(1, p_pad)

    # ---- tiling / VMEM budget ------------------------------------------------
    cap = _vmem_capacity_bytes()                      # 64 MiB v7x, 128 MiB v5e/v6e
    Bt = batch_tile or _choose_batch_tile(B, p_pad, E, A, cap // 3, enc_bytes)
    est = _vmem_footprint_bytes(Bt, p_pad, E, A, enc_bytes)
    vmem_limit = int(min(0.9 * cap, max(32 * _MIB, 2 * est)))
    grid = (B // Bt,)

    cost = pl.CostEstimate(
        flops=2 * B * p_pad * E * A + 4 * B * p_pad * A + 2 * B * p_pad * E,
        transcendentals=B * p_pad,
        bytes_accessed=(enc_bytes * (B * p_pad * E + E * A)
                        + 4 * (B * A + A + p_pad + B * E + B * p_pad)),
    )

    def build(single_buffer_weights):
        def const_spec(shape):
            idx = lambda b: (0,) * len(shape)
            if single_buffer_weights:
                try:
                    # constant-index blocks: one resident buffer is enough
                    return pl.BlockSpec(shape, idx, pipeline_mode=pl.Buffered(1))
                except TypeError:
                    pass
            return pl.BlockSpec(shape, idx)

        return pl.pallas_call(
            _attention_kernel,
            out_shape=(
                jax.ShapeDtypeStruct((B, E), jnp.float32),
                jax.ShapeDtypeStruct((B, p_pad), jnp.float32),
            ),
            grid=grid,
            in_specs=[
                pl.BlockSpec((Bt, p_pad, E), lambda b: (b, 0, 0)),  # encoder_out
                pl.BlockSpec((Bt, A), lambda b: (b, 0)),            # att2 (+biases)
                const_spec((E, A)),                                 # W_enc (bf16)
                const_spec((1, A)),                                 # W_att row
                const_spec((1, p_pad)),                             # pad mask
            ],
            out_specs=(
                pl.BlockSpec((Bt, E), lambda b: (b, 0)),            # z
                pl.BlockSpec((Bt, p_pad), lambda b: (b, 0)),        # alpha
            ),
            compiler_params=pltpu.CompilerParams(
                dimension_semantics=("parallel",),                  # megacore
                vmem_limit_bytes=vmem_limit),
            cost_estimate=cost,
        )

    args = (enc_p, att2_all, we_b, wa_row, mask_row)
    try:
        z, alpha_pad = build(True)(*args)
    except Exception:
        # pl.Buffered(1) not supported by this jax/Mosaic version; fall back to
        # default double-buffered weight blocks (slightly more VMEM, same math).
        z, alpha_pad = build(False)(*args)

    return z, alpha_pad[:, :P]


# --------------------------------------------------------------------------- #
# Params / references / test
# --------------------------------------------------------------------------- #
def init_params(key, encoder_dim, decoder_dim, attention_dim):
    """Deterministic init mimicking nn.Linear's U(-1/sqrt(fan_in), 1/sqrt(fan_in))."""
    ks = jax.random.split(key, 6)

    def lin(kw, kb, fan_in, fan_out):
        bound = 1.0 / jnp.sqrt(fan_in)
        w = jax.random.uniform(kw, (fan_in, fan_out), jnp.float32, -bound, bound)
        b = jax.random.uniform(kb, (1, fan_out), jnp.float32, -bound, bound)
        return w, b

    we, be = lin(ks[0], ks[1], encoder_dim, attention_dim)
    wd, bd = lin(ks[2], ks[3], decoder_dim, attention_dim)
    wa, ba = lin(ks[4], ks[5], attention_dim, 1)
    return we, be, wd, bd, wa, ba


def _reference_f32(encoder_out, decoder_hidden, params):
    """Pure-f32 equivalent of the PyTorch forward."""
    we, be, wd, bd, wa, ba = params
    att1 = encoder_out @ we + be
    att2 = (decoder_hidden @ wd + bd)[:, None, :]
    e = (jnp.maximum(att1 + att2, 0.0) @ wa + ba)[..., 0]
    alpha = jax.nn.softmax(e, axis=-1)
    z = jnp.sum(encoder_out * alpha[..., None], axis=1)
    return z, alpha


def _reference_bf16_matched(encoder_out, decoder_hidden, params):
    """Reference that mirrors the kernel's bf16 rounding of enc / W_enc / alpha."""
    we, be, wd, bd, wa, ba = params
    enc = encoder_out.astype(jnp.bfloat16).astype(jnp.float32)
    we_r = we.astype(jnp.bfloat16).astype(jnp.float32)
    att1 = enc @ we_r
    att2 = (decoder_hidden @ wd + bd + be)[:, None, :]
    e = jnp.sum(jnp.maximum(att1 + att2, 0.0) * wa.reshape(1, 1, -1), axis=-1)
    alpha = jax.nn.softmax(e, axis=-1)
    alpha_r = alpha.astype(jnp.bfloat16).astype(jnp.float32)
    z = jnp.einsum('bp,bpe->be', alpha_r, enc)
    return z, alpha


if __name__ == "__main__":
    B, P = 2, 16                  # batch, num_pixels
    encoder_dim, decoder_dim, attention_dim = 32, 24, 48

    key = jax.random.PRNGKey(0)
    k_enc, k_dec, k_par = jax.random.split(key, 3)
    encoder_out = jax.random.normal(k_enc, (B, P, encoder_dim), jnp.float32)
    decoder_hidden = jax.random.normal(k_dec, (B, decoder_dim), jnp.float32)
    params = init_params(k_par, encoder_dim, decoder_dim, attention_dim)

    z, alpha = attention_forward(encoder_out, decoder_hidden, params)
    jax.block_until_ready((z, alpha))
    assert z.shape == (B, encoder_dim) and alpha.shape == (B, P)

    # tight check vs. a reference using the same bf16 input rounding
    z_m, alpha_m = _reference_bf16_matched(encoder_out, decoder_hidden, params)
    assert jnp.allclose(alpha, alpha_m, atol=1e-4, rtol=1e-4)
    assert jnp.allclose(z, z_m, atol=1e-4, rtol=1e-4)

    # sanity check vs. the pure-f32 PyTorch-equivalent forward (bf16 tolerance)
    z_f, alpha_f = _reference_f32(encoder_out, decoder_hidden, params)
    assert jnp.allclose(alpha, alpha_f, atol=2e-2, rtol=2e-2)
    assert jnp.allclose(z, z_f, atol=2e-2, rtol=2e-2)
    assert jnp.allclose(alpha.sum(-1), 1.0, atol=1e-3)

    print("KERNEL_OK")
</pallas_src>

<mosaic_0001>
module attributes {stable_mosaic.version = 11 : i64} {
  func.func @_attention_kernel(%arg0: i32, %arg1: memref<2x128x32xbf16, #tpu.memory_space<vmem>>, %arg2: memref<2x48xf32, #tpu.memory_space<vmem>>, %arg3: memref<32x48xbf16, #tpu.memory_space<vmem>>, %arg4: memref<1x48xf32, #tpu.memory_space<vmem>>, %arg5: memref<1x128xf32, #tpu.memory_space<vmem>>, %arg6: memref<2x32xf32, #tpu.memory_space<vmem>>, %arg7: memref<2x128xf32, #tpu.memory_space<vmem>>) attributes {dimension_semantics = [#tpu.dimension_semantics<parallel>], iteration_bounds = array<i64: 1>, scalar_prefetch = 0 : i64, scratch_operands = 0 : i64, tpu.core_type = #tpu.core_type<tc>, window_params = [{transform_indices = @transform_0, window_bounds = array<i64: 2, 128, 32>}, {transform_indices = @transform_1, window_bounds = array<i64: 2, 48>}, {pipeline_mode = #tpu.pipeline_mode<synchronous>, transform_indices = @transform_2, window_bounds = array<i64: 32, 48>}, {pipeline_mode = #tpu.pipeline_mode<synchronous>, transform_indices = @transform_3, window_bounds = array<i64: 1, 48>}, {pipeline_mode = #tpu.pipeline_mode<synchronous>, transform_indices = @transform_4, window_bounds = array<i64: 1, 128>}, {transform_indices = @transform_5, window_bounds = array<i64: 2, 32>}, {transform_indices = @transform_6, window_bounds = array<i64: 2, 128>}]} {
    %c0 = arith.constant 0 : index
    %c0_0 = arith.constant 0 : index
    %c0_1 = arith.constant 0 : index
    %0 = vector.load %arg1[%c0, %c0_0, %c0_1] : memref<2x128x32xbf16, #tpu.memory_space<vmem>>, vector<2x128x32xbf16>
    %1 = vector.shape_cast %0 : vector<2x128x32xbf16> to vector<256x32xbf16>
    %c0_2 = arith.constant 0 : index
    %c0_3 = arith.constant 0 : index
    %2 = vector.load %arg3[%c0_2, %c0_3] : memref<32x48xbf16, #tpu.memory_space<vmem>>, vector<32x48xbf16>
    %cst = arith.constant dense<0.000000e+00> : vector<256x48xf32>
    %3 = tpu.matmul %1, %2, %cst {dimension_numbers = #tpu.dot_dimension_numbers<[1], [0], [0], [1], [0, 0, 1, 1], [], []>} : vector<256x32xbf16>, vector<32x48xbf16>, vector<256x48xf32> -> vector<256x48xf32>
    %4 = vector.shape_cast %3 : vector<256x48xf32> to vector<2x128x48xf32>
    %c0_4 = arith.constant 0 : index
    %c0_5 = arith.constant 0 : index
    %5 = vector.load %arg2[%c0_4, %c0_5] : memref<2x48xf32, #tpu.memory_space<vmem>>, vector<2x48xf32>
    %6 = vector.shape_cast %5 : vector<2x48xf32> to vector<2x1x48xf32>
    %7 = vector.broadcast %6 : vector<2x1x48xf32> to vector<2x128x48xf32>
    %8 = arith.addf %4, %7 : vector<2x128x48xf32>
    %cst_6 = arith.constant 0.000000e+00 : f32
    %9 = vector.broadcast %cst_6 : f32 to vector<2x128x48xf32>
    %10 = arith.maximumf %8, %9 : vector<2x128x48xf32>
    %c0_7 = arith.constant 0 : index
    %c0_8 = arith.constant 0 : index
    %11 = vector.load %arg4[%c0_7, %c0_8] : memref<1x48xf32, #tpu.memory_space<vmem>>, vector<1x48xf32>
    %12 = vector.shape_cast %11 : vector<1x48xf32> to vector<1x1x48xf32>
    %13 = vector.broadcast %12 : vector<1x1x48xf32> to vector<2x128x48xf32>
    %14 = arith.mulf %10, %13 : vector<2x128x48xf32>
    %cst_9 = arith.constant dense<0.000000e+00> : vector<2x128xf32>
    %15 = vector.multi_reduction <add>, %14, %cst_9 [2] : vector<2x128x48xf32> to vector<2x128xf32>
    %c0_10 = arith.constant 0 : index
    %c0_11 = arith.constant 0 : index
    %16 = vector.load %arg5[%c0_10, %c0_11] : memref<1x128xf32, #tpu.memory_space<vmem>>, vector<1x128xf32>
    %17 = vector.broadcast %16 : vector<1x128xf32> to vector<2x128xf32>
    %18 = arith.addf %15, %17 : vector<2x128xf32>
    %cst_12 = arith.constant dense<0xFF800000> : vector<2xf32>
    %19 = vector.multi_reduction <maximumf>, %18, %cst_12 [1] : vector<2x128xf32> to vector<2xf32>
    %20 = vector.shape_cast %19 : vector<2xf32> to vector<2x1xf32>
    %21 = vector.broadcast %20 : vector<2x1xf32> to vector<2x128xf32>
    %22 = arith.subf %18, %21 : vector<2x128xf32>
    %23 = math.exp %22 : vector<2x128xf32>
    %cst_13 = arith.constant dense<0.000000e+00> : vector<2xf32>
    %24 = vector.multi_reduction <add>, %23, %cst_13 [1] : vector<2x128xf32> to vector<2xf32>
    %25 = vector.shape_cast %24 : vector<2xf32> to vector<2x1xf32>
    %26 = tpu.reciprocal %25 {approx = true} : vector<2x1xf32> -> vector<2x1xf32>
    %27 = arith.mulf %25, %26 : vector<2x1xf32>
    %cst_14 = arith.constant 2.000000e+00 : f32
    %28 = vector.broadcast %cst_14 : f32 to vector<2x1xf32>
    %29 = arith.subf %28, %27 : vector<2x1xf32>
    %30 = arith.mulf %26, %29 : vector<2x1xf32>
    %31 = vector.broadcast %30 : vector<2x1xf32> to vector<2x128xf32>
    %32 = arith.mulf %23, %31 : vector<2x128xf32>
    %33 = arith.truncf %32 : vector<2x128xf32> to vector<2x128xbf16>
    %34 = vector.shape_cast %33 : vector<2x128xbf16> to vector<2x1x128xbf16>
    "tpu.trace_start"() <{level = 10 : i32, message = "bqp,bpe->bqe"}> : () -> ()
    %cst_15 = arith.constant dense<0.000000e+00> : vector<2x1x32xf32>
    %35 = tpu.matmul %34, %0, %cst_15 {dimension_numbers = #tpu.dot_dimension_numbers<[2], [1], [1], [2], [0, 0, 0, 1, 1, 2], [0], [0]>} : vector<2x1x128xbf16>, vector<2x128x32xbf16>, vector<2x1x32xf32> -> vector<2x1x32xf32>
    "tpu.trace_stop"() : () -> ()
    %36 = vector.shape_cast %35 : vector<2x1x32xf32> to vector<2x32xf32>
    %c0_16 = arith.constant 0 : index
    %c0_17 = arith.constant 0 : index
    %37 = vector.load %arg6[%c0_16, %c0_17] : memref<2x32xf32, #tpu.memory_space<vmem>>, vector<2x32xf32>
    tpu.vector_store %arg6[%c0_16, %c0_17], %36 {strides = array<i32>} : memref<2x32xf32, #tpu.memory_space<vmem>>, vector<2x32xf32>,
    %c0_18 = arith.constant 0 : index
    %c0_19 = arith.constant 0 : index
    %38 = vector.load %arg7[%c0_18, %c0_19] : memref<2x128xf32, #tpu.memory_space<vmem>>, vector<2x128xf32>
    tpu.vector_store %arg7[%c0_18, %c0_19], %32 {strides = array<i32>} : memref<2x128xf32, #tpu.memory_space<vmem>>, vector<2x128xf32>,
    return
  }
  func.func @transform_0(%arg0: i32) -> (i32, i32, i32) {
    %c0_i32 = arith.constant 0 : i32
    %c0_i32_0 = arith.constant 0 : i32
    %c0_i32_1 = arith.constant 0 : i32
    return %arg0, %c0_i32, %c0_i32_0 : i32, i32, i32
  }
  func.func @transform_1(%arg0: i32) -> (i32, i32) {
    %c0_i32 = arith.constant 0 : i32
    %c0_i32_0 = arith.constant 0 : i32
    return %arg0, %c0_i32 : i32, i32
  }
  func.func @transform_2(%arg0: i32) -> (i32, i32) {
    %c0_i32 = arith.constant 0 : i32
    %c0_i32_0 = arith.constant 0 : i32
    %c0_i32_1 = arith.constant 0 : i32
    return %c0_i32, %c0_i32_0 : i32, i32
  }
  func.func @transform_3(%arg0: i32) -> (i32, i32) {
    %c0_i32 = arith.constant 0 : i32
    %c0_i32_0 = arith.constant 0 : i32
    %c0_i32_1 = arith.constant 0 : i32
    return %c0_i32, %c0_i32_0 : i32, i32
  }
  func.func @transform_4(%arg0: i32) -> (i32, i32) {
    %c0_i32 = arith.constant 0 : i32
    %c0_i32_0 = arith.constant 0 : i32
    %c0_i32_1 = arith.constant 0 : i32
    return %c0_i32, %c0_i32_0 : i32, i32
  }
  func.func @transform_5(%arg0: i32) -> (i32, i32) {
    %c0_i32 = arith.constant 0 : i32
    %c0_i32_0 = arith.constant 0 : i32
    return %arg0, %c0_i32 : i32, i32
  }
  func.func @transform_6(%arg0: i32) -> (i32, i32) {
    %c0_i32 = arith.constant 0 : i32
    %c0_i32_0 = arith.constant 0 : i32
    return %arg0, %c0_i32 : i32, i32
  }
}

module attributes {stable_mosaic.version = 11 : i64} {
  func.func @_attention_kernel(%arg0: i32, %arg1: memref<2x128x32xbf16, #tpu.memory_space<vmem>>, %arg2: memref<2x48xf32, #tpu.memory_space<vmem>>, %arg3: memref<32x48xbf16, #tpu.memory_space<vmem>>, %arg4: memref<1x48xf32, #tpu.memory_space<vmem>>, %arg5: memref<1x128xf32, #tpu.memory_space<vmem>>, %arg6: memref<2x32xf32, #tpu.memory_space<vmem>>, %arg7: memref<2x128xf32, #tpu.memory_space<vmem>>) attributes {dimension_semantics = [#tpu.dimension_semantics<parallel>], iteration_bounds = array<i64: 1>, scalar_prefetch = 0 : i64, scratch_operands = 0 : i64, tpu.core_type = #tpu.core_type<tc>, window_params = [{transform_indices = @transform_0, window_bounds = array<i64: 2, 128, 32>}, {transform_indices = @transform_1, window_bounds = array<i64: 2, 48>}, {pipeline_mode = #tpu.pipeline_mode<synchronous>, transform_indices = @transform_2, window_bounds = array<i64: 32, 48>}, {pipeline_mode = #tpu.pipeline_mode<synchronous>, transform_indices = @transform_3, window_bounds = array<i64: 1, 48>}, {pipeline_mode = #tpu.pipeline_mode<synchronous>, transform_indices = @transform_4, window_bounds = array<i64: 1, 128>}, {transform_indices = @transform_5, window_bounds = array<i64: 2, 32>}, {transform_indices = @transform_6, window_bounds = array<i64: 2, 128>}]} {
    %c0 = arith.constant 0 : index
    %c0_0 = arith.constant 0 : index
    %c0_1 = arith.constant 0 : index
    %0 = vector.load %arg1[%c0, %c0_0, %c0_1] : memref<2x128x32xbf16, #tpu.memory_space<vmem>>, vector<2x128x32xbf16>
    %1 = vector.shape_cast %0 : vector<2x128x32xbf16> to vector<256x32xbf16>
    %c0_2 = arith.constant 0 : index
    %c0_3 = arith.constant 0 : index
    %2 = vector.load %arg3[%c0_2, %c0_3] : memref<32x48xbf16, #tpu.memory_space<vmem>>, vector<32x48xbf16>
    %cst = arith.constant dense<0.000000e+00> : vector<256x48xf32>
    %3 = tpu.matmul %1, %2, %cst {dimension_numbers = #tpu.dot_dimension_numbers<[1], [0], [0], [1], [0, 0, 1, 1], [], []>} : vector<256x32xbf16>, vector<32x48xbf16>, vector<256x48xf32> -> vector<256x48xf32>
    %4 = vector.shape_cast %3 : vector<256x48xf32> to vector<2x128x48xf32>
    %c0_4 = arith.constant 0 : index
    %c0_5 = arith.constant 0 : index
    %5 = vector.load %arg2[%c0_4, %c0_5] : memref<2x48xf32, #tpu.memory_space<vmem>>, vector<2x48xf32>
    %6 = vector.shape_cast %5 : vector<2x48xf32> to vector<2x1x48xf32>
    %7 = vector.broadcast %6 : vector<2x1x48xf32> to vector<2x128x48xf32>
    %8 = arith.addf %4, %7 : vector<2x128x48xf32>
    %cst_6 = arith.constant 0.000000e+00 : f32
    %9 = vector.broadcast %cst_6 : f32 to vector<2x128x48xf32>
    %10 = arith.maximumf %8, %9 : vector<2x128x48xf32>
    %c0_7 = arith.constant 0 : index
    %c0_8 = arith.constant 0 : index
    %11 = vector.load %arg4[%c0_7, %c0_8] : memref<1x48xf32, #tpu.memory_space<vmem>>, vector<1x48xf32>
    %12 = vector.shape_cast %11 : vector<1x48xf32> to vector<1x1x48xf32>
    %13 = vector.broadcast %12 : vector<1x1x48xf32> to vector<2x128x48xf32>
    %14 = arith.mulf %10, %13 : vector<2x128x48xf32>
    %cst_9 = arith.constant dense<0.000000e+00> : vector<2x128xf32>
    %15 = vector.multi_reduction <add>, %14, %cst_9 [2] : vector<2x128x48xf32> to vector<2x128xf32>
    %c0_10 = arith.constant 0 : index
    %c0_11 = arith.constant 0 : index
    %16 = vector.load %arg5[%c0_10, %c0_11] : memref<1x128xf32, #tpu.memory_space<vmem>>, vector<1x128xf32>
    %17 = vector.broadcast %16 : vector<1x128xf32> to vector<2x128xf32>
    %18 = arith.addf %15, %17 : vector<2x128xf32>
    %cst_12 = arith.constant dense<0xFF800000> : vector<2xf32>
    %19 = vector.multi_reduction <maximumf>, %18, %cst_12 [1] : vector<2x128xf32> to vector<2xf32>
    %20 = vector.shape_cast %19 : vector<2xf32> to vector<2x1xf32>
    %21 = vector.broadcast %20 : vector<2x1xf32> to vector<2x128xf32>
    %22 = arith.subf %18, %21 : vector<2x128xf32>
    %23 = math.exp %22 : vector<2x128xf32>
    %cst_13 = arith.constant dense<0.000000e+00> : vector<2xf32>
    %24 = vector.multi_reduction <add>, %23, %cst_13 [1] : vector<2x128xf32> to vector<2xf32>
    %25 = vector.shape_cast %24 : vector<2xf32> to vector<2x1xf32>
    %26 = tpu.reciprocal %25 {approx = true} : vector<2x1xf32> -> vector<2x1xf32>
    %27 = arith.mulf %25, %26 : vector<2x1xf32>
    %cst_14 = arith.constant 2.000000e+00 : f32
    %28 = vector.broadcast %cst_14 : f32 to vector<2x1xf32>
    %29 = arith.subf %28, %27 : vector<2x1xf32>
    %30 = arith.mulf %26, %29 : vector<2x1xf32>
    %31 = vector.broadcast %30 : vector<2x1xf32> to vector<2x128xf32>
    %32 = arith.mulf %23, %31 : vector<2x128xf32>
    %33 = arith.truncf %32 : vector<2x128xf32> to vector<2x128xbf16>
    %34 = vector.shape_cast %33 : vector<2x128xbf16> to vector<2x1x128xbf16>
    "tpu.trace_start"() <{level = 10 : i32, message = "bqp,bpe->bqe"}> : () -> ()
    %cst_15 = arith.constant dense<0.000000e+00> : vector<2x1x32xf32>
    %35 = tpu.matmul %34, %0, %cst_15 {dimension_numbers = #tpu.dot_dimension_numbers<[2], [1], [1], [2], [0, 0, 0, 1, 1, 2], [0], [0]>} : vector<2x1x128xbf16>, vector<2x128x32xbf16>, vector<2x1x32xf32> -> vector<2x1x32xf32>
    "tpu.trace_stop"() : () -> ()
    %36 = vector.shape_cast %35 : vector<2x1x32xf32> to vector<2x32xf32>
    %c0_16 = arith.constant 0 : index
    %c0_17 = arith.constant 0 : index
    %37 = vector.load %arg6[%c0_16, %c0_17] : memref<2x32xf32, #tpu.memory_space<vmem>>, vector<2x32xf32>
    tpu.vector_store %arg6[%c0_16, %c0_17], %36 {strides = array<i32>} : memref<2x32xf32, #tpu.memory_space<vmem>>, vector<2x32xf32>,
    %c0_18 = arith.constant 0 : index
    %c0_19 = arith.constant 0 : index
    %38 = vector.load %arg7[%c0_18, %c0_19] : memref<2x128xf32, #tpu.memory_space<vmem>>, vector<2x128xf32>
    tpu.vector_store %arg7[%c0_18, %c0_19], %32 {strides = array<i32>} : memref<2x128xf32, #tpu.memory_space<vmem>>, vector<2x128xf32>,
    return
  }
  func.func @transform_0(%arg0: i32) -> (i32, i32, i32) {
    %c0_i32 = arith.constant 0 : i32
    %c0_i32_0 = arith.constant 0 : i32
    %c0_i32_1 = arith.constant 0 : i32
    return %arg0, %c0_i32, %c0_i32_0 : i32, i32, i32
  }
  func.func @transform_1(%arg0: i32) -> (i32, i32) {
    %c0_i32 = arith.constant 0 : i32
    %c0_i32_0 = arith.constant 0 : i32
    return %arg0, %c0_i32 : i32, i32
  }
  func.func @transform_2(%arg0: i32) -> (i32, i32) {
    %c0_i32 = arith.constant 0 : i32
    %c0_i32_0 = arith.constant 0 : i32
    %c0_i32_1 = arith.constant 0 : i32
    return %c0_i32, %c0_i32_0 : i32, i32
  }
  func.func @transform_3(%arg0: i32) -> (i32, i32) {
    %c0_i32 = arith.constant 0 : i32
    %c0_i32_0 = arith.constant 0 : i32
    %c0_i32_1 = arith.constant 0 : i32
    return %c0_i32, %c0_i32_0 : i32, i32
  }
  func.func @transform_4(%arg0: i32) -> (i32, i32) {
    %c0_i32 = arith.constant 0 : i32
    %c0_i32_0 = arith.constant 0 : i32
    %c0_i32_1 = arith.constant 0 : i32
    return %c0_i32, %c0_i32_0 : i32, i32
  }
  func.func @transform_5(%arg0: i32) -> (i32, i32) {
    %c0_i32 = arith.constant 0 : i32
    %c0_i32_0 = arith.constant 0 : i32
    return %arg0, %c0_i32 : i32, i32
  }
  func.func @transform_6(%arg0: i32) -> (i32, i32) {
    %c0_i32 = arith.constant 0 : i32
    %c0_i32_0 = arith.constant 0 : i32
    return %arg0, %c0_i32 : i32, i32
  }
}

</mosaic_0001>

<bundles_post_ra>
// kernel: tpu_custom_call.1
= control target key start
LH: loop header
LB: loop body
LE: loop exit
PB: predicated region body
PF: predicated region fallthrough
CT: control target
= control target key end

     0   :  { %12 = vsyncpa [#allocation3], 0  ;;  %vm153_vm0 = vcmask 261120   ;;  %s3786_s0 = inlined_call_operand.vmem [shape: bf16[2,128,32], index: 0, kind: input, shape index: {}]   ;;  %s3787_s1 = inlined_call_operand.vmem [shape: f32[2,48], index: 1, kind: input, shape index: {}]   ;;  %s3788_s2 = inlined_call_operand.vmem [shape: bf16[32,48], index: 2, kind: input, shape index: {}]   ;;  %s3789_s3 = inlined_call_operand.vmem [shape: f32[1,48], index: 3, kind: input, shape index: {}]   ;;  %s3790_s4 = inlined_call_operand.vmem [shape: f32[1,128], index: 4, kind: input, shape index: {}]   ;;  %s3791_s5 = inlined_call_operand.hbm [shape: f32[2,32], index: 5, kind: output, shape index: {0}]   ;;  %s3792_s6 = inlined_call_operand.hbm [shape: f32[2,128], index: 6, kind: output, shape index: {1}]  }
   0x1   :  { %v2383_v0 = vld [vmem:[%s3788_s2 + $0x8] sm:$0xff]   ;;  %v2384_v1 = vld [vmem:[%s3788_s2] sm:$0xff]   ;;  %v2387_v4 = vld [vmem:[%s3786_s0 + $0x10] sm:$0xff]  }
   0x2   :  { %2299 = vmatprep.subr.bf16.mxu0 %v2383_v0  ;;  %v2385_v2 = vld [vmem:[%s3786_s0] sm:$0xff]   ;;  %v2386_v3 = vld [vmem:[%s3786_s0 + $0x8] sm:$0xff]   ;;  %v2388_v5 = vld [vmem:[%s3786_s0 + $0x18] sm:$0xff]  }
   0x3   :  { %2300 = vmatpush3.bf16.msra.mxu0 %v2383_v0  ;;  %2303 = vmatprep.mubr.msk.bf16.mxu0 %vm153_vm0, %v2385_v2  ;;  %v2389_v6 = vld [vmem:[%s3786_s0 + $0x20] sm:$0xff]  }
   0x4   :  { %2301 = vmatprep.subr.bf16.mxu0 %v2384_v1  ;;  %v2262_v7 = vld [vmem:[%s3790_s4] ss:$0 sm:$0xff] }
   0x7   :  { %2302 = vmatpush3.bf16.msra.mxu0 %v2384_v1 }
   0xa   :  { %2304 = vmatmul.mubr.msk.bf16.vlgmr.msra.gmra.mxu0 %vm153_vm0, %v2386_v3 }
   0xb   :  { %2307 = vmatprep.mubr.msk.bf16.mxu0 %vm153_vm0, %v2387_v4 }
  0x12   :  { %2308 = vmatmul.mubr.msk.bf16.gmra.mxu0 %vm153_vm0, %v2388_v5 }
  0x13   :  { %13 = vsyncpa [#allocation5], 0  ;;  %2311 = vmatprep.mubr.msk.bf16.mxu0 %vm153_vm0, %v2389_v6  ;;  %604 = vbcast.lane.b32.xlu0 %v2262_v7, 256  ;;  %v2390_v8 = vld [vmem:[%s3786_s0 + $0x28] sm:$0xff]   ;;  %v2391_v9 = vld [vmem:[%s3786_s0 + $0x30] sm:$0xff]   ;;  %v376_v21 = vlaneseq  ;;  %vm500_vm1 = vcmask 392192  }
  0x14   :  { %608 = vbcast.lane.b32.xlu1 %v2262_v7, 264  ;;  %v2392_v10 = vld [vmem:[%s3786_s0 + $0x38] sm:$0xff]   ;;  %v2393_v11 = vld [vmem:[%s3786_s0 + $0x40] sm:$0xff]   ;;  %v2394_v12 = vld [vmem:[%s3786_s0 + $0x48] sm:$0xff]   ;;  %v2527_v19 = vmov 1966171168  }
  0x15   :  { %v2395_v13 = vld [vmem:[%s3786_s0 + $0x50] sm:$0xff]   ;;  %v2396_v14 = vld [vmem:[%s3786_s0 + $0x58] sm:$0xff]   ;;  %v2397_v15 = vld [vmem:[%s3786_s0 + $0x60] sm:$0xff]   ;;  %v374_v20 = vunpack.c.l.s4 %v2527_v19  ;;  %v2642_v23 = vshrl.u32 %v376_v21, 7  ;;  %v2528_v62 = vmov 0   ;;  %vm3825_vm2 = vcmask 130112  }
  0x16   :  { %v2398_v16 = vld [vmem:[%s3786_s0 + $0x68] sm:$0xff]   ;;  %v2399_v17 = vld [vmem:[%s3786_s0 + $0x70] sm:$0xff]   ;;  %v2400_v18 = vld [vmem:[%s3786_s0 + $0x78] sm:$0xff]   ;;  %2381 = vset.pattern.permute.xlu1 %v2528_v62  ;;  %2382 = vset.pattern.permute.xlu0 %v2528_v62  ;;  %vm860_vm3 = vcmask 195712   ;;  %vm867_vm4 = vcmask 261312   ;;  %vm874_vm5 = vcmask 326912  }
  0x17   :  { %612 = vbcast.lane.b32.xlu0 %v2262_v7, 272  ;;  %v375_v22 = vunpack.c.0.s8 %v374_v20  ;;  %v2260_v25 = vld.sshfl [vmem:[%s3787_s1] sm:$0x11 pattern:$0x75316420]  ;;  %v2649_v27 = vsub.s32 0, %v2642_v23 }
  0x18   :  { %616 = vbcast.lane.b32.xlu1 %v2262_v7, 280  ;;  %v2658_v32 = vld [vmem:[%s3789_s3] ss:$0 sm:$0xff]  ;;  %v372_v0 = vcombine.high %v2260_v25, %v2260_v25  ;;  %vm881_vm6 = vcmask 392512   ;;  %vm888_vm7 = vcmask 458112   ;;  %vm895_vm8 = vcmask 523712  }
  0x19   :  { %v378_v24 = vsub.s32 %v375_v22, %v2642_v23  ;;  %vm902_vm9 = vcmask 589312   ;;  %vm909_vm10 = vcmask 654912   ;;  %vm916_vm11 = vcmask 720512  }
  0x1a   :  { %2312 = vmatmul.mubr.msk.bf16.gmra.mxu0 %vm153_vm0, %v2390_v8  ;;  %vm3807_vm12 = vcmask 786112   ;;  %vm930_vm13 = vcmask 851712   ;;  %vm937_vm14 = vcmask 917312   ;;  %vm944_vm15 = vcmask 982912  }
  0x1b   :  { %2315 = vmatprep.mubr.msk.bf16.mxu0 %vm153_vm0, %v2391_v9  ;;  %620 = vbcast.lane.b32.xlu0 %v2262_v7, 288  ;;  %v379_v26 = vrot.slane %v2260_v25, %v378_v24  ;;  %v386_v8 = vrot.slane %v372_v0, %v378_v24 }
  0x1c   :  { %624 = vbcast.lane.b32.xlu1 %v2262_v7, 296 }
  0x1d   :  { %v2652_v28 = vrot.slane %v379_v26, %v2649_v27 }
  0x1f   :  { %628 = vbcast.lane.b32.xlu0 %v2262_v7, 304 }
  0x20   :  { %632 = vbcast.lane.b32.xlu1 %v2262_v7, 312 }
  0x22   :  { %2316 = vmatmul.mubr.msk.bf16.gmra.mxu0 %vm153_vm0, %v2392_v10 }
  0x23   :  { %2319 = vmatprep.mubr.msk.bf16.mxu0 %vm153_vm0, %v2393_v11  ;;  %636 = vbcast.lane.b32.xlu0 %v2262_v7, 320 }
  0x24   :  { %640 = vbcast.lane.b32.xlu1 %v2262_v7, 328 }
  0x27   :  { %644 = vbcast.lane.b32.xlu0 %v2262_v7, 336 }
  0x28   :  { %648 = vbcast.lane.b32.xlu1 %v2262_v7, 344 }
  0x2a   :  { %2320 = vmatmul.mubr.msk.bf16.gmra.mxu0 %vm153_vm0, %v2394_v12 }
  0x2b   :  { %2323 = vmatprep.mubr.msk.bf16.mxu0 %vm153_vm0, %v2395_v13  ;;  %652 = vbcast.lane.b32.xlu0 %v2262_v7, 352 }
  0x2c   :  { %656 = vbcast.lane.b32.xlu1 %v2262_v7, 360 }
  0x2f   :  { %660 = vbcast.lane.b32.xlu0 %v2262_v7, 368 }
  0x30   :  { %664 = vbcast.lane.b32.xlu1 %v2262_v7, 376 }
  0x32   :  { %2324 = vmatmul.mubr.msk.bf16.gmra.mxu0 %vm153_vm0, %v2396_v14 }
  0x33   :  { %2327 = vmatprep.mubr.msk.bf16.mxu0 %vm153_vm0, %v2397_v15 }
  0x3a   :  { %2328 = vmatmul.mubr.msk.bf16.gmra.mxu0 %vm153_vm0, %v2398_v16 }
  0x3b   :  { %2331 = vmatprep.mubr.msk.bf16.mxu0 %vm153_vm0, %v2399_v17 }
  0x42   :  { %2332 = vmatmul.mubr.msk.bf16.gmra.mxu0 %vm153_vm0, %v2400_v18  ;;  %v2685_v18 = vrot.slane %v386_v8, %v2649_v27  ;;  %vm951_vm0 = vcmask 1048512  }
  0xca   :  { %v2305_v29 = vpop.f32.mrf.mxu0 }
  0xcb   :  { %v399_v30 = vadd.f32 %v2305_v29, %v2652_v28 }
  0xcc   :  { %v236_v31 = vpop.f32.mrf.mxu0 }
  0xcd   :  { %v431_v33 = vmax.f32 %v399_v30, 0.0  ;;  %v397_v34 = vadd.f32 %v2652_v28, %v236_v31 }
  0xce   :  { %v2306_v35 = vpop.f32.mrf.mxu0 }
  0xcf   :  { %v429_v36 = vmax.f32 %v397_v34, 0.0  ;;  %v400_v37 = vadd.f32 %v2306_v35, %v2652_v28  ;;  %v470_v38 = vmul.f32 %v2658_v32, %v431_v33 }
  0xd0   :  { %v239_v39 = vpop.f32.mrf.mxu0 }
  0xd1   :  { %v432_v40 = vmax.f32 %v400_v37, 0.0  ;;  %v398_v41 = vadd.f32 %v2652_v28, %v239_v39  ;;  %v507_v42 = vsel %vm500_vm1, %v470_v38, 0.0  ;;  %v468_v43 = vmul.f32 %v2658_v32, %v429_v36 }
  0xd2   :  { %508 = vadd.xlane.f32.xlu0 %v507_v42  ;;  %v2309_v44 = vpop.f32.mrf.mxu0 }
  0xd3   :  { %v430_v46 = vmax.f32 %v398_v41, 0.0  ;;  %v403_v47 = vadd.f32 %v2309_v44, %v2652_v28  ;;  %v501_v48 = vsel %vm500_vm1, %v468_v43, 0.0  ;;  %v471_v49 = vmul.f32 %v2658_v32, %v432_v40 }
  0xd4   :  { %v252_v45 = vpop.f32.mrf.mxu0 }
  0xd5   :  { %v435_v52 = vmax.f32 %v403_v47, 0.0  ;;  %v401_v53 = vadd.f32 %v2652_v28, %v252_v45  ;;  %v510_v54 = vsel %vm500_vm1, %v471_v49, 0.0  ;;  %v469_v55 = vmul.f32 %v2658_v32, %v430_v46 }
  0xd6   :  { %502 = vadd.xlane.f32.xlu0 %v501_v48  ;;  %v2310_v50 = vpop.f32.mrf.mxu0 }
  0xd7   :  { %v433_v58 = vmax.f32 %v401_v53, 0.0  ;;  %v404_v59 = vadd.f32 %v2310_v50, %v2652_v28  ;;  %v504_v60 = vsel %vm500_vm1, %v469_v55, 0.0  ;;  %v474_v61 = vmul.f32 %v2658_v32, %v435_v52 }
  0xd8   :  { %v255_v51 = vpop.f32.mrf.mxu0 }
  0xd9   :  { %v436_v2 = vmax.f32 %v404_v59, 0.0  ;;  %v402_v3 = vadd.f32 %v2652_v28, %v255_v51  ;;  %v519_v4 = vsel %vm500_vm1, %v474_v61, 0.0  ;;  %v472_v5 = vmul.f32 %v2658_v32, %v433_v58 }
  0xda   :  { %511 = vadd.xlane.f32.xlu0 %v510_v54  ;;  %v2313_v56 = vpop.f32.mrf.mxu0 }
  0xdb   :  { %v407_v9 = vadd.f32 %v2313_v56, %v2652_v28  ;;  %v434_v11 = vmax.f32 %v402_v3, 0.0  ;;  %v513_v13 = vsel %vm500_vm1, %v472_v5, 0.0  ;;  %v475_v14 = vmul.f32 %v2658_v32, %v436_v2 }
  0xdc   :  { %v268_v57 = vpop.f32.mrf.mxu0 }
  0xdd   :  { %v439_v19 = vmax.f32 %v407_v9, 0.0  ;;  %v405_v20 = vadd.f32 %v2652_v28, %v268_v57  ;;  %v522_v25 = vsel %vm500_vm1, %v475_v14, 0.0  ;;  %v473_v29 = vmul.f32 %v2658_v32, %v434_v11 }
  0xde   :  { %505 = vadd.xlane.f32.xlu0 %v504_v60  ;;  %v2314_v63 = vpop.f32.mrf.mxu0 }
  0xdf   :  { %v437_v34 = vmax.f32 %v405_v20, 0.0  ;;  %v408_v35 = vadd.f32 %v2314_v63, %v2652_v28  ;;  %v478_v37 = vmul.f32 %v2658_v32, %v439_v19  ;;  %v516_v40 = vsel %vm500_vm1, %v473_v29, 0.0 }
  0xe0   :  { %v271_v1 = vpop.f32.mrf.mxu0 }
  0xe1   :  { %v440_v46 = vmax.f32 %v408_v35, 0.0  ;;  %v406_v47 = vadd.f32 %v2652_v28, %v271_v1  ;;  %v531_v49 = vsel %vm500_vm1, %v478_v37, 0.0  ;;  %v476_v50 = vmul.f32 %v2658_v32, %v437_v34 }
  0xe2   :  { %520 = vadd.xlane.f32.xlu0 %v519_v4  ;;  %v2317_v6 = vpop.f32.mrf.mxu0 }
  0xe3   :  { %v411_v7 = vadd.f32 %v2317_v6, %v2652_v28  ;;  %v438_v58 = vmax.f32 %v406_v47, 0.0  ;;  %v525_v60 = vsel %vm500_vm1, %v476_v50, 0.0  ;;  %v479_v63 = vmul.f32 %v2658_v32, %v440_v46 }
  0xe4   :  { %v284_v10 = vpop.f32.mrf.mxu0 }
  0xe5   :  { %v443_v12 = vmax.f32 %v411_v7, 0.0  ;;  %v409_v55 = vadd.f32 %v2652_v28, %v284_v10  ;;  %v534_v7 = vsel %vm500_vm1, %v479_v63, 0.0  ;;  %v477_v9 = vmul.f32 %v2658_v32, %v438_v58 }
  0xe6   :  { %514 = vadd.xlane.f32.xlu0 %v513_v13  ;;  %v2318_v15 = vpop.f32.mrf.mxu0 }
  0xe7   :  { %v412_v16 = vadd.f32 %v2318_v15, %v2652_v28  ;;  %v482_v17 = vmul.f32 %v2658_v32, %v443_v12  ;;  %v441_v1 = vmax.f32 %v409_v55, 0.0 }
  0xe8   :  { %v287_v22 = vpop.f32.mrf.mxu0 }
  0xe9   :  { %v444_v24 = vmax.f32 %v412_v16, 0.0  ;;  %v543_v26 = vsel %vm500_vm1, %v482_v17, 0.0  ;;  %v410_v4 = vadd.f32 %v2652_v28, %v287_v22  ;;  %v480_v12 = vmul.f32 %v2658_v32, %v441_v1 }
  0xea   :  { %523 = vadd.xlane.f32.xlu0 %v522_v25  ;;  %544 = vadd.xlane.f32.xlu1 %v543_v26  ;;  %v2321_v30 = vpop.f32.mrf.mxu0  ;;  %v528_v22 = vsel %vm500_vm1, %v477_v9, 0.0 }
  0xeb   :  { %v415_v31 = vadd.f32 %v2321_v30, %v2685_v18  ;;  %v483_v33 = vmul.f32 %v2658_v32, %v444_v24  ;;  %v442_v14 = vmax.f32 %v410_v4, 0.0  ;;  %v537_v26 = vsel %vm500_vm1, %v480_v12, 0.0 }
  0xec   :  { %v300_v36 = vpop.f32.mrf.mxu0 }
  0xed   :  { %v447_v38 = vmax.f32 %v415_v31, 0.0  ;;  %v413_v39 = vadd.f32 %v2685_v18, %v300_v36  ;;  %v546_v41 = vsel %vm500_vm1, %v483_v33, 0.0  ;;  %v481_v37 = vmul.f32 %v2658_v32, %v442_v14  ;;  %v609_v14 = vpop.permute.xlu1 %608 }
  0xee   :  { %517 = vadd.xlane.f32.xlu0 %v516_v40  ;;  %547 = vadd.xlane.f32.xlu1 %v546_v41  ;;  %v2322_v42 = vpop.f32.mrf.mxu0 }
  0xef   :  { %v445_v43 = vmax.f32 %v413_v39, 0.0  ;;  %v416_v44 = vadd.f32 %v2322_v42, %v2685_v18  ;;  %v486_v45 = vmul.f32 %v2658_v32, %v447_v38 }
  0xf0   :  { %v303_v48 = vpop.f32.mrf.mxu0 }
  0xf1   :  { %v448_v51 = vmax.f32 %v416_v44, 0.0  ;;  %v414_v52 = vadd.f32 %v2685_v18, %v303_v48  ;;  %v555_v53 = vsel %vm500_vm1, %v486_v45, 0.0  ;;  %v484_v54 = vmul.f32 %v2658_v32, %v445_v43 }
  0xf2   :  { %532 = vadd.xlane.f32.xlu0 %v531_v49  ;;  %556 = vadd.xlane.f32.xlu1 %v555_v53  ;;  %v2325_v56 = vpop.f32.mrf.mxu0  ;;  %v540_v49 = vsel %vm500_vm1, %v481_v37, 0.0 }
  0xf3   :  { %v419_v57 = vadd.f32 %v2325_v56, %v2685_v18  ;;  %v446_v61 = vmax.f32 %v414_v52, 0.0  ;;  %v549_v62 = vsel %vm500_vm1, %v484_v54, 0.0  ;;  %v487_v0 = vmul.f32 %v2658_v32, %v448_v51 }
  0xf4   :  { %v316_v59 = vpop.f32.mrf.mxu0 }
  0xf5   :  { %v451_v3 = vmax.f32 %v419_v57, 0.0  ;;  %v417_v5 = vadd.f32 %v2685_v18, %v316_v59  ;;  %v558_v8 = vsel %vm500_vm1, %v487_v0, 0.0  ;;  %v485_v10 = vmul.f32 %v2658_v32, %v446_v61 }
  0xf6   :  { %526 = vadd.xlane.f32.xlu0 %v525_v60  ;;  %550 = vadd.xlane.f32.xlu1 %v549_v62  ;;  %v2326_v2 = vpop.f32.mrf.mxu0 }
  0xf7   :  { %v490_v28 = vmul.f32 %v2658_v32, %v451_v3  ;;  %v449_v15 = vmax.f32 %v417_v5, 0.0  ;;  %v420_v16 = vadd.f32 %v2326_v2, %v2685_v18  ;;  %v552_v24 = vsel %vm500_vm1, %v485_v10, 0.0 }
  0xf8   :  { %v319_v6 = vpop.f32.mrf.mxu0 }
  0xf9   :  { %v567_v31 = vsel %vm500_vm1, %v490_v28, 0.0  ;;  %v452_v34 = vmax.f32 %v420_v16, 0.0  ;;  %v418_v35 = vadd.f32 %v2685_v18, %v319_v6  ;;  %v488_v38 = vmul.f32 %v2658_v32, %v449_v15 }
  0xfa   :  { %535 = vadd.xlane.f32.xlu0 %v534_v7  ;;  %559 = vadd.xlane.f32.xlu1 %v558_v8  ;;  %v2329_v11 = vpop.f32.mrf.mxu0 }
  0xfb   :  { %v423_v13 = vadd.f32 %v2329_v11, %v2685_v18  ;;  %v450_v48 = vmax.f32 %v418_v35, 0.0  ;;  %v561_v50 = vsel %vm500_vm1, %v488_v38, 0.0  ;;  %v491_v51 = vmul.f32 %v2658_v32, %v452_v34 }
  0xfc   :  { %v332_v17 = vpop.f32.mrf.mxu0 }
  0xfd   :  { %v455_v19 = vmax.f32 %v423_v13, 0.0  ;;  %v421_v20 = vadd.f32 %v2685_v18, %v332_v17  ;;  %v570_v62 = vsel %vm500_vm1, %v491_v51, 0.0  ;;  %v489_v63 = vmul.f32 %v2658_v32, %v450_v48 }
  0xfe   :  { %529 = vadd.xlane.f32.xlu0 %v528_v22  ;;  %553 = vadd.xlane.f32.xlu1 %v552_v24  ;;  %v2330_v25 = vpop.f32.mrf.mxu0 }
  0xff   :  { %v453_v29 = vmax.f32 %v421_v20, 0.0  ;;  %v424_v30 = vadd.f32 %v2330_v25, %v2685_v18  ;;  %v494_v33 = vmul.f32 %v2658_v32, %v455_v19  ;;  %v564_v8 = vsel %vm500_vm1, %v489_v63, 0.0 }
 0x100   :  { %v335_v36 = vpop.f32.mrf.mxu0 }
 0x101   :  { %v456_v39 = vmax.f32 %v424_v30, 0.0  ;;  %v422_v40 = vadd.f32 %v2685_v18, %v335_v36  ;;  %v579_v41 = vsel %vm500_vm1, %v494_v33, 0.0  ;;  %v492_v42 = vmul.f32 %v2658_v32, %v453_v29 }
 0x102   :  { %538 = vadd.xlane.f32.xlu0 %v537_v26  ;;  %568 = vadd.xlane.f32.xlu1 %v567_v31  ;;  %v2333_v43 = vpop.f32.mrf.mxu0 }
 0x103   :  { %v454_v44 = vmax.f32 %v422_v40, 0.0  ;;  %v427_v45 = vadd.f32 %v2333_v43, %v2685_v18  ;;  %v573_v46 = vsel %vm500_vm1, %v492_v42, 0.0  ;;  %v495_v47 = vmul.f32 %v2658_v32, %v456_v39 }
 0x104   :  { %v348_v52 = vpop.f32.mrf.mxu0 }
 0x105   :  { %v459_v53 = vmax.f32 %v427_v45, 0.0  ;;  %v425_v54 = vadd.f32 %v2685_v18, %v348_v52  ;;  %v582_v55 = vsel %vm500_vm1, %v495_v47, 0.0  ;;  %v493_v56 = vmul.f32 %v2658_v32, %v454_v44 }
 0x106   :  { %541 = vadd.xlane.f32.xlu0 %v540_v49  ;;  %562 = vadd.xlane.f32.xlu1 %v561_v50  ;;  %v2334_v57 = vpop.f32.mrf.mxu0 }
 0x107   :  { %v498_v58 = vmul.f32 %v2658_v32, %v459_v53  ;;  %v457_v59 = vmax.f32 %v425_v54, 0.0  ;;  %v428_v60 = vadd.f32 %v2334_v57, %v2685_v18  ;;  %v576_v61 = vsel %vm500_vm1, %v493_v56, 0.0 }
 0x108   :  { %v351_v0 = vpop.f32.mrf.mxu0 }
 0x109   :  { %v591_v1 = vsel %vm500_vm1, %v498_v58, 0.0  ;;  %v460_v2 = vmax.f32 %v428_v60, 0.0  ;;  %v426_v3 = vadd.f32 %v2685_v18, %v351_v0  ;;  %v496_v4 = vmul.f32 %v2658_v32, %v457_v59  ;;  %v2758_v18 = vpop.permute.xlu0 %604 }
 0x10a   :  { %571 = vadd.xlane.f32.xlu1 %v570_v62  ;;  %592 = vadd.xlane.f32.xlu0 %v591_v1 }
 0x10b   :  { %v458_v5 = vmax.f32 %v426_v3, 0.0  ;;  %v585_v6 = vsel %vm500_vm1, %v496_v4, 0.0  ;;  %v499_v7 = vmul.f32 %v2658_v32, %v460_v2 }
 0x10d   :  { %v594_v9 = vsel %vm500_vm1, %v499_v7, 0.0  ;;  %v497_v10 = vmul.f32 %v2658_v32, %v458_v5  ;;  %v613_v12 = vpop.permute.xlu0 %612  ;;  %v617_v32 = vpop.permute.xlu1 %616 }
 0x10e   :  { %565 = vadd.xlane.f32.xlu1 %v564_v8 }
 0x10f   :  { %v588_v11 = vsel %vm500_vm1, %v497_v10, 0.0  ;;  %vm1032_vm1 = vcmask 1041409  }
 0x111   :  { %v2760_v13 = vpop.permute.xlu0 %620  ;;  %v2768_v17 = vpop.permute.xlu1 %624 }
 0x112   :  { %580 = vadd.xlane.f32.xlu1 %v579_v41 }
 0x115   :  { %v2762_v28 = vpop.permute.xlu0 %628  ;;  %v2772_v20 = vpop.permute.xlu1 %632 }
 0x116   :  { %574 = vadd.xlane.f32.xlu1 %v573_v46 }
 0x119   :  { %v2764_v15 = vpop.permute.xlu0 %636  ;;  %v2778_v26 = vpop.permute.xlu1 %640 }
 0x11a   :  { %583 = vadd.xlane.f32.xlu1 %v582_v55 }
 0x11d   :  { %v2766_v16 = vpop.permute.xlu0 %644  ;;  %v2785_v31 = vpop.permute.xlu1 %648 }
 0x11e   :  { %577 = vadd.xlane.f32.xlu1 %v576_v61 }
 0x121   :  { %v2770_v19 = vpop.permute.xlu0 %652  ;;  %v2792_v37 = vpop.permute.xlu1 %656 }
 0x122   :  { %586 = vadd.xlane.f32.xlu1 %v585_v6 }
 0x125   :  { %v2774_v22 = vpop.permute.xlu0 %660  ;;  %v2799_v40 = vpop.permute.xlu1 %664 }
 0x126   :  { %595 = vadd.xlane.f32.xlu1 %v594_v9 }
 0x12a   :  { %589 = vadd.xlane.f32.xlu1 %v588_v11 }
 0x15b   :  { %v509_v24 = vpop.xlane.xlu0 %508 }
 0x15c   :  { %v2776_v25 = vadd.f32 %v613_v12, %v509_v24 }
 0x15e   :  { %753 = vperm.xlu1 %2381, %v2776_v25  }
 0x15f   :  { %v503_v29 = vpop.xlane.xlu0 %502 }
 0x160   :  { %v2782_v30 = vadd.f32 %v2758_v18, %v503_v29 }
 0x162   :  { %747 = vperm.xlu0 %2382, %v2782_v30  }
 0x163   :  { %v512_v33 = vpop.xlane.xlu0 %511 }
 0x164   :  { %v2787_v34 = vadd.f32 %v617_v32, %v512_v33 }
 0x166   :  { %756 = vperm.xlu1 %2381, %v2787_v34  }
 0x167   :  { %v506_v35 = vpop.xlane.xlu0 %505 }
 0x168   :  { %v2790_v36 = vadd.f32 %v609_v14, %v506_v35 }
 0x16a   :  { %750 = vperm.xlu1 %2381, %v2790_v36  }
 0x16b   :  { %v521_v38 = vpop.xlane.xlu0 %520 }
 0x16c   :  { %v2796_v39 = vadd.f32 %v2762_v28, %v521_v38 }
 0x16e   :  { %765 = vperm.xlu1 %2381, %v2796_v39  }
 0x16f   :  { %v515_v41 = vpop.xlane.xlu0 %514 }
 0x170   :  { %v2802_v42 = vadd.f32 %v2760_v13, %v515_v41 }
 0x172   :  { %759 = vperm.xlu1 %2381, %v2802_v42  }
 0x173   :  { %v524_v43 = vpop.xlane.xlu0 %523  ;;  %v545_v44 = vpop.xlane.xlu1 %544 }
 0x174   :  { %v2806_v45 = vadd.f32 %v2772_v20, %v524_v43 }
 0x176   :  { %768 = vperm.xlu1 %2381, %v2806_v45  }
 0x177   :  { %v518_v46 = vpop.xlane.xlu0 %517  ;;  %v548_v47 = vpop.xlane.xlu1 %547 }
 0x178   :  { %v2810_v48 = vadd.f32 %v2768_v17, %v518_v46 }
 0x17a   :  { %762 = vperm.xlu1 %2381, %v2810_v48  }
 0x17b   :  { %v533_v49 = vpop.xlane.xlu0 %532  ;;  %v557_v50 = vpop.xlane.xlu1 %556 }
 0x17c   :  { %v2814_v51 = vadd.f32 %v2766_v16, %v533_v49  ;;  %v2816_v52 = vadd.f32 %v613_v12, %v557_v50 }
 0x17e   :  { %3828 = vst [vmem:[#allocation8_spill] sm:$0xff] %v2814_v51  ;;  %801 = vperm.xlu0 %2382, %v2816_v52   ;;  %777 = vperm.xlu1 %2381, %v2814_v51  }
 0x17f   :  { %v527_v53 = vpop.xlane.xlu0 %526  ;;  %v551_v54 = vpop.xlane.xlu1 %550 }
 0x180   :  { %v2821_v55 = vadd.f32 %v2764_v15, %v527_v53  ;;  %v2839_v2 = vadd.f32 %v2758_v18, %v551_v54  ;;  %v2863_v18 = vadd.f32 %v2774_v22, %v545_v44 }
 0x182   :  { %771 = vperm.xlu1 %2381, %v2821_v55   ;;  %3832 = vst [vmem:[#allocation12_spill] sm:$0xff] %v2863_v18 }
 0x183   :  { %v536_v56 = vpop.xlane.xlu0 %535  ;;  %v560_v57 = vpop.xlane.xlu1 %559 }
 0x184   :  { %v2825_v58 = vadd.f32 %v2785_v31, %v536_v56  ;;  %v2827_v59 = vadd.f32 %v617_v32, %v560_v57 }
 0x186   :  { %3829 = vst [vmem:[#allocation9_spill] sm:$0xff] %v2825_v58  ;;  %804 = vperm.xlu0 %2382, %v2827_v59   ;;  %780 = vperm.xlu1 %2381, %v2825_v58  }
 0x187   :  { %v530_v60 = vpop.xlane.xlu0 %529  ;;  %v554_v61 = vpop.xlane.xlu1 %553 }
 0x188   :  { %v2832_v62 = vadd.f32 %v2778_v26, %v530_v60  ;;  %v2834_v63 = vadd.f32 %v609_v14, %v554_v61 }
 0x18a   :  { %798 = vperm.xlu0 %2382, %v2834_v63   ;;  %774 = vperm.xlu1 %2381, %v2832_v62  }
 0x18b   :  { %v539_v0 = vpop.xlane.xlu0 %538  ;;  %v569_v1 = vpop.xlane.xlu1 %568 }
 0x18c   :  { %v2842_v3 = vadd.f32 %v2762_v28, %v569_v1  ;;  %v2847_v5 = vadd.f32 %v2770_v19, %v539_v0  ;;  %v2871_v28 = vadd.f32 %v2799_v40, %v548_v47 }
 0x18e   :  { %813 = vperm.xlu0 %2382, %v2842_v3   ;;  %795 = vperm.xlu1 %2381, %v2839_v2   ;;  %3830 = vst [vmem:[#allocation10_spill] sm:$0xff] %v2847_v5  ;;  %3833 = vst [vmem:[#allocation13_spill] sm:$0xff] %v2871_v28 }
 0x18f   :  { %v563_v4 = vpop.xlane.xlu1 %562  ;;  %v542_v7 = vpop.xlane.xlu0 %541 }
 0x190   :  { %v2850_v6 = vadd.f32 %v2760_v13, %v563_v4  ;;  %v2855_v9 = vadd.f32 %v2792_v37, %v542_v7  ;;  %v2927_v4 = vand.u32 127, %v376_v21 }
 0x192   :  { %807 = vperm.xlu0 %2382, %v2850_v6   ;;  %783 = vperm.xlu1 %2381, %v2847_v5   ;;  %3831 = vst [vmem:[#allocation11_spill] sm:$0xff] %v2855_v9  ;;  %v862_v21 = vadd.s32 4294967272, %v2927_v4 }
 0x193   :  { %v572_v8 = vpop.xlane.xlu1 %571  ;;  %v593_v33 = vpop.xlane.xlu0 %592 }
 0x194   :  { %v2858_v10 = vadd.f32 %v2772_v20, %v572_v8  ;;  %v2891_v38 = vadd.f32 %v2774_v22, %v593_v33  ;;  %v848_v8 = vadd.s32 4294967288, %v2927_v4 }
 0x196   :  { %816 = vperm.xlu0 %2382, %v2858_v10   ;;  %786 = vperm.xlu1 %2381, %v2855_v9   ;;  %v876_v9 = vadd.s32 4294967256, %v2927_v4 }
 0x197   :  { %v566_v11 = vpop.xlane.xlu1 %565 }
 0x198   :  { %v2866_v12 = vadd.f32 %v2768_v17, %v566_v11 }
 0x19a   :  { %810 = vperm.xlu0 %2382, %v2866_v12   ;;  %789 = vperm.xlu1 %2381, %v2863_v18  }
 0x19b   :  { %v581_v13 = vpop.xlane.xlu1 %580 }
 0x19c   :  { %v2874_v14 = vadd.f32 %v2766_v16, %v581_v13  ;;  %v2934_v13 = vsub.s32 %v2927_v4, %v2642_v23 }
 0x19e   :  { %825 = vperm.xlu0 %2382, %v2874_v14   ;;  %792 = vperm.xlu1 %2381, %v2871_v28   ;;  %3834 = vst [vmem:[#allocation14_spill] sm:$0xff] %v2934_v13 }
 0x19f   :  { %v575_v32 = vpop.xlane.xlu1 %574 }
 0x1a0   :  { %v2879_v20 = vadd.f32 %v2764_v15, %v575_v32  ;;  %v855_v32 = vadd.s32 4294967280, %v2927_v4 }
 0x1a2   :  { %819 = vperm.xlu0 %2382, %v2879_v20  }
 0x1a3   :  { %v584_v17 = vpop.xlane.xlu1 %583 }
 0x1a4   :  { %v2883_v24 = vadd.f32 %v2785_v31, %v584_v17 }
 0x1a6   :  { %828 = vperm.xlu0 %2382, %v2883_v24  }
 0x1a7   :  { %v578_v29 = vpop.xlane.xlu1 %577 }
 0x1a8   :  { %v2887_v16 = vadd.f32 %v2778_v26, %v578_v29  ;;  %v2938_v29 = vsub.s32 %v848_v8, %v2642_v23 }
 0x1aa   :  { %822 = vperm.xlu0 %2382, %v2887_v16   ;;  %3835 = vst [vmem:[#allocation15_spill] sm:$0xff] %v2938_v29 }
 0x1ab   :  { %v587_v35 = vpop.xlane.xlu1 %586 }
 0x1ac   :  { %v2895_v41 = vadd.f32 %v2770_v19, %v587_v35 }
 0x1ae   :  { %837 = vperm.xlu0 %2382, %v2891_v38  }
 0x1af   :  { %v596_v15 = vpop.xlane.xlu1 %595 }
 0x1b0   :  { %v2903_v26 = vadd.f32 %v2799_v40, %v596_v15  ;;  %v2944_v15 = vsub.s32 %v855_v32, %v2642_v23 }
 0x1b2   :  { %831 = vperm.xlu0 %2382, %v2895_v41  }
 0x1b3   :  { %v590_v31 = vpop.xlane.xlu1 %589 }
 0x1b4   :  { %v2899_v43 = vadd.f32 %v2792_v37, %v590_v31  ;;  %v869_v31 = vadd.s32 4294967264, %v2927_v4 }
 0x1b6   :  { %834 = vperm.xlu0 %2382, %v2899_v43   ;;  %v2958_v32 = vsub.s32 %v869_v31, %v2642_v23 }
 0x1b8   :  { %3836 = vst [vmem:[#allocation16_spill] sm:$0xff] %v2958_v32 }
 0x1ba   :  { %840 = vperm.xlu0 %2382, %v2903_v26  }
 0x1d9   :  { %v754_v22 = vpop.permute.xlu1 %753 }
 0x1dd   :  { %v748_v37 = vpop.permute.xlu0 %747 }
 0x1de   :  { %v847_v5 = vrot.slane %v748_v37, %v2934_v13  ;;  %v883_v37 = vadd.s32 4294967248, %v2927_v4 }
 0x1e1   :  { %v2906_v44 = vpop.permute.xlu1 %756 }
 0x1e5   :  { %v751_v46 = vpop.permute.xlu1 %750 }
 0x1e6   :  { %v852_v18 = vrot.slane %v751_v46, %v2938_v29 }
 0x1e8   :  { %v854_v46 = vsel %vm3825_vm2, %v852_v18, %v847_v5  ;;  %v897_v18 = vadd.s32 4294967232, %v2927_v4 }
 0x1e9   :  { %v2908_v47 = vpop.permute.xlu1 %765 }
 0x1ed   :  { %v2910_v19 = vpop.permute.xlu1 %759 }
 0x1f1   :  { %v2912_v49 = vpop.permute.xlu1 %768 }
 0x1f5   :  { %v2914_v50 = vpop.permute.xlu1 %762 }
 0x1f9   :  { %v2916_v53 = vpop.permute.xlu1 %777  ;;  %v802_v54 = vpop.permute.xlu0 %801 }
 0x1fd   :  { %v2918_v40 = vpop.permute.xlu1 %771 }
 0x201   :  { %v805_v56 = vpop.permute.xlu0 %804  ;;  %v2920_v60 = vpop.permute.xlu1 %780 }
 0x205   :  { %v799_v57 = vpop.permute.xlu0 %798  ;;  %v2924_v0 = vpop.permute.xlu1 %774 }
 0x206   :  { %v960_v35 = vrot.slane %v799_v57, %v2938_v29  ;;  %v2955_v57 = vsub.s32 %v862_v21, %v2642_v23  ;;  %v2963_v29 = vsub.s32 %v876_v9, %v2642_v23  ;;  %v873_v9 = vrot.slane %v2910_v19, %v2958_v32 }
 0x208   :  { %3837 = vst [vmem:[#allocation17_spill] sm:$0xff] %v2963_v29 }
 0x209   :  { %v2922_v61 = vpop.permute.xlu0 %813  ;;  %v796_v11 = vpop.permute.xlu1 %795 }
 0x20a   :  { %v956_v33 = vrot.slane %v796_v11, %v2934_v13  ;;  %v965_v11 = vrot.slane %v802_v54, %v2944_v15  ;;  %v859_v54 = vrot.slane %v754_v22, %v2944_v15 }
 0x20c   :  { %v961_v8 = vsel %vm3825_vm2, %v960_v35, %v956_v33  ;;  %v970_v33 = vrot.slane %v805_v56, %v2955_v57  ;;  %v861_v5 = vsel %vm860_vm3, %v859_v54, %v854_v46  ;;  %v866_v56 = vrot.slane %v2906_v44, %v2955_v57 }
 0x20d   :  { %v808_v1 = vpop.permute.xlu0 %807  ;;  %v966_v58 = vsel %vm860_vm3, %v965_v11, %v961_v8  ;;  %v2969_v35 = vpop.permute.xlu1 %783  ;;  %v2986_v11 = vsub.s32 %v883_v37, %v2642_v23  ;;  %v2993_v44 = vsub.s32 %v897_v18, %v2642_v23 }
 0x20e   :  { %v975_v21 = vrot.slane %v808_v1, %v2958_v32  ;;  %v971_v31 = vsel %vm867_vm4, %v970_v33, %v966_v58  ;;  %v890_v1 = vadd.s32 4294967240, %v2927_v4  ;;  %v880_v58 = vrot.slane %v2914_v50, %v2963_v29 }
 0x20f   :  { %v868_v46 = vsel %vm867_vm4, %v866_v56, %v861_v5  ;;  %v985_v50 = vrot.slane %v2922_v61, %v2986_v11  ;;  %v911_v5 = vadd.s32 4294967216, %v2927_v4 }
 0x210   :  { %v976_v19 = vsel %vm874_vm5, %v975_v21, %v971_v31  ;;  %v875_v54 = vsel %vm874_vm5, %v873_v9, %v868_v46  ;;  %v3000_v37 = vsub.s32 %v890_v1, %v2642_v23 }
 0x211   :  { %v2929_v7 = vpop.permute.xlu0 %816  ;;  %v2997_v32 = vpop.permute.xlu1 %786  ;;  %v882_v21 = vsel %vm881_vm6, %v880_v58, %v875_v54  ;;  %v901_v58 = vrot.slane %v2918_v40, %v2993_v44  ;;  %v939_v40 = vadd.s32 4294967184, %v2927_v4 }
 0x212   :  { %v990_v18 = vrot.slane %v2929_v7, %v3000_v37  ;;  %v932_v7 = vadd.s32 4294967192, %v2927_v4 }
 0x215   :  { %v811_v17 = vpop.permute.xlu0 %810  ;;  %v790_v54 = vpop.permute.xlu1 %789 }
 0x216   :  { %v980_v8 = vrot.slane %v811_v17, %v2963_v29  ;;  %v904_v17 = vadd.s32 4294967224, %v2927_v4 }
 0x218   :  { %v981_v33 = vsel %vm881_vm6, %v980_v8, %v976_v19  ;;  %v3004_v31 = vsub.s32 %v904_v17, %v2642_v23  ;;  %v887_v8 = vrot.slane %v2908_v47, %v2986_v11  ;;  %v918_v47 = vadd.s32 4294967208, %v2927_v4 }
 0x219   :  { %v2947_v28 = vpop.permute.xlu0 %825  ;;  %v986_v9 = vsel %vm888_vm7, %v985_v50, %v981_v33  ;;  %v925_v17 = vadd.s32 4294967200, %v2927_v4  ;;  %v3026_v33 = vsub.s32 %v911_v5, %v2642_v23 }
 0x21a   :  { %3838 = vst [vmem:[#allocation18_spill] sm:$0xff] %v3004_v31  ;;  %v889_v1 = vsel %vm888_vm7, %v887_v8, %v882_v21  ;;  %v908_v46 = vrot.slane %v2924_v0, %v3004_v31 }
 0x21b   :  { %v1005_v5 = vrot.slane %v2947_v28, %v3026_v33 }
 0x21d   :  { %v820_v51 = vpop.permute.xlu0 %819 }
 0x21e   :  { %v995_v61 = vrot.slane %v820_v51, %v2993_v44  ;;  %v894_v51 = vrot.slane %v2912_v49, %v3000_v37  ;;  %v946_v49 = vadd.s32 4294967176, %v2927_v4  ;;  %v915_v4 = vrot.slane %v2916_v53, %v3026_v33 }
 0x220   :  { %v896_v21 = vsel %vm895_vm8, %v894_v51, %v889_v1  ;;  %v3044_v1 = vsub.s32 %v932_v7, %v2642_v23 }
 0x221   :  { %v2977_v22 = vpop.permute.xlu0 %828  ;;  %v903_v0 = vsel %vm902_vm9, %v901_v58, %v896_v21 }
 0x225   :  { %v823_v29 = vpop.permute.xlu0 %822 }
 0x226   :  { %v1000_v56 = vrot.slane %v823_v29, %v3004_v31  ;;  %v991_v29 = vsel %vm895_vm8, %v990_v18, %v986_v9  ;;  %v3035_v31 = vsub.s32 %v925_v17, %v2642_v23  ;;  %v3040_v18 = vsub.s32 %v918_v47, %v2642_v23 }
 0x227   :  { %v996_v50 = vsel %vm902_vm9, %v995_v61, %v991_v29  ;;  %v910_v61 = vsel %vm909_vm10, %v908_v46, %v903_v0  ;;  %v3054_v17 = vsub.s32 %v946_v49, %v2642_v23  ;;  %v793_v46 = vpop.permute.xlu1 %792 }
 0x228   :  { %v1001_v8 = vsel %vm909_vm10, %v1000_v56, %v996_v50  ;;  %v3049_v56 = vsub.s32 %v939_v40, %v2642_v23  ;;  %v1010_v47 = vrot.slane %v2977_v22, %v3040_v18  ;;  %v917_v51 = vsel %vm916_vm11, %v915_v4, %v910_v61 }
 0x229   :  { %v838_v19 = vpop.permute.xlu0 %837  ;;  %v1006_v58 = vsel %vm916_vm11, %v1005_v5, %v1001_v8  ;;  %3839 = vst [vmem:[#allocation19_spill] sm:$0xff] %v3054_v17  ;;  %v929_v53 = vrot.slane %v2969_v35, %v3035_v31  ;;  %v922_v29 = vrot.slane %v2920_v60, %v3040_v18  ;;  %v936_v40 = vrot.slane %v2997_v32, %v3044_v1 }
 0x22a   :  { %v1011_v50 = vsel %vm3807_vm12, %v1010_v47, %v1006_v58  ;;  %v943_v22 = vrot.slane %v790_v54, %v3049_v56  ;;  %v950_v35 = vrot.slane %v793_v46, %v3054_v17  ;;  %v1025_v32 = vrot.slane %v838_v19, %v3049_v56 }
 0x22b   :  { %v924_v8 = vsel %vm3807_vm12, %v922_v29, %v917_v51  ;;  %vm1035_vm12 = vcmask 1041408   ;;  %v3808_v51 = vsub.s32 1, %v2642_v23 }
 0x22c   :  { %v931_v60 = vsel %vm930_vm13, %v929_v53, %v924_v8 }
 0x22d   :  { %v832_v9 = vpop.permute.xlu0 %831 }
 0x22e   :  { %v1015_v28 = vrot.slane %v832_v9, %v3035_v31  ;;  %v938_v9 = vsel %vm937_vm14, %v936_v40, %v931_v60 }
 0x22f   :  { %v945_v54 = vsel %vm944_vm15, %v943_v22, %v938_v9 }
 0x230   :  { %v1016_v49 = vsel %vm930_vm13, %v1015_v28, %v1011_v50  ;;  %v952_v58 = vsel %vm951_vm0, %v950_v35, %v945_v54 }
 0x231   :  { %v835_v7 = vpop.permute.xlu0 %834 }
 0x232   :  { %v1020_v21 = vrot.slane %v835_v7, %v3044_v1 }
 0x234   :  { %v1021_v0 = vsel %vm937_vm14, %v1020_v21, %v1016_v49 }
 0x235   :  { %v841_v5 = vpop.permute.xlu0 %840  ;;  %v1026_v4 = vsel %vm944_vm15, %v1025_v32, %v1021_v0 }
 0x236   :  { %v1030_v61 = vrot.slane %v841_v5, %v3054_v17 }
 0x238   :  { %v1031_v28 = vsel %vm951_vm0, %v1030_v61, %v1026_v4 }
 0x239   :  { %v1033_v47 = vsel %vm1032_vm1, %v1031_v28, %v952_v58 }
 0x23a   :  { %v1036_v19 = vsel %vm1035_vm12, %v1033_v47, -inf }
 0x23b   :  { %1037 = vmax.xlane.f32.xlu1 %v1036_v19 }
 0x2c4   :  { %v1038_v53 = vpop.xlane.xlu1 %1037 }
 0x2c5   :  { %v3084_v46 = vrot.slane %v1038_v53, %v2649_v27  ;;  %v3088_v7 = vrot.slane %v1038_v53, %v3808_v51 }
 0x2c7   :  { %v1070_v29 = vsub.f32 %v2850_v6, %v3088_v7  ;;  %v1050_v40 = vsub.f32 %v2782_v30, %v3084_v46  ;;  %v1073_v50 = vsub.f32 %v2858_v10, %v3088_v7  ;;  %v1051_v21 = vsub.f32 %v2790_v36, %v3084_v46 }
 0x2c8   :  { %v1074_v35 = vsub.f32 %v2879_v20, %v3088_v7  ;;  %v1066_v6 = vsub.f32 %v2839_v2, %v3088_v7  ;;  %v1075_v10 = vsub.f32 %v2887_v16, %v3088_v7  ;;  %v1067_v36 = vsub.f32 %v2834_v63, %v3088_v7 }
 0x2c9   :  { %v1122_v22 = vmul.f32 1.442695, %v1070_v29  ;;  %v1082_v49 = vmul.f32 1.442695, %v1050_v40  ;;  %v1128_v8 = vmul.f32 1.442695, %v1073_v50  ;;  %v1076_v20 = vsub.f32 %v2874_v14, %v3088_v7 }
 0x2ca   :  { %v1084_v0 = vmul.f32 1.442695, %v1051_v21  ;;  %v1130_v30 = vmul.f32 1.442695, %v1074_v35  ;;  %v1114_v60 = vmul.f32 1.442695, %v1066_v6  ;;  %v1052_v2 = vsub.f32 %v2776_v25, %v3084_v46 }
 0x2cb   :  { %2401 = vpow2.f32 %v1122_v22  ;;  %v1132_v32 = vmul.f32 1.442695, %v1075_v10  ;;  %v1116_v5 = vmul.f32 1.442695, %v1067_v36  ;;  %v1134_v9 = vmul.f32 1.442695, %v1076_v20 }
 0x2cc   :  { %2403 = vpow2.f32 %v1082_v49  ;;  %v1077_v16 = vsub.f32 %v2883_v24, %v3088_v7  ;;  %v1086_v54 = vmul.f32 1.442695, %v1052_v2  ;;  %v1068_v63 = vsub.f32 %v2816_v52, %v3088_v7 }
 0x2cd   :  { %2405 = vpow2.f32 %v1128_v8  ;;  %v1078_v14 = vsub.f32 %v2895_v41, %v3088_v7  ;;  %v1053_v28 = vsub.f32 %v2787_v34, %v3084_v46  ;;  %v1079_v19 = vsub.f32 %v2899_v43, %v3088_v7 }
 0x2ce   :  { %2407 = vpow2.f32 %v1084_v0  ;;  %v1136_v25 = vmul.f32 1.442695, %v1077_v16  ;;  %v1118_v24 = vmul.f32 1.442695, %v1068_v63  ;;  %v1069_v29 = vsub.f32 %v2827_v59, %v3088_v7 }
 0x2cf   :  { %2409 = vpow2.f32 %v1130_v30  ;;  %v1138_v52 = vmul.f32 1.442695, %v1078_v14  ;;  %v1088_v41 = vmul.f32 1.442695, %v1053_v28  ;;  %v1140_v34 = vmul.f32 1.442695, %v1079_v19 }
 0x2d0   :  { %2411 = vpow2.f32 %v1114_v60  ;;  %v1080_v50 = vsub.f32 %v2891_v38, %v3088_v7  ;;  %v1120_v43 = vmul.f32 1.442695, %v1069_v29  ;;  %v1054_v22 = vsub.f32 %v2802_v42, %v3084_v46  ;;  %v3847_v19 = vld [vmem:[#allocation8_spill] sm:$0xff] }
 0x2d1   :  { %2413 = vpow2.f32 %v1132_v32  ;;  %v1081_v8 = vsub.f32 %v2903_v26, %v3088_v7  ;;  %v1055_v0 = vsub.f32 %v2810_v48, %v3084_v46  ;;  %v1071_v26 = vsub.f32 %v2866_v12, %v3088_v7 }
 0x2d2   :  { %2415 = vpow2.f32 %v1116_v5  ;;  %v1142_v59 = vmul.f32 1.442695, %v1080_v50  ;;  %v1090_v38 = vmul.f32 1.442695, %v1054_v22  ;;  %v1056_v32 = vsub.f32 %v2796_v39, %v3084_v46  ;;  %v3850_v22 = vld [vmem:[#allocation10_spill] sm:$0xff] }
 0x2d3   :  { %2417 = vpow2.f32 %v1134_v9  ;;  %v1144_v42 = vmul.f32 1.442695, %v1081_v8  ;;  %v1092_v10 = vmul.f32 1.442695, %v1055_v0  ;;  %v1124_v36 = vmul.f32 1.442695, %v1071_v26 }
 0x2d4   :  { %2419 = vpow2.f32 %v1086_v54  ;;  %v1094_v5 = vmul.f32 1.442695, %v1056_v32  ;;  %v1072_v2 = vsub.f32 %v2842_v3, %v3088_v7  ;;  %v1057_v54 = vsub.f32 %v2806_v45, %v3084_v46  ;;  %v3852_v0 = vld [vmem:[#allocation11_spill] sm:$0xff] }
 0x2d5   :  { %2421 = vpow2.f32 %v1136_v25  ;;  %v1058_v25 = vsub.f32 %v2821_v55, %v3084_v46  ;;  %v1060_v55 = vsub.f32 %v3847_v19, %v3084_v46 }
 0x2d6   :  { %2423 = vpow2.f32 %v1118_v24  ;;  %v1126_v16 = vmul.f32 1.442695, %v1072_v2  ;;  %v1096_v7 = vmul.f32 1.442695, %v1057_v54  ;;  %v1059_v24 = vsub.f32 %v2832_v62, %v3084_v46 }
 0x2d7   :  { %2425 = vpow2.f32 %v1138_v52  ;;  %v1098_v45 = vmul.f32 1.442695, %v1058_v25  ;;  %v1102_v29 = vmul.f32 1.442695, %v1060_v55 }
 0x2d8   :  { %v3112_v61 = vpop.eup %2401  ;;  %2427 = vpow2.f32 %v1088_v41  ;;  %v1100_v52 = vmul.f32 1.442695, %v1059_v24 }
 0x2d9   :  { %v3116_v4 = vpop.eup %2403  ;;  %1239 = vperm.xlu1 %2381, %v3112_v61   ;;  %2429 = vpow2.f32 %v1140_v34  ;;  %v3849_v34 = vld [vmem:[#allocation9_spill] sm:$0xff] }
 0x2da   :  { %1179 = vperm.xlu0 %2382, %v3116_v4   ;;  %v3122_v58 = vpop.eup %2405  ;;  %2431 = vpow2.f32 %v1120_v43  ;;  %v1061_v50 = vsub.f32 %v3849_v34, %v3084_v46 }
 0x2db   :  { %v3126_v47 = vpop.eup %2407  ;;  %2433 = vpow2.f32 %v1142_v59  ;;  %v1062_v59 = vsub.f32 %v3850_v22, %v3084_v46 }
 0x2dc   :  { %v3132_v53 = vpop.eup %2409  ;;  %2435 = vpow2.f32 %v1090_v38  ;;  %v1104_v62 = vmul.f32 1.442695, %v1061_v50  ;;  %v3859_v50 = vld [vmem:[#allocation15_spill] sm:$0xff] }
 0x2dd   :  { %1248 = vperm.xlu1 %2381, %v3122_v58   ;;  %v3136_v40 = vpop.eup %2411  ;;  %2437 = vpow2.f32 %v1144_v42  ;;  %v1106_v38 = vmul.f32 1.442695, %v1062_v59  ;;  %v1063_v42 = vsub.f32 %v3852_v0, %v3084_v46 }
 0x2de   :  { %1182 = vperm.xlu0 %2382, %v3126_v47   ;;  %v3142_v21 = vpop.eup %2413  ;;  %2439 = vpow2.f32 %v1092_v10 }
 0x2df   :  { %3840 = vst [vmem:[#allocation20_spill] sm:$0xff] %v3142_v21  ;;  %v3146_v49 = vpop.eup %2415  ;;  %2441 = vpow2.f32 %v1124_v36  ;;  %v1108_v26 = vmul.f32 1.442695, %v1063_v42  ;;  %v3853_v36 = vld [vmem:[#allocation12_spill] sm:$0xff] }
 0x2e0   :  { %v3152_v35 = vpop.eup %2417  ;;  %2443 = vpow2.f32 %v1094_v5  ;;  %v1064_v32 = vsub.f32 %v3853_v36, %v3084_v46 }
 0x2e1   :  { %1251 = vperm.xlu1 %2381, %v3132_v53   ;;  %3841 = vst [vmem:[#allocation21_spill] sm:$0xff] %v3152_v35  ;;  %v3156_v6 = vpop.eup %2419  ;;  %2445 = vpow2.f32 %v1126_v16  ;;  %v3854_v16 = vld [vmem:[#allocation13_spill] sm:$0xff] }
 0x2e2   :  { %1227 = vperm.xlu0 %2382, %v3136_v40   ;;  %v3160_v30 = vpop.eup %2421  ;;  %2447 = vpow2.f32 %v1096_v7  ;;  %v1110_v2 = vmul.f32 1.442695, %v1064_v32  ;;  %v1065_v54 = vsub.f32 %v3854_v16, %v3084_v46 }
 0x2e3   :  { %3842 = vst [vmem:[#allocation22_spill] sm:$0xff] %v3160_v30  ;;  %v3164_v60 = vpop.eup %2423  ;;  %2449 = vpow2.f32 %v1098_v45 }
 0x2e4   :  { %v3168_v48 = vpop.eup %2425  ;;  %2451 = vpow2.f32 %v1100_v52  ;;  %v1112_v25 = vmul.f32 1.442695, %v1065_v54 }
 0x2e5   :  { %1254 = vperm.xlu1 %2381, %v3142_v21   ;;  %3843 = vst [vmem:[#allocation23_spill] sm:$0xff] %v3168_v48  ;;  %v3172_v20 = vpop.eup %2427  ;;  %2453 = vpow2.f32 %v1102_v29 }
 0x2e6   :  { %1230 = vperm.xlu0 %2382, %v3146_v49   ;;  %v3176_v12 = vpop.eup %2429  ;;  %2455 = vpow2.f32 %v1104_v62 }
 0x2e7   :  { %3844 = vst [vmem:[#allocation24_spill] sm:$0xff] %v3176_v12  ;;  %v3180_v9 = vpop.eup %2431  ;;  %2457 = vpow2.f32 %v1106_v38 }
 0x2e8   :  { %v3184_v39 = vpop.eup %2433  ;;  %2459 = vpow2.f32 %v1108_v26 }
 0x2e9   :  { %1257 = vperm.xlu1 %2381, %v3152_v35   ;;  %3845 = vst [vmem:[#allocation25_spill] sm:$0xff] %v3184_v39  ;;  %v3188_v63 = vpop.eup %2435  ;;  %2461 = vpow2.f32 %v1110_v2 }
 0x2ea   :  { %1185 = vperm.xlu0 %2382, %v3156_v6   ;;  %v3192_v3 = vpop.eup %2437  ;;  %2463 = vpow2.f32 %v1112_v25 }
 0x2eb   :  { %3846 = vst [vmem:[#allocation26_spill] sm:$0xff] %v3192_v3  ;;  %v3196_v14 = vpop.eup %2439 }
 0x2ec   :  { %v3202_v28 = vpop.eup %2441 }
 0x2ed   :  { %1260 = vperm.xlu1 %2381, %v3160_v30   ;;  %v3207_v41 = vpop.eup %2443  ;;  %v3860_v30 = vld [vmem:[#allocation17_spill] sm:$0xff] }
 0x2ee   :  { %1233 = vperm.xlu0 %2382, %v3164_v60   ;;  %3848 = vst [vmem:[#allocation8_spill] sm:$0xff] %v3207_v41  ;;  %v3212_v43 = vpop.eup %2445 }
 0x2ef   :  { %v3217_v8 = vpop.eup %2447 }
 0x2f0   :  { %3851 = vst [vmem:[#allocation9_spill] sm:$0xff] %v3217_v8  ;;  %v3222_v10 = vpop.eup %2449 }
 0x2f1   :  { %1263 = vperm.xlu1 %2381, %v3168_v48   ;;  %v3227_v5 = vpop.eup %2451 }
 0x2f2   :  { %1188 = vperm.xlu0 %2382, %v3172_v20   ;;  %v3232_v7 = vpop.eup %2453 }
 0x2f3   :  { %3855 = vst [vmem:[#allocation10_spill] sm:$0xff] %v3232_v7  ;;  %v3235_v45 = vpop.eup %2455 }
 0x2f4   :  { %3856 = vst [vmem:[#allocation11_spill] sm:$0xff] %v3235_v45  ;;  %v3238_v24 = vpop.eup %2457 }
 0x2f5   :  { %1266 = vperm.xlu1 %2381, %v3176_v12   ;;  %3857 = vst [vmem:[#allocation12_spill] sm:$0xff] %v3238_v24  ;;  %v3241_v52 = vpop.eup %2459 }
 0x2f6   :  { %1236 = vperm.xlu0 %2382, %v3180_v9   ;;  %3858 = vst [vmem:[#allocation13_spill] sm:$0xff] %v3241_v52  ;;  %v3244_v46 = vpop.eup %2461 }
 0x2f7   :  { %v3247_v19 = vpop.eup %2463 }
 0x2f9   :  { %1269 = vperm.xlu1 %2381, %v3184_v39  }
 0x2fa   :  { %1191 = vperm.xlu0 %2382, %v3188_v63  }
 0x2fd   :  { %1272 = vperm.xlu1 %2381, %v3192_v3  }
 0x2fe   :  { %1194 = vperm.xlu0 %2382, %v3196_v14  }
 0x302   :  { %1242 = vperm.xlu0 %2382, %v3202_v28  }
 0x306   :  { %1197 = vperm.xlu0 %2382, %v3207_v41  }
 0x30a   :  { %1245 = vperm.xlu0 %2382, %v3212_v43  }
 0x30e   :  { %1200 = vperm.xlu0 %2382, %v3217_v8   ;;  %v3861_v8 = vld [vmem:[#allocation16_spill] sm:$0xff] }
 0x312   :  { %1203 = vperm.xlu0 %2382, %v3222_v10  }
 0x316   :  { %1206 = vperm.xlu0 %2382, %v3227_v5  }
 0x31a   :  { %1209 = vperm.xlu0 %2382, %v3232_v7  }
 0x31e   :  { %1212 = vperm.xlu0 %2382, %v3235_v45  }
 0x322   :  { %1215 = vperm.xlu0 %2382, %v3238_v24  }
 0x326   :  { %1218 = vperm.xlu0 %2382, %v3241_v52  }
 0x32a   :  { %1221 = vperm.xlu0 %2382, %v3244_v46  }
 0x32e   :  { %1224 = vperm.xlu0 %2382, %v3247_v19  }
 0x354   :  { %v1240_v36 = vpop.permute.xlu1 %1239 }
 0x355   :  { %v1180_v55 = vpop.permute.xlu0 %1179  ;;  %v1375_v41 = vrot.slane %v1240_v36, %v3861_v8 }
 0x356   :  { %v1277_v34 = vrot.slane %v1180_v55, %v2934_v13 }
 0x358   :  { %v1249_v16 = vpop.permute.xlu1 %1248 }
 0x359   :  { %v1183_v29 = vpop.permute.xlu0 %1182 }
 0x35a   :  { %v1281_v62 = vrot.slane %v1183_v29, %v3859_v50 }
 0x35c   :  { %v1282_v22 = vsel %vm3825_vm2, %v1281_v62, %v1277_v34  ;;  %v1252_v25 = vpop.permute.xlu1 %1251 }
 0x35d   :  { %v1228_v59 = vpop.permute.xlu0 %1227 }
 0x35e   :  { %v1356_v34 = vrot.slane %v1228_v59, %v2934_v13 }
 0x360   :  { %v1255_v24 = vpop.permute.xlu1 %1254 }
 0x361   :  { %v1231_v38 = vpop.permute.xlu0 %1230 }
 0x362   :  { %v1360_v55 = vrot.slane %v1231_v38, %v3859_v50 }
 0x364   :  { %v1258_v7 = vpop.permute.xlu1 %1257  ;;  %v1361_v39 = vsel %vm3825_vm2, %v1360_v55, %v1356_v34  ;;  %v1390_v55 = vrot.slane %v1249_v16, %v3000_v37  ;;  %vm3863_vm2 = vcmask 786112  }
 0x365   :  { %v1186_v0 = vpop.permute.xlu0 %1185 }
 0x369   :  { %v1234_v42 = vpop.permute.xlu0 %1233 }
 0x36a   :  { %v1365_v29 = vrot.slane %v1234_v42, %v2944_v15  ;;  %v1261_v42 = vpop.permute.xlu1 %1260 }
 0x36c   :  { %v1366_v12 = vsel %vm860_vm3, %v1365_v29, %v1361_v39 }
 0x36d   :  { %v1189_v26 = vpop.permute.xlu0 %1188 }
 0x36e   :  { %v1291_v16 = vrot.slane %v1189_v26, %v2955_v57 }
 0x371   :  { %v1237_v32 = vpop.permute.xlu0 %1236 }
 0x372   :  { %v1370_v62 = vrot.slane %v1237_v32, %v2955_v57 }
 0x374   :  { %v1371_v48 = vsel %vm867_vm4, %v1370_v62, %v1366_v12  ;;  %v1395_v12 = vrot.slane %v1252_v25, %v2993_v44 }
 0x375   :  { %v1192_v2 = vpop.permute.xlu0 %1191  ;;  %v1376_v59 = vsel %vm874_vm5, %v1375_v41, %v1371_v48  ;;  %v1286_v41 = vrot.slane %v1186_v0, %v2944_v15 }
 0x379   :  { %v1195_v54 = vpop.permute.xlu0 %1194 }
 0x37d   :  { %v1243_v51 = vpop.permute.xlu0 %1242 }
 0x37e   :  { %v1380_v35 = vrot.slane %v1243_v51, %v3860_v30  ;;  %v1264_v51 = vpop.permute.xlu1 %1263 }
 0x37f   :  { %v1415_v26 = vrot.slane %v1264_v51, %v3035_v31 }
 0x380   :  { %v1381_v32 = vsel %vm881_vm6, %v1380_v35, %v1376_v59  ;;  %v1405_v35 = vrot.slane %v1258_v7, %v3026_v33 }
 0x381   :  { %v1198_v52 = vpop.permute.xlu0 %1197 }
 0x385   :  { %v1246_v45 = vpop.permute.xlu0 %1245 }
 0x386   :  { %v1385_v38 = vrot.slane %v1246_v45, %v2986_v11  ;;  %v3862_v45 = vld [vmem:[#allocation18_spill] sm:$0xff] }
 0x387   :  { %v1400_v34 = vrot.slane %v1255_v24, %v3862_v45  ;;  %v1287_v24 = vsel %vm860_vm3, %v1286_v41, %v1282_v22 }
 0x388   :  { %v1386_v13 = vsel %vm888_vm7, %v1385_v38, %v1381_v32  ;;  %v1267_v38 = vpop.permute.xlu1 %1266  ;;  %v1410_v32 = vrot.slane %v1261_v42, %v3040_v18  ;;  %v1292_v7 = vsel %vm867_vm4, %v1291_v16, %v1287_v24 }
 0x389   :  { %v1201_v3 = vpop.permute.xlu0 %1200  ;;  %v1391_v39 = vsel %vm895_vm8, %v1390_v55, %v1386_v13  ;;  %v1296_v13 = vrot.slane %v1192_v2, %v3861_v8  ;;  %v1301_v55 = vrot.slane %v1195_v54, %v3860_v30 }
 0x38a   :  { %v1396_v36 = vsel %vm902_vm9, %v1395_v12, %v1391_v39  ;;  %v1306_v39 = vrot.slane %v1198_v52, %v2986_v11  ;;  %v1311_v0 = vrot.slane %v1201_v3, %v3000_v37 }
 0x38b   :  { %v1401_v48 = vsel %vm909_vm10, %v1400_v34, %v1396_v36  ;;  %v1297_v36 = vsel %vm874_vm5, %v1296_v13, %v1292_v7 }
 0x38c   :  { %v1406_v25 = vsel %vm916_vm11, %v1405_v35, %v1401_v48  ;;  %v1270_v2 = vpop.permute.xlu1 %1269  ;;  %v1302_v54 = vsel %vm881_vm6, %v1301_v55, %v1297_v36  ;;  %v1420_v35 = vrot.slane %v1267_v38, %v3044_v1 }
 0x38d   :  { %v1204_v50 = vpop.permute.xlu0 %1203  ;;  %v1411_v12 = vsel %vm3863_vm2, %v1410_v32, %v1406_v25  ;;  %v1307_v52 = vsel %vm888_vm7, %v1306_v39, %v1302_v54 }
 0x38e   :  { %v1316_v34 = vrot.slane %v1204_v50, %v2993_v44  ;;  %v1416_v3 = vsel %vm930_vm13, %v1415_v26, %v1411_v12  ;;  %v1312_v51 = vsel %vm895_vm8, %v1311_v0, %v1307_v52 }
 0x38f   :  { %v1421_v32 = vsel %vm937_vm14, %v1420_v35, %v1416_v3 }
 0x390   :  { %v1317_v16 = vsel %vm902_vm9, %v1316_v34, %v1312_v51  ;;  %v1273_v55 = vpop.permute.xlu1 %1272 }
 0x391   :  { %v1207_v21 = vpop.permute.xlu0 %1206  ;;  %v1430_v0 = vrot.slane %v1273_v55, %v3054_v17 }
 0x392   :  { %v1321_v22 = vrot.slane %v1207_v21, %v3862_v45 }
 0x394   :  { %v1322_v25 = vsel %vm909_vm10, %v1321_v22, %v1317_v16 }
 0x395   :  { %v1210_v29 = vpop.permute.xlu0 %1209 }
 0x396   :  { %v1326_v48 = vrot.slane %v1210_v29, %v3026_v33  ;;  %v1425_v29 = vrot.slane %v1270_v2, %v3049_v56 }
 0x398   :  { %v1327_v38 = vsel %vm916_vm11, %v1326_v48, %v1322_v25 }
 0x399   :  { %v1213_v62 = vpop.permute.xlu0 %1212 }
 0x39a   :  { %v1331_v41 = vrot.slane %v1213_v62, %v3040_v18 }
 0x39c   :  { %v1332_v62 = vsel %vm3863_vm2, %v1331_v41, %v1327_v38  ;;  %v3864_v41 = vsub.s32 1, %v2642_v23  ;;  %vm3880_vm2 = vcmask 130112  }
 0x39d   :  { %v1216_v59 = vpop.permute.xlu0 %1215 }
 0x39e   :  { %v1336_v50 = vrot.slane %v1216_v59, %v3035_v31  ;;  %v1426_v59 = vsel %vm944_vm15, %v1425_v29, %v1421_v32 }
 0x39f   :  { %v1431_v34 = vsel %vm951_vm0, %v1430_v0, %v1426_v59 }
 0x3a0   :  { %v1337_v39 = vsel %vm930_vm13, %v1336_v50, %v1332_v62 }
 0x3a1   :  { %v1219_v42 = vpop.permute.xlu0 %1218 }
 0x3a2   :  { %v1341_v21 = vrot.slane %v1219_v42, %v3044_v1 }
 0x3a4   :  { %v1342_v12 = vsel %vm937_vm14, %v1341_v21, %v1337_v39 }
 0x3a5   :  { %v1222_v13 = vpop.permute.xlu0 %1221 }
 0x3a6   :  { %v1346_v24 = vrot.slane %v1222_v13, %v3049_v56 }
 0x3a8   :  { %v1347_v2 = vsel %vm944_vm15, %v1346_v24, %v1342_v12 }
 0x3a9   :  { %v1225_v7 = vpop.permute.xlu0 %1224 }
 0x3aa   :  { %v1351_v26 = vrot.slane %v1225_v7, %v3054_v17 }
 0x3ac   :  { %v1352_v36 = vsel %vm951_vm0, %v1351_v26, %v1347_v2 }
 0x3ad   :  { %v1432_v42 = vsel %vm1032_vm1, %v1431_v34, %v1352_v36  ;;  %v3865_v36 = vld [vmem:[#allocation20_spill] sm:$0xff] }
 0x3ae   :  { %v1434_v54 = vsel %vm1035_vm12, %v1432_v42, 0.0  ;;  %v3866_v42 = vld [vmem:[#allocation8_spill] sm:$0xff]  ;;  %vm2530_vm12 = vmmov 0  }
 0x3af   :  { %1435 = vadd.xlane.f32.xlu0 %v1434_v54 }
 0x438   :  { %v1436_v22 = vpop.xlane.xlu0 %1435 }
 0x439   :  { %2465 = vrcp.f32 %v1436_v22 }
 0x446   :  { %v2466_v52 = vpop.eup %2465 }
 0x447   :  { %v1438_v48 = vmul.f32 %v2466_v52, %v1436_v22 }
 0x449   :  { %v1439_v3 = vsub.f32 2.0, %v1438_v48 }
 0x44b   :  { %v1440_v35 = vmul.f32 %v2466_v52, %v1439_v3  ;;  %v3867_v52 = vld [vmem:[#allocation9_spill] sm:$0xff] }
 0x44c   :  { %v3868_v3 = vld [vmem:[#allocation21_spill] sm:$0xff] }
 0x44d   :  { %v3315_v51 = vrot.slane %v1440_v35, %v2649_v27  ;;  %v3319_v16 = vrot.slane %v1440_v35, %v3864_v41 }
 0x44f   :  { %v3323_v50 = vmul.f32 %v3222_v10, %v3315_v51  ;;  %v3327_v13 = vmul.f32 %v3227_v5, %v3315_v51  ;;  %v3331_v25 = vmul.f32 %v3116_v4, %v3315_v51  ;;  %v3335_v27 = vmul.f32 %v3126_v47, %v3315_v51 }
 0x450   :  { %v3339_v23 = vmul.f32 %v3244_v46, %v3315_v51  ;;  %v3343_v10 = vmul.f32 %v3247_v19, %v3315_v51  ;;  %v3353_v21 = vmul.f32 %v3136_v40, %v3319_v16  ;;  %v3357_v47 = vmul.f32 %v3146_v49, %v3319_v16 }
 0x451   :  { %v3347_v5 = vpack.c.bf16 %v3327_v13, %v3323_v50  ;;  %v1484_v4 = vpack.c.bf16 %v3335_v27, %v3331_v25  ;;  %v3361_v46 = vmul.f32 %v3156_v6, %v3315_v51  ;;  %v3370_v55 = vmul.f32 %v3172_v20, %v3315_v51 }
 0x452   :  { %v3366_v29 = vpack.c.bf16 %v3343_v10, %v3339_v23  ;;  %v3374_v40 = vpack.c.bf16 %v3357_v47, %v3353_v21  ;;  %v3378_v49 = vmul.f32 %v3164_v60, %v3319_v16  ;;  %v3382_v6 = vmul.f32 %v3180_v9, %v3319_v16 }
 0x453   :  { %v1516_v19 = vunpack.c.l.b16 %v3347_v5  ;;  %v1508_v32 = vunpack.c.l.b16 %v1484_v4  ;;  %v1509_v24 = vunpack.c.h.b16 %v1484_v4  ;;  %v1485_v20 = vpack.c.bf16 %v3370_v55, %v3361_v46 }
 0x454   :  { %v1523_v38 = vunpack.c.h.b16 %v3366_v29  ;;  %v1710_v62 = vunpack.c.h.b16 %v3374_v40  ;;  %v3390_v39 = vpack.c.bf16 %v3382_v6, %v3378_v49  ;;  %v3394_v60 = vmul.f32 %v3112_v61, %v3319_v16 }
 0x455   :  { %1549 = vperm.xlu0 %2382, %v1516_v19   ;;  %1525 = vperm.xlu1 %2381, %v1508_v32   ;;  %v1510_v9 = vunpack.c.l.b16 %v1485_v20  ;;  %v3398_v7 = vmul.f32 %v3202_v28, %v3319_v16  ;;  %v3402_v59 = vmul.f32 %v3188_v63, %v3315_v51  ;;  %v3406_v0 = vmul.f32 %v3196_v14, %v3315_v51  ;;  %v3869_v32 = vld [vmem:[#allocation22_spill] sm:$0xff] }
 0x456   :  { %v1712_v12 = vunpack.c.h.b16 %v3390_v39  ;;  %v1511_v26 = vunpack.c.h.b16 %v1485_v20  ;;  %v3417_v63 = vmul.f32 %v3212_v43, %v3319_v16  ;;  %v3421_v14 = vmul.f32 %v3122_v58, %v3319_v16  ;;  %v3870_v20 = vld [vmem:[#allocation23_spill] sm:$0xff] }
 0x457   :  { %v3411_v61 = vpack.c.bf16 %v3398_v7, %v3394_v60  ;;  %v1486_v28 = vpack.c.bf16 %v3406_v0, %v3402_v59  ;;  %v3425_v2 = vmul.f32 %v3132_v53, %v3319_v16  ;;  %v3429_v34 = vmul.f32 %v3865_v36, %v3319_v16 }
 0x458   :  { %v3433_v54 = vmul.f32 %v3866_v42, %v3315_v51  ;;  %v3438_v58 = vpack.c.bf16 %v3421_v14, %v3417_v63  ;;  %v3442_v48 = vmul.f32 %v3867_v52, %v3315_v51  ;;  %v3450_v35 = vmul.f32 %v3868_v3, %v3319_v16  ;;  %v3873_v52 = vld [vmem:[#allocation26_spill] sm:$0xff] }
 0x459   :  { %1570 = vperm.xlu0 %2382, %v1523_v38   ;;  %1528 = vperm.xlu1 %2381, %v1509_v24   ;;  %v1714_v43 = vunpack.c.h.b16 %v3411_v61  ;;  %v1512_v22 = vunpack.c.l.b16 %v1486_v28  ;;  %v3446_v53 = vpack.c.bf16 %v3429_v34, %v3425_v2  ;;  %v1513_v4 = vunpack.c.h.b16 %v1486_v28 }
 0x45a   :  { %v1716_v41 = vunpack.c.h.b16 %v3438_v58  ;;  %v1487_v19 = vpack.c.bf16 %v3442_v48, %v3433_v54  ;;  %v3457_v38 = vmul.f32 %v3869_v32, %v3319_v16  ;;  %v2529_v36 = vmov 0.0  }
 0x45b   :  { %v1718_v24 = vunpack.c.h.b16 %v3446_v53  ;;  %2335 = vmatprep.subr.bf16.mxu1 %v2529_v36  ;;  %v3479_v3 = vmul.f32 %v3873_v52, %v3319_v16  ;;  %2351 = vmatprep.mubr.msk.bf16.mxu1 %vm2530_vm12, %v2529_v36 }
 0x45c   :  { %v1515_v42 = vunpack.c.h.b16 %v1487_v19 }
 0x45d   :  { %1729 = vperm.xlu0 %2382, %v1710_v62   ;;  %1531 = vperm.xlu1 %2381, %v1510_v9   ;;  %v3462_v62 = vmul.f32 %v3870_v20, %v3319_v16  ;;  %v1514_v9 = vunpack.c.l.b16 %v1487_v19  ;;  %v3874_v19 = vld [vmem:[#allocation10_spill] sm:$0xff]  ;;  %v3875_v20 = vld [vmem:[#allocation11_spill] sm:$0xff] }
 0x461   :  { %1735 = vperm.xlu0 %2382, %v1712_v12   ;;  %1534 = vperm.xlu1 %2381, %v1511_v26   ;;  %v3466_v12 = vpack.c.bf16 %v3457_v38, %v3450_v35  ;;  %v3871_v26 = vld [vmem:[#allocation24_spill] sm:$0xff] }
 0x462   :  { %v3470_v28 = vmul.f32 %v3871_v26, %v3319_v16 }
 0x464   :  { %v3487_v32 = vpack.c.bf16 %v3470_v28, %v3462_v62 }
 0x465   :  { %1741 = vperm.xlu0 %2382, %v1714_v43   ;;  %1537 = vperm.xlu1 %2381, %v1512_v22   ;;  %v3872_v43 = vld [vmem:[#allocation25_spill] sm:$0xff] }
 0x466   :  { %v3475_v22 = vmul.f32 %v3872_v43, %v3319_v16  ;;  %v2468_v16 = vld [vmem:[%s3786_s0 + $0x30] sm:$0xff]   ;;  %v1722_v26 = vunpack.c.h.b16 %v3487_v32  ;;  %v1517_v43 = vunpack.c.h.b16 %v3347_v5  ;;  %v3876_v5 = vld [vmem:[#allocation12_spill] sm:$0xff] }
 0x468   :  { %v3505_v52 = vpack.c.bf16 %v3479_v3, %v3475_v22 }
 0x469   :  { %1747 = vperm.xlu0 %2382, %v1716_v41   ;;  %1540 = vperm.xlu1 %2381, %v1513_v4   ;;  %v2467_v41 = vld [vmem:[%s3786_s0 + $0x38] sm:$0xff]   ;;  %v1720_v4 = vunpack.c.h.b16 %v3466_v12 }
 0x46a   :  { %2336 = vmatpush3.bf16.msra.mxu1 %v2467_v41 }
 0x46b   :  { %2337 = vmatprep.subr.bf16.mxu1 %v2529_v36 }
 0x46d   :  { %1753 = vperm.xlu0 %2382, %v1718_v24   ;;  %1543 = vperm.xlu1 %2381, %v1514_v9   ;;  %v3491_v24 = vmul.f32 %v3874_v19, %v3315_v51  ;;  %v3495_v9 = vmul.f32 %v3875_v20, %v3315_v51  ;;  %v3516_v20 = vmul.f32 %v3876_v5, %v3315_v51  ;;  %v1522_v5 = vunpack.c.l.b16 %v3366_v29 }
 0x46e   :  { %2338 = vmatpush3.bf16.msra.mxu1 %v2468_v16  ;;  %v3877_v16 = vld [vmem:[#allocation13_spill] sm:$0xff]  ;;  %v1711_v29 = vunpack.c.l.b16 %v3390_v39  ;;  %v1719_v39 = vunpack.c.l.b16 %v3466_v12 }
 0x46f   :  { %v1489_v41 = vpack.c.bf16 %v3495_v9, %v3491_v24  ;;  %2339 = vmatprep.subr.bf16.mxu1 %v2529_v36  ;;  %v3520_v17 = vmul.f32 %v3877_v16, %v3315_v51  ;;  %v2471_v51 = vld [vmem:[%s3786_s0 + $0x18] sm:$0xff]   ;;  %v1717_v16 = vunpack.c.l.b16 %v3446_v53 }
 0x470   :  { %v3878_v53 = vld [vmem:[#allocation15_spill] sm:$0xff] }
 0x471   :  { %1759 = vperm.xlu0 %2382, %v1720_v4   ;;  %1546 = vperm.xlu1 %2381, %v1515_v42   ;;  %v2469_v42 = vld [vmem:[%s3786_s0 + $0x28] sm:$0xff]   ;;  %v1724_v4 = vunpack.c.h.b16 %v3505_v52  ;;  %v1518_v19 = vunpack.c.l.b16 %v1489_v41 }
 0x472   :  { %2340 = vmatpush3.bf16.msra.mxu1 %v2469_v42  ;;  %v1490_v42 = vpack.c.bf16 %v3520_v17, %v3516_v20 }
 0x473   :  { %2341 = vmatprep.subr.bf16.mxu1 %v2529_v36 }
 0x475   :  { %1765 = vperm.xlu0 %2382, %v1722_v26   ;;  %1552 = vperm.xlu1 %2381, %v1517_v43   ;;  %v2470_v26 = vld [vmem:[%s3786_s0 + $0x20] sm:$0xff]   ;;  %v1519_v43 = vunpack.c.h.b16 %v1489_v41  ;;  %v2472_v41 = vld [vmem:[%s3786_s0 + $0x10] sm:$0xff]  }
 0x476   :  { %2342 = vmatpush3.bf16.msra.mxu1 %v2470_v26 }
 0x477   :  { %2343 = vmatprep.subr.bf16.mxu1 %v2529_v36 }
 0x479   :  { %1771 = vperm.xlu0 %2382, %v1724_v4   ;;  %1555 = vperm.xlu1 %2381, %v1518_v19   ;;  %v1520_v4 = vunpack.c.l.b16 %v1490_v42  ;;  %v1521_v19 = vunpack.c.h.b16 %v1490_v42 }
 0x47a   :  { %2344 = vmatpush3.bf16.msra.mxu1 %v2471_v51 }
 0x47b   :  { %2345 = vmatprep.subr.bf16.mxu1 %v2529_v36 }
 0x47d   :  { %1945 = vperm.xlu0 %2382, %v3335_v27   ;;  %1558 = vperm.xlu1 %2381, %v1519_v43   ;;  %v2473_v27 = vld [vmem:[%s3786_s0 + $0x8] sm:$0xff]  }
 0x47e   :  { %2346 = vmatpush3.bf16.msra.mxu1 %v2472_v41 }
 0x47f   :  { %2347 = vmatprep.subr.bf16.mxu1 %v2529_v36 }
 0x481   :  { %1993 = vperm.xlu0 %2382, %v3357_v47   ;;  %1561 = vperm.xlu1 %2381, %v1520_v4   ;;  %v2474_v47 = vld [vmem:[%s3786_s0] sm:$0xff]  }
 0x482   :  { %2348 = vmatpush3.bf16.msra.mxu1 %v2473_v27 }
 0x483   :  { %2349 = vmatprep.subr.bf16.mxu1 %v2529_v36 }
 0x485   :  { %1996 = vperm.xlu0 %2382, %v3378_v49   ;;  %1564 = vperm.xlu1 %2381, %v1521_v19   ;;  %v1709_v49 = vunpack.c.l.b16 %v3374_v40  ;;  %v1715_v40 = vunpack.c.l.b16 %v3438_v58 }
 0x486   :  { %2350 = vmatpush3.bf16.msra.mxu1 %v2474_v47 }
 0x487   :  { %2355 = vmatprep.subr.bf16.mxu1 %v2529_v36 }
 0x489   :  { %1999 = vperm.xlu0 %2382, %v3382_v6   ;;  %1567 = vperm.xlu1 %2381, %v1522_v5   ;;  %v1713_v6 = vunpack.c.l.b16 %v3411_v61 }
 0x48d   :  { %2002 = vperm.xlu0 %2382, %v3394_v60   ;;  %1726 = vperm.xlu1 %2381, %v1709_v49   ;;  %v1721_v60 = vunpack.c.l.b16 %v3487_v32 }
 0x491   :  { %2005 = vperm.xlu0 %2382, %v3398_v7   ;;  %1732 = vperm.xlu1 %2381, %v1711_v29   ;;  %v1723_v7 = vunpack.c.l.b16 %v3505_v52 }
 0x495   :  { %2008 = vperm.xlu0 %2382, %v3417_v63   ;;  %1738 = vperm.xlu1 %2381, %v1713_v6  }
 0x499   :  { %2011 = vperm.xlu0 %2382, %v3421_v14   ;;  %1744 = vperm.xlu1 %2381, %v1715_v40  }
 0x49d   :  { %2014 = vperm.xlu0 %2382, %v3425_v2   ;;  %1750 = vperm.xlu1 %2381, %v1717_v16  }
 0x4a1   :  { %2017 = vperm.xlu0 %2382, %v3429_v34   ;;  %1756 = vperm.xlu1 %2381, %v1719_v39  }
 0x4a5   :  { %2020 = vperm.xlu0 %2382, %v3450_v35   ;;  %1762 = vperm.xlu1 %2381, %v1721_v60  }
 0x4a9   :  { %2023 = vperm.xlu0 %2382, %v3457_v38   ;;  %1768 = vperm.xlu1 %2381, %v1723_v7  }
 0x4ad   :  { %2026 = vperm.xlu0 %2382, %v3462_v62   ;;  %1942 = vperm.xlu1 %2381, %v3331_v25  }
 0x4b1   :  { %2029 = vperm.xlu0 %2382, %v3470_v28   ;;  %1990 = vperm.xlu1 %2381, %v3353_v21  }
 0x4b5   :  { %2032 = vperm.xlu0 %2382, %v3475_v22   ;;  %1948 = vperm.xlu1 %2381, %v3361_v46  }
 0x4b9   :  { %2035 = vperm.xlu0 %2382, %v3479_v3   ;;  %1951 = vperm.xlu1 %2381, %v3370_v55  }
 0x4bd   :  { %1954 = vperm.xlu1 %2381, %v3402_v59  }
 0x4c1   :  { %1957 = vperm.xlu1 %2381, %v3406_v0  }
 0x4c5   :  { %1960 = vperm.xlu1 %2381, %v3433_v54  }
 0x4c9   :  { %1963 = vperm.xlu1 %2381, %v3442_v48  }
 0x4cd   :  { %1966 = vperm.xlu1 %2381, %v3323_v50  }
 0x4d0   :  { %v1550_v25 = vpop.permute.xlu0 %1549  ;;  %v1526_v21 = vpop.permute.xlu1 %1525 }
 0x4d1   :  { %1969 = vperm.xlu1 %2381, %v3327_v13   ;;  %v1614_v27 = vrot.slane %v1550_v25, %v2993_v44 }
 0x4d4   :  { %v1571_v61 = vpop.permute.xlu0 %1570  ;;  %v1529_v46 = vpop.permute.xlu1 %1528 }
 0x4d5   :  { %1972 = vperm.xlu1 %2381, %v3491_v24   ;;  %v1579_v35 = vrot.slane %v1529_v46, %v3878_v53 }
 0x4d8   :  { %v3583_v63 = vpop.permute.xlu0 %1729  ;;  %v1532_v55 = vpop.permute.xlu1 %1531 }
 0x4d9   :  { %1975 = vperm.xlu1 %2381, %v3495_v9   ;;  %v1584_v62 = vrot.slane %v1532_v55, %v2944_v15  ;;  %v3882_v55 = vld [vmem:[#allocation19_spill] sm:$0xff] }
 0x4dc   :  { %v1535_v59 = vpop.permute.xlu1 %1534  ;;  %v3587_v0 = vpop.permute.xlu0 %1735 }
 0x4dd   :  { %1978 = vperm.xlu1 %2381, %v3516_v20   ;;  %v1589_v28 = vrot.slane %v1535_v59, %v2955_v57  ;;  %v1649_v59 = vrot.slane %v1571_v61, %v3882_v55  ;;  %v2475_v61 = vld [vmem:[%s3786_s0 + $0x78] sm:$0xff]  }
 0x4e0   :  { %v1538_v14 = vpop.permute.xlu1 %1537  ;;  %v3590_v50 = vpop.permute.xlu0 %1741 }
 0x4e1   :  { %1981 = vperm.xlu1 %2381, %v3520_v17   ;;  %v3879_v17 = vld [vmem:[#allocation14_spill] sm:$0xff] }
 0x4e2   :  { %v1575_v12 = vrot.slane %v1526_v21, %v3879_v17 }
 0x4e4   :  { %v1541_v13 = vpop.permute.xlu1 %1540  ;;  %v3594_v34 = vpop.permute.xlu0 %1747 }
 0x4e5   :  { %1984 = vperm.xlu1 %2381, %v3339_v23   ;;  %v1594_v23 = vrot.slane %v1538_v14, %v3861_v8  ;;  %v1599_v3 = vrot.slane %v1541_v13, %v3860_v30 }
 0x4e8   :  { %v1544_v2 = vpop.permute.xlu1 %1543  ;;  %v3596_v58 = vpop.permute.xlu0 %1753 }
 0x4e9   :  { %1987 = vperm.xlu1 %2381, %v3343_v10   ;;  %v1580_v10 = vsel %vm3880_vm2, %v1579_v35, %v1575_v12  ;;  %v1604_v9 = vrot.slane %v1544_v2, %v2986_v11  ;;  %vm3881_vm2 = vcmask 786112  }
 0x4ea   :  { %v1585_v24 = vsel %vm860_vm3, %v1584_v62, %v1580_v10  ;;  %v1780_v62 = vrot.slane %v3583_v63, %v3878_v53  ;;  %v1790_v63 = vrot.slane %v3587_v0, %v2955_v57  ;;  %v2477_v0 = vld [vmem:[%s3786_s0 + $0x68] sm:$0xff]  }
 0x4eb   :  { %v1590_v52 = vsel %vm867_vm4, %v1589_v28, %v1585_v24 }
 0x4ec   :  { %v1547_v54 = vpop.permute.xlu1 %1546  ;;  %v3602_v22 = vpop.permute.xlu0 %1759  ;;  %v1595_v26 = vsel %vm874_vm5, %v1594_v23, %v1590_v52 }
 0x4ed   :  { %v1609_v20 = vrot.slane %v1547_v54, %v3000_v37  ;;  %v1600_v43 = vsel %vm881_vm6, %v1599_v3, %v1595_v26  ;;  %v1800_v26 = vrot.slane %v3590_v50, %v3860_v30  ;;  %v2478_v50 = vld [vmem:[%s3786_s0 + $0x60] sm:$0xff]  }
 0x4ee   :  { %v1605_v4 = vsel %vm888_vm7, %v1604_v9, %v1600_v43 }
 0x4ef   :  { %v1610_v41 = vsel %vm895_vm8, %v1609_v20, %v1605_v4 }
 0x4f0   :  { %v1553_v48 = vpop.permute.xlu1 %1552  ;;  %v3613_v42 = vpop.permute.xlu0 %1765  ;;  %v1615_v29 = vsel %vm902_vm9, %v1614_v27, %v1610_v41  ;;  %v1810_v27 = vrot.slane %v3594_v34, %v3000_v37  ;;  %v2479_v34 = vld [vmem:[%s3786_s0 + $0x58] sm:$0xff]  }
 0x4f1   :  { %v1619_v19 = vrot.slane %v1553_v48, %v3862_v45 }
 0x4f3   :  { %v1620_v40 = vsel %vm909_vm10, %v1619_v19, %v1615_v29 }
 0x4f4   :  { %v1556_v38 = vpop.permute.xlu1 %1555  ;;  %v3624_v16 = vpop.permute.xlu0 %1771 }
 0x4f5   :  { %v1624_v5 = vrot.slane %v1556_v38, %v3026_v33 }
 0x4f7   :  { %v1625_v60 = vsel %vm916_vm11, %v1624_v5, %v1620_v40  ;;  %v1820_v40 = vrot.slane %v3596_v58, %v3862_v45  ;;  %v2480_v58 = vld [vmem:[%s3786_s0 + $0x50] sm:$0xff]  }
 0x4f8   :  { %v1559_v32 = vpop.permute.xlu1 %1558  ;;  %v3634_v2 = vpop.permute.xlu0 %1945 }
 0x4f9   :  { %v1629_v47 = vrot.slane %v1559_v32, %v3040_v18  ;;  %v2476_v32 = vld [vmem:[%s3786_s0 + $0x70] sm:$0xff]  }
 0x4fb   :  { %v1630_v7 = vsel %vm3881_vm2, %v1629_v47, %v1625_v60  ;;  %vm3883_vm2 = vcmask 130112  }
 0x4fc   :  { %v1562_v51 = vpop.permute.xlu1 %1561  ;;  %v3647_v23 = vpop.permute.xlu0 %1993 }
 0x4fd   :  { %v1634_v6 = vrot.slane %v1562_v51, %v3035_v31 }
 0x4ff   :  { %v1635_v21 = vsel %vm930_vm13, %v1634_v6, %v1630_v7 }
 0x500   :  { %v1565_v49 = vpop.permute.xlu1 %1564  ;;  %v3662_v43 = vpop.permute.xlu0 %1996 }
 0x501   :  { %v1639_v39 = vrot.slane %v1565_v49, %v3044_v1 }
 0x503   :  { %v1640_v14 = vsel %vm937_vm14, %v1639_v39, %v1635_v21  ;;  %v1830_v21 = vrot.slane %v3602_v22, %v3040_v18  ;;  %v2481_v22 = vld [vmem:[%s3786_s0 + $0x48] sm:$0xff]  }
 0x504   :  { %v1568_v25 = vpop.permute.xlu1 %1567  ;;  %v2000_v49 = vpop.permute.xlu0 %1999 }
 0x505   :  { %v1644_v46 = vrot.slane %v1568_v25, %v3049_v56 }
 0x507   :  { %v1645_v13 = vsel %vm944_vm15, %v1644_v46, %v1640_v14 }
 0x508   :  { %v1727_v54 = vpop.permute.xlu1 %1726  ;;  %v1650_v48 = vsel %vm951_vm0, %v1649_v59, %v1645_v13  ;;  %v2003_v46 = vpop.permute.xlu0 %2002 }
 0x509   :  { %v1651_v35 = vpack.c.b16 %v1650_v48, %v1650_v48  ;;  %v1776_v38 = vrot.slane %v1727_v54, %v3879_v17  ;;  %v1840_v48 = vrot.slane %v3613_v42, %v3044_v1 }
 0x50b   :  { %2352 = vmatmul.mubr.bf16.vlgmr.msra.gmra.mxu1 %v1651_v35  ;;  %v1781_v10 = vsel %vm3883_vm2, %v1780_v62, %v1776_v38  ;;  %v1850_v62 = vrot.slane %v3624_v16, %v3882_v55 }
 0x50c   :  { %2356 = vmatpush3.bf16.msra.mxu1 %v2475_v61  ;;  %v1733_v12 = vpop.permute.xlu1 %1732  ;;  %2371 = vmatprep.mubr.msk.bf16.mxu1 %vm2530_vm12, %v2529_v36  ;;  %vm3884_vm12 = vcmask 786112   ;;  %v2006_v61 = vpop.permute.xlu0 %2005 }
 0x50d   :  { %v1785_v28 = vrot.slane %v1733_v12, %v2944_v15  ;;  %2357 = vmatprep.subr.bf16.mxu1 %v2529_v36 }
 0x50f   :  { %v1786_v3 = vsel %vm860_vm3, %v1785_v28, %v1781_v10  ;;  %v2482_v10 = vld [vmem:[%s3786_s0 + $0x40] sm:$0xff]   ;;  %s2531_s0 = smov [#allocation4]  }
 0x510   :  { %2358 = vmatpush3.bf16.msra.mxu1 %v2476_v32  ;;  %v1739_v24 = vpop.permute.xlu1 %1738  ;;  %v1791_v52 = vsel %vm867_vm4, %v1790_v63, %v1786_v3  ;;  %v2009_v32 = vpop.permute.xlu0 %2008  ;;  %s2214_s14 = sshll.u32 %s2531_s0, 4  ;;  %s2215_s14 = int_to_ptr.vmem [resolvable:$true] %s2214_s14 }
 0x511   :  { %v1795_v9 = vrot.slane %v1739_v24, %v3861_v8  ;;  %2359 = vmatprep.subr.bf16.mxu1 %v2529_v36  ;;  %s2483_s15 = scalar_lea.vmem %s2215_s14, 32  ;;  %p2488_p1 = scmp.lt.s32.totalorder %s2215_s14, %s2215_s14 }
 0x512   :  { %p2484_p0 = scmp.ne.s32.totalorder %s2215_s14, %s2483_s15  ;;  %p2489_p2 = scmp.lt.s32.totalorder %s2483_s15, %s2483_s15 }
 0x513   :  { %v1796_v20 = vsel %vm874_vm5, %v1795_v9, %v1791_v52 }
 0x514   :  { %2360 = vmatpush3.bf16.msra.mxu1 %v2477_v0  ;;  %v1745_v51 = vpop.permute.xlu1 %1744  ;;  %v1801_v41 = vsel %vm881_vm6, %v1800_v26, %v1796_v20  ;;  %v2012_v9 = vpop.permute.xlu0 %2011  ;;  %v2123_v0 = vrot.slane %v3647_v23, %v3878_v53  ;;  %p2490_p3 = por %p2489_p2, %p2488_p1 }
 0x515   :  { %v1805_v4 = vrot.slane %v1745_v51, %v2986_v11  ;;  %2361 = vmatprep.subr.bf16.mxu1 %v2529_v36 }
 0x516   :  { %p2491_p4 = pnand %p2490_p3, %p2484_p0 }
 0x517   :  { %v1806_v19 = vsel %vm888_vm7, %v1805_v4, %v1801_v41  ;;  %v2128_v41 = vrot.slane %v3662_v43, %v2944_v15  ;;  %v2148_v43 = vrot.slane %v2009_v32, %v2986_v11 }
 0x518   :  { %2362 = vmatpush3.bf16.msra.mxu1 %v2478_v50  ;;  %v1751_v5 = vpop.permute.xlu1 %1750  ;;  %v1811_v29 = vsel %vm895_vm8, %v1810_v27, %v1806_v19  ;;  %v2015_v52 = vpop.permute.xlu0 %2014 }
 0x519   :  { %v1815_v47 = vrot.slane %v1751_v5, %v2993_v44  ;;  %2363 = vmatprep.subr.bf16.mxu1 %v2529_v36  ;;  %v2133_v5 = vrot.slane %v2000_v49, %v2955_v57  ;;  %v2153_v49 = vrot.slane %v2012_v9, %v3000_v37 }
 0x51b   :  { %v1816_v6 = vsel %vm902_vm9, %v1815_v47, %v1811_v29  ;;  %v2138_v29 = vrot.slane %v2003_v46, %v3861_v8  ;;  %v2158_v46 = vrot.slane %v2015_v52, %v2993_v44 }
 0x51c   :  { %2364 = vmatpush3.bf16.msra.mxu1 %v2479_v34  ;;  %v1757_v39 = vpop.permute.xlu1 %1756  ;;  %v1821_v7 = vsel %vm909_vm10, %v1820_v40, %v1816_v6  ;;  %v2018_v19 = vpop.permute.xlu0 %2017  ;;  %v2143_v34 = vrot.slane %v2006_v61, %v3860_v30 }
 0x51d   :  { %v1825_v60 = vrot.slane %v1757_v39, %v3026_v33  ;;  %2365 = vmatprep.subr.bf16.mxu1 %v2529_v36 }
 0x51f   :  { %v1826_v25 = vsel %vm916_vm11, %v1825_v60, %v1821_v7 }
 0x520   :  { %2366 = vmatpush3.bf16.msra.mxu1 %v2480_v58  ;;  %v1763_v59 = vpop.permute.xlu1 %1762  ;;  %v1831_v13 = vsel %vm3884_vm12, %v1830_v21, %v1826_v25  ;;  %v2021_v6 = vpop.permute.xlu0 %2020  ;;  %vm3885_vm12 = vmmov %vm3883_vm2 }
 0x521   :  { %v1835_v14 = vrot.slane %v1763_v59, %v3035_v31  ;;  %2367 = vmatprep.subr.bf16.mxu1 %v2529_v36 }
 0x523   :  { %v1836_v54 = vsel %vm930_vm13, %v1835_v14, %v1831_v13 }
 0x524   :  { %2368 = vmatpush3.bf16.msra.mxu1 %v2481_v22  ;;  %v1769_v35 = vpop.permute.xlu1 %1768  ;;  %v1841_v12 = vsel %vm937_vm14, %v1840_v48, %v1836_v54  ;;  %v2024_v7 = vpop.permute.xlu0 %2023  ;;  %v2163_v54 = vrot.slane %v2018_v19, %v3862_v45 }
 0x525   :  { %v1845_v38 = vrot.slane %v1769_v35, %v3049_v56  ;;  %2369 = vmatprep.subr.bf16.mxu1 %v2529_v36  ;;  %v2173_v32 = vrot.slane %v2024_v7, %v3040_v18 }
 0x527   :  { %v1846_v28 = vsel %vm944_vm15, %v1845_v38, %v1841_v12  ;;  %v2168_v38 = vrot.slane %v2021_v6, %v3026_v33  ;;  %v2044_v12 = vrot.slane %v3634_v2, %v3878_v53 }
 0x528   :  { %v1851_v42 = vsel %vm951_vm0, %v1850_v62, %v1846_v28  ;;  %2370 = vmatpush3.bf16.msra.mxu1 %v2482_v10  ;;  %v1943_v3 = vpop.permute.xlu1 %1942  ;;  %v2027_v59 = vpop.permute.xlu0 %2026 }
 0x529   :  { %v1852_v63 = vpack.c.b16 %v1851_v42, %v1851_v42  ;;  %v2040_v22 = vrot.slane %v1943_v3, %v3879_v17  ;;  %v2178_v2 = vrot.slane %v2027_v59, %v3035_v31 }
 0x52b   :  { %2372 = vmatmul.mubr.bf16.vlgmr.msra.gmra.mxu1 %v1852_v63 }
 0x52c   :  { %v1991_v36 = vpop.permute.xlu1 %1990  ;;  %v2030_v62 = vpop.permute.xlu0 %2029 }
 0x52d   :  { %v2119_v26 = vrot.slane %v1991_v36, %v3879_v17  ;;  %v2045_v17 = vsel %vm3885_vm12, %v2044_v12, %v2040_v22 }
 0x52f   :  { %v2124_v4 = vsel %vm3883_vm2, %v2123_v0, %v2119_v26  ;;  %vm3886_vm2 = vcmask 786112  }
 0x530   :  { %v1949_v24 = vpop.permute.xlu1 %1948  ;;  %v2129_v27 = vsel %vm860_vm3, %v2128_v41, %v2124_v4 }
 0x531   :  { %v2134_v47 = vsel %vm867_vm4, %v2133_v5, %v2129_v27  ;;  %v2049_v61 = vrot.slane %v1949_v24, %v2944_v15 }
 0x532   :  { %v2139_v23 = vsel %vm874_vm5, %v2138_v29, %v2134_v47 }
 0x533   :  { %v2144_v60 = vsel %vm881_vm6, %v2143_v34, %v2139_v23  ;;  %v2050_v36 = vsel %vm860_vm3, %v2049_v61, %v2045_v17  ;;  %vm3887_vm3 = vmmov %vm3886_vm2 }
 0x534   :  { %v1952_v16 = vpop.permute.xlu1 %1951  ;;  %v2149_v25 = vsel %vm888_vm7, %v2148_v43, %v2144_v60 }
 0x535   :  { %v2154_v58 = vsel %vm895_vm8, %v2153_v49, %v2149_v25  ;;  %v2054_v28 = vrot.slane %v1952_v16, %v2955_v57 }
 0x536   :  { %v2159_v13 = vsel %vm902_vm9, %v2158_v46, %v2154_v58 }
 0x537   :  { %v2164_v35 = vsel %vm909_vm10, %v2163_v54, %v2159_v13  ;;  %v2055_v53 = vsel %vm867_vm4, %v2054_v28, %v2050_v36 }
 0x538   :  { %v1955_v20 = vpop.permute.xlu1 %1954  ;;  %v2169_v42 = vsel %vm916_vm11, %v2168_v38, %v2164_v35 }
 0x539   :  { %v2059_v10 = vrot.slane %v1955_v20, %v3861_v8  ;;  %v2174_v24 = vsel %vm3886_vm2, %v2173_v32, %v2169_v42  ;;  %v2033_v8 = vpop.permute.xlu0 %2032 }
 0x53a   :  { %v2188_v5 = vrot.slane %v2033_v8, %v3049_v56 }
 0x53b   :  { %v2060_v9 = vsel %vm874_vm5, %v2059_v10, %v2055_v53 }
 0x53c   :  { %v1958_v51 = vpop.permute.xlu1 %1957 }
 0x53d   :  { %v2064_v3 = vrot.slane %v1958_v51, %v3860_v30 }
 0x53f   :  { %v2065_v30 = vsel %vm881_vm6, %v2064_v3, %v2060_v9 }
 0x540   :  { %v1961_v50 = vpop.permute.xlu1 %1960 }
 0x541   :  { %v2069_v15 = vrot.slane %v1961_v50, %v2986_v11  ;;  %v2179_v11 = vsel %vm930_vm13, %v2178_v2, %v2174_v24 }
 0x543   :  { %v2070_v26 = vsel %vm888_vm7, %v2069_v15, %v2065_v30 }
 0x544   :  { %v1964_v40 = vpop.permute.xlu1 %1963 }
 0x545   :  { %v2074_v57 = vrot.slane %v1964_v40, %v3000_v37  ;;  %v2183_v37 = vrot.slane %v2030_v62, %v3044_v1 }
 0x547   :  { %v2075_v51 = vsel %vm895_vm8, %v2074_v57, %v2070_v26  ;;  %v2184_v27 = vsel %vm937_vm14, %v2183_v37, %v2179_v11 }
 0x548   :  { %v1967_v39 = vpop.permute.xlu1 %1966  ;;  %v2189_v6 = vsel %vm944_vm15, %v2188_v5, %v2184_v27 }
 0x549   :  { %v2079_v16 = vrot.slane %v1967_v39, %v2993_v44 }
 0x54b   :  { %v2080_v41 = vsel %vm902_vm9, %v2079_v16, %v2075_v51 }
 0x54c   :  { %v1970_v21 = vpop.permute.xlu1 %1969 }
 0x54d   :  { %v2084_v20 = vrot.slane %v1970_v21, %v3862_v45 }
 0x54f   :  { %v2085_v45 = vsel %vm909_vm10, %v2084_v20, %v2080_v41 }
 0x550   :  { %v1973_v14 = vpop.permute.xlu1 %1972 }
 0x551   :  { %v2089_v0 = vrot.slane %v1973_v14, %v3026_v33  ;;  %v2036_v33 = vpop.permute.xlu0 %2035 }
 0x552   :  { %v2193_v23 = vrot.slane %v2036_v33, %v3882_v55 }
 0x553   :  { %v2090_v47 = vsel %vm916_vm11, %v2089_v0, %v2085_v45 }
 0x554   :  { %v1976_v48 = vpop.permute.xlu1 %1975  ;;  %v2194_v43 = vsel %vm951_vm0, %v2193_v23, %v2189_v6 }
 0x555   :  { %v2094_v4 = vrot.slane %v1976_v48, %v3040_v18 }
 0x557   :  { %v2095_v18 = vsel %vm3887_vm3, %v2094_v4, %v2090_v47 }
 0x558   :  { %v1979_v63 = vpop.permute.xlu1 %1978 }
 0x559   :  { %v2099_v44 = vrot.slane %v1979_v63, %v3035_v31 }
 0x55b   :  { %v2100_v31 = vsel %vm930_vm13, %v2099_v44, %v2095_v18 }
 0x55c   :  { %v1982_v52 = vpop.permute.xlu1 %1981 }
 0x55d   :  { %v2104_v50 = vrot.slane %v1982_v52, %v3044_v1 }
 0x55f   :  { %v2105_v34 = vsel %vm937_vm14, %v2104_v50, %v2100_v31 }
 0x560   :  { %v1985_v19 = vpop.permute.xlu1 %1984 }
 0x561   :  { %v2109_v29 = vrot.slane %v1985_v19, %v3049_v56 }
 0x563   :  { %v2110_v39 = vsel %vm944_vm15, %v2109_v29, %v2105_v34 }
 0x564   :  { %v1988_v40 = vpop.permute.xlu1 %1987 }
 0x565   :  { %v2114_v1 = vrot.slane %v1988_v40, %v3882_v55 }
 0x567   :  { %v2115_v60 = vsel %vm951_vm0, %v2114_v1, %v2110_v39 }
 0x568   :  { %v2195_v56 = vsel %vm1032_vm1, %v2194_v43, %v2115_v60 }
 0x569   :  { %2197 = vst [vmem:[#allocation4] sm:$0x3] %v2195_v56 }
 0x56a   :  { %2494 = shalt.err (!%p2491_p4)
}
 0x56b   :  { %2217 = dma.vmem_to_hbm [thread:$0]  %s2215_s14, 32, %s3792_s6, [#allocation5]   ;;  %vm1907_vm4 = vcmask 254976  }
 0x56c   :  { %s2532_s17 = smov [#allocation2]  }
 0x56d   :  { %s2204_s18 = sshll.u32 %s2532_s17, 4  ;;  %s2205_s18 = int_to_ptr.vmem [resolvable:$true] %s2204_s18 }
 0x56e   :  { %s2503_s19 = scalar_lea.vmem %s2205_s18, 32  ;;  %p2508_p6 = scmp.lt.s32.totalorder %s2205_s18, %s2205_s18 }
 0x56f   :  { %p2504_p5 = scmp.ne.s32.totalorder %s2205_s18, %s2503_s19  ;;  %p2509_p7 = scmp.lt.s32.totalorder %s2503_s19, %s2503_s19 }
 0x571   :  { %p2510_p8 = por %p2509_p7, %p2508_p6 }
 0x573   :  { %p2511_p9 = pnand %p2510_p8, %p2504_p5 }
 0x5cb   :  { %v1695_v55 = vpop.f32.mrf.mxu1 }
 0x5cd   :  { %v2353_v7 = vpop.f32.mrf.mxu1 }
 0x5cf   :  { %v1698_v25 = vpop.f32.mrf.mxu1 }
 0x5d1   :  { %v2354_v21 = vpop.f32.mrf.mxu1 }
 0x5eb   :  { %v1896_v49 = vpop.f32.mrf.mxu1 }
 0x5ec   :  { %v1904_v58 = vrot.slane %v1896_v49, 7 }
 0x5ed   :  { %v2373_v46 = vpop.f32.mrf.mxu1 }
 0x5ee   :  { %v1905_v59 = vsel %vm1032_vm1, %v1904_v58, %v1695_v55 }
 0x5ef   :  { %v1899_v14 = vpop.f32.mrf.mxu1  ;;  %1908 = vst.msk [vmem:[#allocation2] sm:$0x3] %vm1907_vm4, %v1905_v59 }
 0x5f0   :  { %2514 = shalt.err (!%p2511_p9)
}
 0x5f1   :  { %2207 = dma.vmem_to_hbm [thread:$0]  %s2205_s18, 32, %s3791_s5, [#allocation3]   ;;  %v2374_v13 = vpop.f32.mrf.mxu1 }
 0x5f2   :  { %2523 = dma.done.wait [#allocation3], 32  }
 0x5f3   :  { %2524 = vsyncadd [#allocation3], 4294967264 }
 0x5f4   :  { %2525 = dma.done.wait [#allocation5], 32  }
 0x5f5   :  { %2526 = vsyncadd [#allocation5], 4294967264 }
 0x5f6   :  { %2224 = vsyncpa [#allocation3], 1 }
 0x5f7   :  { %2225 = vsyncpa [#allocation5], 1 }

// kernel: tpu_custom_call.1
= control target key start
LH: loop header
LB: loop body
LE: loop exit
PB: predicated region body
PF: predicated region fallthrough
CT: control target
= control target key end

     0   :  { %12 = vsyncpa [#allocation3], 0  ;;  %vm153_vm0 = vcmask 261120   ;;  %s3786_s0 = inlined_call_operand.vmem [shape: bf16[2,128,32], index: 0, kind: input, shape index: {}]   ;;  %s3787_s1 = inlined_call_operand.vmem [shape: f32[2,48], index: 1, kind: input, shape index: {}]   ;;  %s3788_s2 = inlined_call_operand.vmem [shape: bf16[32,48], index: 2, kind: input, shape index: {}]   ;;  %s3789_s3 = inlined_call_operand.vmem [shape: f32[1,48], index: 3, kind: input, shape index: {}]   ;;  %s3790_s4 = inlined_call_operand.vmem [shape: f32[1,128], index: 4, kind: input, shape index: {}]   ;;  %s3791_s5 = inlined_call_operand.hbm [shape: f32[2,32], index: 5, kind: output, shape index: {0}]   ;;  %s3792_s6 = inlined_call_operand.hbm [shape: f32[2,128], index: 6, kind: output, shape index: {1}]  }
   0x1   :  { %v2383_v0 = vld [vmem:[%s3788_s2 + $0x8] sm:$0xff]   ;;  %v2384_v1 = vld [vmem:[%s3788_s2] sm:$0xff]   ;;  %v2387_v4 = vld [vmem:[%s3786_s0 + $0x10] sm:$0xff]  }
   0x2   :  { %2299 = vmatprep.subr.bf16.mxu0 %v2383_v0  ;;  %v2385_v2 = vld [vmem:[%s3786_s0] sm:$0xff]   ;;  %v2386_v3 = vld [vmem:[%s3786_s0 + $0x8] sm:$0xff]   ;;  %v2388_v5 = vld [vmem:[%s3786_s0 + $0x18] sm:$0xff]  }
   0x3   :  { %2300 = vmatpush3.bf16.msra.mxu0 %v2383_v0  ;;  %2303 = vmatprep.mubr.msk.bf16.mxu0 %vm153_vm0, %v2385_v2  ;;  %v2389_v6 = vld [vmem:[%s3786_s0 + $0x20] sm:$0xff]  }
   0x4   :  { %2301 = vmatprep.subr.bf16.mxu0 %v2384_v1  ;;  %v2262_v7 = vld [vmem:[%s3790_s4] ss:$0 sm:$0xff] }
   0x7   :  { %2302 = vmatpush3.bf16.msra.mxu0 %v2384_v1 }
   0xa   :  { %2304 = vmatmul.mubr.msk.bf16.vlgmr.msra.gmra.mxu0 %vm153_vm0, %v2386_v3 }
   0xb   :  { %2307 = vmatprep.mubr.msk.bf16.mxu0 %vm153_vm0, %v2387_v4 }
  0x12   :  { %2308 = vmatmul.mubr.msk.bf16.gmra.mxu0 %vm153_vm0, %v2388_v5 }
  0x13   :  { %13 = vsyncpa [#allocation5], 0  ;;  %2311 = vmatprep.mubr.msk.bf16.mxu0 %vm153_vm0, %v2389_v6  ;;  %604 = vbcast.lane.b32.xlu0 %v2262_v7, 256  ;;  %v2390_v8 = vld [vmem:[%s3786_s0 + $0x28] sm:$0xff]   ;;  %v2391_v9 = vld [vmem:[%s3786_s0 + $0x30] sm:$0xff]   ;;  %v376_v21 = vlaneseq  ;;  %vm500_vm1 = vcmask 392192  }
  0x14   :  { %608 = vbcast.lane.b32.xlu1 %v2262_v7, 264  ;;  %v2392_v10 = vld [vmem:[%s3786_s0 + $0x38] sm:$0xff]   ;;  %v2393_v11 = vld [vmem:[%s3786_s0 + $0x40] sm:$0xff]   ;;  %v2394_v12 = vld [vmem:[%s3786_s0 + $0x48] sm:$0xff]   ;;  %v2527_v19 = vmov 1966171168  }
  0x15   :  { %v2395_v13 = vld [vmem:[%s3786_s0 + $0x50] sm:$0xff]   ;;  %v2396_v14 = vld [vmem:[%s3786_s0 + $0x58] sm:$0xff]   ;;  %v2397_v15 = vld [vmem:[%s3786_s0 + $0x60] sm:$0xff]   ;;  %v374_v20 = vunpack.c.l.s4 %v2527_v19  ;;  %v2642_v23 = vshrl.u32 %v376_v21, 7  ;;  %v2528_v62 = vmov 0   ;;  %vm3825_vm2 = vcmask 130112  }
  0x16   :  { %v2398_v16 = vld [vmem:[%s3786_s0 + $0x68] sm:$0xff]   ;;  %v2399_v17 = vld [vmem:[%s3786_s0 + $0x70] sm:$0xff]   ;;  %v2400_v18 = vld [vmem:[%s3786_s0 + $0x78] sm:$0xff]   ;;  %2381 = vset.pattern.permute.xlu1 %v2528_v62  ;;  %2382 = vset.pattern.permute.xlu0 %v2528_v62  ;;  %vm860_vm3 = vcmask 195712   ;;  %vm867_vm4 = vcmask 261312   ;;  %vm874_vm5 = vcmask 326912  }
  0x17   :  { %612 = vbcast.lane.b32.xlu0 %v2262_v7, 272  ;;  %v375_v22 = vunpack.c.0.s8 %v374_v20  ;;  %v2260_v25 = vld.sshfl [vmem:[%s3787_s1] sm:$0x11 pattern:$0x75316420]  ;;  %v2649_v27 = vsub.s32 0, %v2642_v23 }
  0x18   :  { %616 = vbcast.lane.b32.xlu1 %v2262_v7, 280  ;;  %v2658_v32 = vld [vmem:[%s3789_s3] ss:$0 sm:$0xff]  ;;  %v372_v0 = vcombine.high %v2260_v25, %v2260_v25  ;;  %vm881_vm6 = vcmask 392512   ;;  %vm888_vm7 = vcmask 458112   ;;  %vm895_vm8 = vcmask 523712  }
  0x19   :  { %v378_v24 = vsub.s32 %v375_v22, %v2642_v23  ;;  %vm902_vm9 = vcmask 589312   ;;  %vm909_vm10 = vcmask 654912   ;;  %vm916_vm11 = vcmask 720512  }
  0x1a   :  { %2312 = vmatmul.mubr.msk.bf16.gmra.mxu0 %vm153_vm0, %v2390_v8  ;;  %vm3807_vm12 = vcmask 786112   ;;  %vm930_vm13 = vcmask 851712   ;;  %vm937_vm14 = vcmask 917312   ;;  %vm944_vm15 = vcmask 982912  }
  0x1b   :  { %2315 = vmatprep.mubr.msk.bf16.mxu0 %vm153_vm0, %v2391_v9  ;;  %620 = vbcast.lane.b32.xlu0 %v2262_v7, 288  ;;  %v379_v26 = vrot.slane %v2260_v25, %v378_v24  ;;  %v386_v8 = vrot.slane %v372_v0, %v378_v24 }
  0x1c   :  { %624 = vbcast.lane.b32.xlu1 %v2262_v7, 296 }
  0x1d   :  { %v2652_v28 = vrot.slane %v379_v26, %v2649_v27 }
  0x1f   :  { %628 = vbcast.lane.b32.xlu0 %v2262_v7, 304 }
  0x20   :  { %632 = vbcast.lane.b32.xlu1 %v2262_v7, 312 }
  0x22   :  { %2316 = vmatmul.mubr.msk.bf16.gmra.mxu0 %vm153_vm0, %v2392_v10 }
  0x23   :  { %2319 = vmatprep.mubr.msk.bf16.mxu0 %vm153_vm0, %v2393_v11  ;;  %636 = vbcast.lane.b32.xlu0 %v2262_v7, 320 }
  0x24   :  { %640 = vbcast.lane.b32.xlu1 %v2262_v7, 328 }
  0x27   :  { %644 = vbcast.lane.b32.xlu0 %v2262_v7, 336 }
  0x28   :  { %648 = vbcast.lane.b32.xlu1 %v2262_v7, 344 }
  0x2a   :  { %2320 = vmatmul.mubr.msk.bf16.gmra.mxu0 %vm153_vm0, %v2394_v12 }
  0x2b   :  { %2323 = vmatprep.mubr.msk.bf16.mxu0 %vm153_vm0, %v2395_v13  ;;  %652 = vbcast.lane.b32.xlu0 %v2262_v7, 352 }
  0x2c   :  { %656 = vbcast.lane.b32.xlu1 %v2262_v7, 360 }
  0x2f   :  { %660 = vbcast.lane.b32.xlu0 %v2262_v7, 368 }
  0x30   :  { %664 = vbcast.lane.b32.xlu1 %v2262_v7, 376 }
  0x32   :  { %2324 = vmatmul.mubr.msk.bf16.gmra.mxu0 %vm153_vm0, %v2396_v14 }
  0x33   :  { %2327 = vmatprep.mubr.msk.bf16.mxu0 %vm153_vm0, %v2397_v15 }
  0x3a   :  { %2328 = vmatmul.mubr.msk.bf16.gmra.mxu0 %vm153_vm0, %v2398_v16 }
  0x3b   :  { %2331 = vmatprep.mubr.msk.bf16.mxu0 %vm153_vm0, %v2399_v17 }
  0x42   :  { %2332 = vmatmul.mubr.msk.bf16.gmra.mxu0 %vm153_vm0, %v2400_v18  ;;  %v2685_v18 = vrot.slane %v386_v8, %v2649_v27  ;;  %vm951_vm0 = vcmask 1048512  }
  0xca   :  { %v2305_v29 = vpop.f32.mrf.mxu0 }
  0xcb   :  { %v399_v30 = vadd.f32 %v2305_v29, %v2652_v28 }
  0xcc   :  { %v236_v31 = vpop.f32.mrf.mxu0 }
  0xcd   :  { %v431_v33 = vmax.f32 %v399_v30, 0.0  ;;  %v397_v34 = vadd.f32 %v2652_v28, %v236_v31 }
  0xce   :  { %v2306_v35 = vpop.f32.mrf.mxu0 }
  0xcf   :  { %v429_v36 = vmax.f32 %v397_v34, 0.0  ;;  %v400_v37 = vadd.f32 %v2306_v35, %v2652_v28  ;;  %v470_v38 = vmul.f32 %v2658_v32, %v431_v33 }
  0xd0   :  { %v239_v39 = vpop.f32.mrf.mxu0 }
  0xd1   :  { %v432_v40 = vmax.f32 %v400_v37, 0.0  ;;  %v398_v41 = vadd.f32 %v2652_v28, %v239_v39  ;;  %v507_v42 = vsel %vm500_vm1, %v470_v38, 0.0  ;;  %v468_v43 = vmul.f32 %v2658_v32, %v429_v36 }
  0xd2   :  { %508 = vadd.xlane.f32.xlu0 %v507_v42  ;;  %v2309_v44 = vpop.f32.mrf.mxu0 }
  0xd3   :  { %v430_v46 = vmax.f32 %v398_v41, 0.0  ;;  %v403_v47 = vadd.f32 %v2309_v44, %v2652_v28  ;;  %v501_v48 = vsel %vm500_vm1, %v468_v43, 0.0  ;;  %v471_v49 = vmul.f32 %v2658_v32, %v432_v40 }
  0xd4   :  { %v252_v45 = vpop.f32.mrf.mxu0 }
  0xd5   :  { %v435_v52 = vmax.f32 %v403_v47, 0.0  ;;  %v401_v53 = vadd.f32 %v2652_v28, %v252_v45  ;;  %v510_v54 = vsel %vm500_vm1, %v471_v49, 0.0  ;;  %v469_v55 = vmul.f32 %v2658_v32, %v430_v46 }
  0xd6   :  { %502 = vadd.xlane.f32.xlu0 %v501_v48  ;;  %v2310_v50 = vpop.f32.mrf.mxu0 }
  0xd7   :  { %v433_v58 = vmax.f32 %v401_v53, 0.0  ;;  %v404_v59 = vadd.f32 %v2310_v50, %v2652_v28  ;;  %v504_v60 = vsel %vm500_vm1, %v469_v55, 0.0  ;;  %v474_v61 = vmul.f32 %v2658_v32, %v435_v52 }
  0xd8   :  { %v255_v51 = vpop.f32.mrf.mxu0 }
  0xd9   :  { %v436_v2 = vmax.f32 %v404_v59, 0.0  ;;  %v402_v3 = vadd.f32 %v2652_v28, %v255_v51  ;;  %v519_v4 = vsel %vm500_vm1, %v474_v61, 0.0  ;;  %v472_v5 = vmul.f32 %v2658_v32, %v433_v58 }
  0xda   :  { %511 = vadd.xlane.f32.xlu0 %v510_v54  ;;  %v2313_v56 = vpop.f32.mrf.mxu0 }
  0xdb   :  { %v407_v9 = vadd.f32 %v2313_v56, %v2652_v28  ;;  %v434_v11 = vmax.f32 %v402_v3, 0.0  ;;  %v513_v13 = vsel %vm500_vm1, %v472_v5, 0.0  ;;  %v475_v14 = vmul.f32 %v2658_v32, %v436_v2 }
  0xdc   :  { %v268_v57 = vpop.f32.mrf.mxu0 }
  0xdd   :  { %v439_v19 = vmax.f32 %v407_v9, 0.0  ;;  %v405_v20 = vadd.f32 %v2652_v28, %v268_v57  ;;  %v522_v25 = vsel %vm500_vm1, %v475_v14, 0.0  ;;  %v473_v29 = vmul.f32 %v2658_v32, %v434_v11 }
  0xde   :  { %505 = vadd.xlane.f32.xlu0 %v504_v60  ;;  %v2314_v63 = vpop.f32.mrf.mxu0 }
  0xdf   :  { %v437_v34 = vmax.f32 %v405_v20, 0.0  ;;  %v408_v35 = vadd.f32 %v2314_v63, %v2652_v28  ;;  %v478_v37 = vmul.f32 %v2658_v32, %v439_v19  ;;  %v516_v40 = vsel %vm500_vm1, %v473_v29, 0.0 }
  0xe0   :  { %v271_v1 = vpop.f32.mrf.mxu0 }
  0xe1   :  { %v440_v46 = vmax.f32 %v408_v35, 0.0  ;;  %v406_v47 = vadd.f32 %v2652_v28, %v271_v1  ;;  %v531_v49 = vsel %vm500_vm1, %v478_v37, 0.0  ;;  %v476_v50 = vmul.f32 %v2658_v32, %v437_v34 }
  0xe2   :  { %520 = vadd.xlane.f32.xlu0 %v519_v4  ;;  %v2317_v6 = vpop.f32.mrf.mxu0 }
  0xe3   :  { %v411_v7 = vadd.f32 %v2317_v6, %v2652_v28  ;;  %v438_v58 = vmax.f32 %v406_v47, 0.0  ;;  %v525_v60 = vsel %vm500_vm1, %v476_v50, 0.0  ;;  %v479_v63 = vmul.f32 %v2658_v32, %v440_v46 }
  0xe4   :  { %v284_v10 = vpop.f32.mrf.mxu0 }
  0xe5   :  { %v443_v12 = vmax.f32 %v411_v7, 0.0  ;;  %v409_v55 = vadd.f32 %v2652_v28, %v284_v10  ;;  %v534_v7 = vsel %vm500_vm1, %v479_v63, 0.0  ;;  %v477_v9 = vmul.f32 %v2658_v32, %v438_v58 }
  0xe6   :  { %514 = vadd.xlane.f32.xlu0 %v513_v13  ;;  %v2318_v15 = vpop.f32.mrf.mxu0 }
  0xe7   :  { %v412_v16 = vadd.f32 %v2318_v15, %v2652_v28  ;;  %v482_v17 = vmul.f32 %v2658_v32, %v443_v12  ;;  %v441_v1 = vmax.f32 %v409_v55, 0.0 }
  0xe8   :  { %v287_v22 = vpop.f32.mrf.mxu0 }
  0xe9   :  { %v444_v24 = vmax.f32 %v412_v16, 0.0  ;;  %v543_v26 = vsel %vm500_vm1, %v482_v17, 0.0  ;;  %v410_v4 = vadd.f32 %v2652_v28, %v287_v22  ;;  %v480_v12 = vmul.f32 %v2658_v32, %v441_v1 }
  0xea   :  { %523 = vadd.xlane.f32.xlu0 %v522_v25  ;;  %544 = vadd.xlane.f32.xlu1 %v543_v26  ;;  %v2321_v30 = vpop.f32.mrf.mxu0  ;;  %v528_v22 = vsel %vm500_vm1, %v477_v9, 0.0 }
  0xeb   :  { %v415_v31 = vadd.f32 %v2321_v30, %v2685_v18  ;;  %v483_v33 = vmul.f32 %v2658_v32, %v444_v24  ;;  %v442_v14 = vmax.f32 %v410_v4, 0.0  ;;  %v537_v26 = vsel %vm500_vm1, %v480_v12, 0.0 }
  0xec   :  { %v300_v36 = vpop.f32.mrf.mxu0 }
  0xed   :  { %v447_v38 = vmax.f32 %v415_v31, 0.0  ;;  %v413_v39 = vadd.f32 %v2685_v18, %v300_v36  ;;  %v546_v41 = vsel %vm500_vm1, %v483_v33, 0.0  ;;  %v481_v37 = vmul.f32 %v2658_v32, %v442_v14  ;;  %v609_v14 = vpop.permute.xlu1 %608 }
  0xee   :  { %517 = vadd.xlane.f32.xlu0 %v516_v40  ;;  %547 = vadd.xlane.f32.xlu1 %v546_v41  ;;  %v2322_v42 = vpop.f32.mrf.mxu0 }
  0xef   :  { %v445_v43 = vmax.f32 %v413_v39, 0.0  ;;  %v416_v44 = vadd.f32 %v2322_v42, %v2685_v18  ;;  %v486_v45 = vmul.f32 %v2658_v32, %v447_v38 }
  0xf0   :  { %v303_v48 = vpop.f32.mrf.mxu0 }
  0xf1   :  { %v448_v51 = vmax.f32 %v416_v44, 0.0  ;;  %v414_v52 = vadd.f32 %v2685_v18, %v303_v48  ;;  %v555_v53 = vsel %vm500_vm1, %v486_v45, 0.0  ;;  %v484_v54 = vmul.f32 %v2658_v32, %v445_v43 }
  0xf2   :  { %532 = vadd.xlane.f32.xlu0 %v531_v49  ;;  %556 = vadd.xlane.f32.xlu1 %v555_v53  ;;  %v2325_v56 = vpop.f32.mrf.mxu0  ;;  %v540_v49 = vsel %vm500_vm1, %v481_v37, 0.0 }
  0xf3   :  { %v419_v57 = vadd.f32 %v2325_v56, %v2685_v18  ;;  %v446_v61 = vmax.f32 %v414_v52, 0.0  ;;  %v549_v62 = vsel %vm500_vm1, %v484_v54, 0.0  ;;  %v487_v0 = vmul.f32 %v2658_v32, %v448_v51 }
  0xf4   :  { %v316_v59 = vpop.f32.mrf.mxu0 }
  0xf5   :  { %v451_v3 = vmax.f32 %v419_v57, 0.0  ;;  %v417_v5 = vadd.f32 %v2685_v18, %v316_v59  ;;  %v558_v8 = vsel %vm500_vm1, %v487_v0, 0.0  ;;  %v485_v10 = vmul.f32 %v2658_v32, %v446_v61 }
  0xf6   :  { %526 = vadd.xlane.f32.xlu0 %v525_v60  ;;  %550 = vadd.xlane.f32.xlu1 %v549_v62  ;;  %v2326_v2 = vpop.f32.mrf.mxu0 }
  0xf7   :  { %v490_v28 = vmul.f32 %v2658_v32, %v451_v3  ;;  %v449_v15 = vmax.f32 %v417_v5, 0.0  ;;  %v420_v16 = vadd.f32 %v2326_v2, %v2685_v18  ;;  %v552_v24 = vsel %vm500_vm1, %v485_v10, 0.0 }
  0xf8   :  { %v319_v6 = vpop.f32.mrf.mxu0 }
  0xf9   :  { %v567_v31 = vsel %vm500_vm1, %v490_v28, 0.0  ;;  %v452_v34 = vmax.f32 %v420_v16, 0.0  ;;  %v418_v35 = vadd.f32 %v2685_v18, %v319_v6  ;;  %v488_v38 = vmul.f32 %v2658_v32, %v449_v15 }
  0xfa   :  { %535 = vadd.xlane.f32.xlu0 %v534_v7  ;;  %559 = vadd.xlane.f32.xlu1 %v558_v8  ;;  %v2329_v11 = vpop.f32.mrf.mxu0 }
  0xfb   :  { %v423_v13 = vadd.f32 %v2329_v11, %v2685_v18  ;;  %v450_v48 = vmax.f32 %v418_v35, 0.0  ;;  %v561_v50 = vsel %vm500_vm1, %v488_v38, 0.0  ;;  %v491_v51 = vmul.f32 %v2658_v32, %v452_v34 }
  0xfc   :  { %v332_v17 = vpop.f32.mrf.mxu0 }
  0xfd   :  { %v455_v19 = vmax.f32 %v423_v13, 0.0  ;;  %v421_v20 = vadd.f32 %v2685_v18, %v332_v17  ;;  %v570_v62 = vsel %vm500_vm1, %v491_v51, 0.0  ;;  %v489_v63 = vmul.f32 %v2658_v32, %v450_v48 }
  0xfe   :  { %529 = vadd.xlane.f32.xlu0 %v528_v22  ;;  %553 = vadd.xlane.f32.xlu1 %v552_v24  ;;  %v2330_v25 = vpop.f32.mrf.mxu0 }
  0xff   :  { %v453_v29 = vmax.f32 %v421_v20, 0.0  ;;  %v424_v30 = vadd.f32 %v2330_v25, %v2685_v18  ;;  %v494_v33 = vmul.f32 %v2658_v32, %v455_v19  ;;  %v564_v8 = vsel %vm500_vm1, %v489_v63, 0.0 }
 0x100   :  { %v335_v36 = vpop.f32.mrf.mxu0 }
 0x101   :  { %v456_v39 = vmax.f32 %v424_v30, 0.0  ;;  %v422_v40 = vadd.f32 %v2685_v18, %v335_v36  ;;  %v579_v41 = vsel %vm500_vm1, %v494_v33, 0.0  ;;  %v492_v42 = vmul.f32 %v2658_v32, %v453_v29 }
 0x102   :  { %538 = vadd.xlane.f32.xlu0 %v537_v26  ;;  %568 = vadd.xlane.f32.xlu1 %v567_v31  ;;  %v2333_v43 = vpop.f32.mrf.mxu0 }
 0x103   :  { %v454_v44 = vmax.f32 %v422_v40, 0.0  ;;  %v427_v45 = vadd.f32 %v2333_v43, %v2685_v18  ;;  %v573_v46 = vsel %vm500_vm1, %v492_v42, 0.0  ;;  %v495_v47 = vmul.f32 %v2658_v32, %v456_v39 }
 0x104   :  { %v348_v52 = vpop.f32.mrf.mxu0 }
 0x105   :  { %v459_v53 = vmax.f32 %v427_v45, 0.0  ;;  %v425_v54 = vadd.f32 %v2685_v18, %v348_v52  ;;  %v582_v55 = vsel %vm500_vm1, %v495_v47, 0.0  ;;  %v493_v56 = vmul.f32 %v2658_v32, %v454_v44 }
 0x106   :  { %541 = vadd.xlane.f32.xlu0 %v540_v49  ;;  %562 = vadd.xlane.f32.xlu1 %v561_v50  ;;  %v2334_v57 = vpop.f32.mrf.mxu0 }
 0x107   :  { %v498_v58 = vmul.f32 %v2658_v32, %v459_v53  ;;  %v457_v59 = vmax.f32 %v425_v54, 0.0  ;;  %v428_v60 = vadd.f32 %v2334_v57, %v2685_v18  ;;  %v576_v61 = vsel %vm500_vm1, %v493_v56, 0.0 }
 0x108   :  { %v351_v0 = vpop.f32.mrf.mxu0 }
 0x109   :  { %v591_v1 = vsel %vm500_vm1, %v498_v58, 0.0  ;;  %v460_v2 = vmax.f32 %v428_v60, 0.0  ;;  %v426_v3 = vadd.f32 %v2685_v18, %v351_v0  ;;  %v496_v4 = vmul.f32 %v2658_v32, %v457_v59  ;;  %v2758_v18 = vpop.permute.xlu0 %604 }
 0x10a   :  { %571 = vadd.xlane.f32.xlu1 %v570_v62  ;;  %592 = vadd.xlane.f32.xlu0 %v591_v1 }
 0x10b   :  { %v458_v5 = vmax.f32 %v426_v3, 0.0  ;;  %v585_v6 = vsel %vm500_vm1, %v496_v4, 0.0  ;;  %v499_v7 = vmul.f32 %v2658_v32, %v460_v2 }
 0x10d   :  { %v594_v9 = vsel %vm500_vm1, %v499_v7, 0.0  ;;  %v497_v10 = vmul.f32 %v2658_v32, %v458_v5  ;;  %v613_v12 = vpop.permute.xlu0 %612  ;;  %v617_v32 = vpop.permute.xlu1 %616 }
 0x10e   :  { %565 = vadd.xlane.f32.xlu1 %v564_v8 }
 0x10f   :  { %v588_v11 = vsel %vm500_vm1, %v497_v10, 0.0  ;;  %vm1032_vm1 = vcmask 1041409  }
 0x111   :  { %v2760_v13 = vpop.permute.xlu0 %620  ;;  %v2768_v17 = vpop.permute.xlu1 %624 }
 0x112   :  { %580 = vadd.xlane.f32.xlu1 %v579_v41 }
 0x115   :  { %v2762_v28 = vpop.permute.xlu0 %628  ;;  %v2772_v20 = vpop.permute.xlu1 %632 }
 0x116   :  { %574 = vadd.xlane.f32.xlu1 %v573_v46 }
 0x119   :  { %v2764_v15 = vpop.permute.xlu0 %636  ;;  %v2778_v26 = vpop.permute.xlu1 %640 }
 0x11a   :  { %583 = vadd.xlane.f32.xlu1 %v582_v55 }
 0x11d   :  { %v2766_v16 = vpop.permute.xlu0 %644  ;;  %v2785_v31 = vpop.permute.xlu1 %648 }
 0x11e   :  { %577 = vadd.xlane.f32.xlu1 %v576_v61 }
 0x121   :  { %v2770_v19 = vpop.permute.xlu0 %652  ;;  %v2792_v37 = vpop.permute.xlu1 %656 }
 0x122   :  { %586 = vadd.xlane.f32.xlu1 %v585_v6 }
 0x125   :  { %v2774_v22 = vpop.permute.xlu0 %660  ;;  %v2799_v40 = vpop.permute.xlu1 %664 }
 0x126   :  { %595 = vadd.xlane.f32.xlu1 %v594_v9 }
 0x12a   :  { %589 = vadd.xlane.f32.xlu1 %v588_v11 }
 0x15b   :  { %v509_v24 = vpop.xlane.xlu0 %508 }
 0x15c   :  { %v2776_v25 = vadd.f32 %v613_v12, %v509_v24 }
 0x15e   :  { %753 = vperm.xlu1 %2381, %v2776_v25  }
 0x15f   :  { %v503_v29 = vpop.xlane.xlu0 %502 }
 0x160   :  { %v2782_v30 = vadd.f32 %v2758_v18, %v503_v29 }
 0x162   :  { %747 = vperm.xlu0 %2382, %v2782_v30  }
 0x163   :  { %v512_v33 = vpop.xlane.xlu0 %511 }
 0x164   :  { %v2787_v34 = vadd.f32 %v617_v32, %v512_v33 }
 0x166   :  { %756 = vperm.xlu1 %2381, %v2787_v34  }
 0x167   :  { %v506_v35 = vpop.xlane.xlu0 %505 }
 0x168   :  { %v2790_v36 = vadd.f32 %v609_v14, %v506_v35 }
 0x16a   :  { %750 = vperm.xlu1 %2381, %v2790_v36  }
 0x16b   :  { %v521_v38 = vpop.xlane.xlu0 %520 }
 0x16c   :  { %v2796_v39 = vadd.f32 %v2762_v28, %v521_v38 }
 0x16e   :  { %765 = vperm.xlu1 %2381, %v2796_v39  }
 0x16f   :  { %v515_v41 = vpop.xlane.xlu0 %514 }
 0x170   :  { %v2802_v42 = vadd.f32 %v2760_v13, %v515_v41 }
 0x172   :  { %759 = vperm.xlu1 %2381, %v2802_v42  }
 0x173   :  { %v524_v43 = vpop.xlane.xlu0 %523  ;;  %v545_v44 = vpop.xlane.xlu1 %544 }
 0x174   :  { %v2806_v45 = vadd.f32 %v2772_v20, %v524_v43 }
 0x176   :  { %768 = vperm.xlu1 %2381, %v2806_v45  }
 0x177   :  { %v518_v46 = vpop.xlane.xlu0 %517  ;;  %v548_v47 = vpop.xlane.xlu1 %547 }
 0x178   :  { %v2810_v48 = vadd.f32 %v2768_v17, %v518_v46 }
 0x17a   :  { %762 = vperm.xlu1 %2381, %v2810_v48  }
 0x17b   :  { %v533_v49 = vpop.xlane.xlu0 %532  ;;  %v557_v50 = vpop.xlane.xlu1 %556 }
 0x17c   :  { %v2814_v51 = vadd.f32 %v2766_v16, %v533_v49  ;;  %v2816_v52 = vadd.f32 %v613_v12, %v557_v50 }
 0x17e   :  { %3828 = vst [vmem:[#allocation8_spill] sm:$0xff] %v2814_v51  ;;  %801 = vperm.xlu0 %2382, %v2816_v52   ;;  %777 = vperm.xlu1 %2381, %v2814_v51  }
 0x17f   :  { %v527_v53 = vpop.xlane.xlu0 %526  ;;  %v551_v54 = vpop.xlane.xlu1 %550 }
 0x180   :  { %v2821_v55 = vadd.f32 %v2764_v15, %v527_v53  ;;  %v2839_v2 = vadd.f32 %v2758_v18, %v551_v54  ;;  %v2863_v18 = vadd.f32 %v2774_v22, %v545_v44 }
 0x182   :  { %771 = vperm.xlu1 %2381, %v2821_v55   ;;  %3832 = vst [vmem:[#allocation12_spill] sm:$0xff] %v2863_v18 }
 0x183   :  { %v536_v56 = vpop.xlane.xlu0 %535  ;;  %v560_v57 = vpop.xlane.xlu1 %559 }
 0x184   :  { %v2825_v58 = vadd.f32 %v2785_v31, %v536_v56  ;;  %v2827_v59 = vadd.f32 %v617_v32, %v560_v57 }
 0x186   :  { %3829 = vst [vmem:[#allocation9_spill] sm:$0xff] %v2825_v58  ;;  %804 = vperm.xlu0 %2382, %v2827_v59   ;;  %780 = vperm.xlu1 %2381, %v2825_v58  }
 0x187   :  { %v530_v60 = vpop.xlane.xlu0 %529  ;;  %v554_v61 = vpop.xlane.xlu1 %553 }
 0x188   :  { %v2832_v62 = vadd.f32 %v2778_v26, %v530_v60  ;;  %v2834_v63 = vadd.f32 %v609_v14, %v554_v61 }
 0x18a   :  { %798 = vperm.xlu0 %2382, %v2834_v63   ;;  %774 = vperm.xlu1 %2381, %v2832_v62  }
 0x18b   :  { %v539_v0 = vpop.xlane.xlu0 %538  ;;  %v569_v1 = vpop.xlane.xlu1 %568 }
 0x18c   :  { %v2842_v3 = vadd.f32 %v2762_v28, %v569_v1  ;;  %v2847_v5 = vadd.f32 %v2770_v19, %v539_v0  ;;  %v2871_v28 = vadd.f32 %v2799_v40, %v548_v47 }
 0x18e   :  { %813 = vperm.xlu0 %2382, %v2842_v3   ;;  %795 = vperm.xlu1 %2381, %v2839_v2   ;;  %3830 = vst [vmem:[#allocation10_spill] sm:$0xff] %v2847_v5  ;;  %3833 = vst [vmem:[#allocation13_spill] sm:$0xff] %v2871_v28 }
 0x18f   :  { %v563_v4 = vpop.xlane.xlu1 %562  ;;  %v542_v7 = vpop.xlane.xlu0 %541 }
 0x190   :  { %v2850_v6 = vadd.f32 %v2760_v13, %v563_v4  ;;  %v2855_v9 = vadd.f32 %v2792_v37, %v542_v7  ;;  %v2927_v4 = vand.u32 127, %v376_v21 }
 0x192   :  { %807 = vperm.xlu0 %2382, %v2850_v6   ;;  %783 = vperm.xlu1 %2381, %v2847_v5   ;;  %3831 = vst [vmem:[#allocation11_spill] sm:$0xff] %v2855_v9  ;;  %v862_v21 = vadd.s32 4294967272, %v2927_v4 }
 0x193   :  { %v572_v8 = vpop.xlane.xlu1 %571  ;;  %v593_v33 = vpop.xlane.xlu0 %592 }
 0x194   :  { %v2858_v10 = vadd.f32 %v2772_v20, %v572_v8  ;;  %v2891_v38 = vadd.f32 %v2774_v22, %v593_v33  ;;  %v848_v8 = vadd.s32 4294967288, %v2927_v4 }
 0x196   :  { %816 = vperm.xlu0 %2382, %v2858_v10   ;;  %786 = vperm.xlu1 %2381, %v2855_v9   ;;  %v876_v9 = vadd.s32 4294967256, %v2927_v4 }
 0x197   :  { %v566_v11 = vpop.xlane.xlu1 %565 }
 0x198   :  { %v2866_v12 = vadd.f32 %v2768_v17, %v566_v11 }
 0x19a   :  { %810 = vperm.xlu0 %2382, %v2866_v12   ;;  %789 = vperm.xlu1 %2381, %v2863_v18  }
 0x19b   :  { %v581_v13 = vpop.xlane.xlu1 %580 }
 0x19c   :  { %v2874_v14 = vadd.f32 %v2766_v16, %v581_v13  ;;  %v2934_v13 = vsub.s32 %v2927_v4, %v2642_v23 }
 0x19e   :  { %825 = vperm.xlu0 %2382, %v2874_v14   ;;  %792 = vperm.xlu1 %2381, %v2871_v28   ;;  %3834 = vst [vmem:[#allocation14_spill] sm:$0xff] %v2934_v13 }
 0x19f   :  { %v575_v32 = vpop.xlane.xlu1 %574 }
 0x1a0   :  { %v2879_v20 = vadd.f32 %v2764_v15, %v575_v32  ;;  %v855_v32 = vadd.s32 4294967280, %v2927_v4 }
 0x1a2   :  { %819 = vperm.xlu0 %2382, %v2879_v20  }
 0x1a3   :  { %v584_v17 = vpop.xlane.xlu1 %583 }
 0x1a4   :  { %v2883_v24 = vadd.f32 %v2785_v31, %v584_v17 }
 0x1a6   :  { %828 = vperm.xlu0 %2382, %v2883_v24  }
 0x1a7   :  { %v578_v29 = vpop.xlane.xlu1 %577 }
 0x1a8   :  { %v2887_v16 = vadd.f32 %v2778_v26, %v578_v29  ;;  %v2938_v29 = vsub.s32 %v848_v8, %v2642_v23 }
 0x1aa   :  { %822 = vperm.xlu0 %2382, %v2887_v16   ;;  %3835 = vst [vmem:[#allocation15_spill] sm:$0xff] %v2938_v29 }
 0x1ab   :  { %v587_v35 = vpop.xlane.xlu1 %586 }
 0x1ac   :  { %v2895_v41 = vadd.f32 %v2770_v19, %v587_v35 }
 0x1ae   :  { %837 = vperm.xlu0 %2382, %v2891_v38  }
 0x1af   :  { %v596_v15 = vpop.xlane.xlu1 %595 }
 0x1b0   :  { %v2903_v26 = vadd.f32 %v2799_v40, %v596_v15  ;;  %v2944_v15 = vsub.s32 %v855_v32, %v2642_v23 }
 0x1b2   :  { %831 = vperm.xlu0 %2382, %v2895_v41  }
 0x1b3   :  { %v590_v31 = vpop.xlane.xlu1 %589 }
 0x1b4   :  { %v2899_v43 = vadd.f32 %v2792_v37, %v590_v31  ;;  %v869_v31 = vadd.s32 4294967264, %v2927_v4 }
 0x1b6   :  { %834 = vperm.xlu0 %2382, %v2899_v43   ;;  %v2958_v32 = vsub.s32 %v869_v31, %v2642_v23 }
 0x1b8   :  { %3836 = vst [vmem:[#allocation16_spill] sm:$0xff] %v2958_v32 }
 0x1ba   :  { %840 = vperm.xlu0 %2382, %v2903_v26  }
 0x1d9   :  { %v754_v22 = vpop.permute.xlu1 %753 }
 0x1dd   :  { %v748_v37 = vpop.permute.xlu0 %747 }
 0x1de   :  { %v847_v5 = vrot.slane %v748_v37, %v2934_v13  ;;  %v883_v37 = vadd.s32 4294967248, %v2927_v4 }
 0x1e1   :  { %v2906_v44 = vpop.permute.xlu1 %756 }
 0x1e5   :  { %v751_v46 = vpop.permute.xlu1 %750 }
 0x1e6   :  { %v852_v18 = vrot.slane %v751_v46, %v2938_v29 }
 0x1e8   :  { %v854_v46 = vsel %vm3825_vm2, %v852_v18, %v847_v5  ;;  %v897_v18 = vadd.s32 4294967232, %v2927_v4 }
 0x1e9   :  { %v2908_v47 = vpop.permute.xlu1 %765 }
 0x1ed   :  { %v2910_v19 = vpop.permute.xlu1 %759 }
 0x1f1   :  { %v2912_v49 = vpop.permute.xlu1 %768 }
 0x1f5   :  { %v2914_v50 = vpop.permute.xlu1 %762 }
 0x1f9   :  { %v2916_v53 = vpop.permute.xlu1 %777  ;;  %v802_v54 = vpop.permute.xlu0 %801 }
 0x1fd   :  { %v2918_v40 = vpop.permute.xlu1 %771 }
 0x201   :  { %v805_v56 = vpop.permute.xlu0 %804  ;;  %v2920_v60 = vpop.permute.xlu1 %780 }
 0x205   :  { %v799_v57 = vpop.permute.xlu0 %798  ;;  %v2924_v0 = vpop.permute.xlu1 %774 }
 0x206   :  { %v960_v35 = vrot.slane %v799_v57, %v2938_v29  ;;  %v2955_v57 = vsub.s32 %v862_v21, %v2642_v23  ;;  %v2963_v29 = vsub.s32 %v876_v9, %v2642_v23  ;;  %v873_v9 = vrot.slane %v2910_v19, %v2958_v32 }
 0x208   :  { %3837 = vst [vmem:[#allocation17_spill] sm:$0xff] %v2963_v29 }
 0x209   :  { %v2922_v61 = vpop.permute.xlu0 %813  ;;  %v796_v11 = vpop.permute.xlu1 %795 }
 0x20a   :  { %v956_v33 = vrot.slane %v796_v11, %v2934_v13  ;;  %v965_v11 = vrot.slane %v802_v54, %v2944_v15  ;;  %v859_v54 = vrot.slane %v754_v22, %v2944_v15 }
 0x20c   :  { %v961_v8 = vsel %vm3825_vm2, %v960_v35, %v956_v33  ;;  %v970_v33 = vrot.slane %v805_v56, %v2955_v57  ;;  %v861_v5 = vsel %vm860_vm3, %v859_v54, %v854_v46  ;;  %v866_v56 = vrot.slane %v2906_v44, %v2955_v57 }
 0x20d   :  { %v808_v1 = vpop.permute.xlu0 %807  ;;  %v966_v58 = vsel %vm860_vm3, %v965_v11, %v961_v8  ;;  %v2969_v35 = vpop.permute.xlu1 %783  ;;  %v2986_v11 = vsub.s32 %v883_v37, %v2642_v23  ;;  %v2993_v44 = vsub.s32 %v897_v18, %v2642_v23 }
 0x20e   :  { %v975_v21 = vrot.slane %v808_v1, %v2958_v32  ;;  %v971_v31 = vsel %vm867_vm4, %v970_v33, %v966_v58  ;;  %v890_v1 = vadd.s32 4294967240, %v2927_v4  ;;  %v880_v58 = vrot.slane %v2914_v50, %v2963_v29 }
 0x20f   :  { %v868_v46 = vsel %vm867_vm4, %v866_v56, %v861_v5  ;;  %v985_v50 = vrot.slane %v2922_v61, %v2986_v11  ;;  %v911_v5 = vadd.s32 4294967216, %v2927_v4 }
 0x210   :  { %v976_v19 = vsel %vm874_vm5, %v975_v21, %v971_v31  ;;  %v875_v54 = vsel %vm874_vm5, %v873_v9, %v868_v46  ;;  %v3000_v37 = vsub.s32 %v890_v1, %v2642_v23 }
 0x211   :  { %v2929_v7 = vpop.permute.xlu0 %816  ;;  %v2997_v32 = vpop.permute.xlu1 %786  ;;  %v882_v21 = vsel %vm881_vm6, %v880_v58, %v875_v54  ;;  %v901_v58 = vrot.slane %v2918_v40, %v2993_v44  ;;  %v939_v40 = vadd.s32 4294967184, %v2927_v4 }
 0x212   :  { %v990_v18 = vrot.slane %v2929_v7, %v3000_v37  ;;  %v932_v7 = vadd.s32 4294967192, %v2927_v4 }
 0x215   :  { %v811_v17 = vpop.permute.xlu0 %810  ;;  %v790_v54 = vpop.permute.xlu1 %789 }
 0x216   :  { %v980_v8 = vrot.slane %v811_v17, %v2963_v29  ;;  %v904_v17 = vadd.s32 4294967224, %v2927_v4 }
 0x218   :  { %v981_v33 = vsel %vm881_vm6, %v980_v8, %v976_v19  ;;  %v3004_v31 = vsub.s32 %v904_v17, %v2642_v23  ;;  %v887_v8 = vrot.slane %v2908_v47, %v2986_v11  ;;  %v918_v47 = vadd.s32 4294967208, %v2927_v4 }
 0x219   :  { %v2947_v28 = vpop.permute.xlu0 %825  ;;  %v986_v9 = vsel %vm888_vm7, %v985_v50, %v981_v33  ;;  %v925_v17 = vadd.s32 4294967200, %v2927_v4  ;;  %v3026_v33 = vsub.s32 %v911_v5, %v2642_v23 }
 0x21a   :  { %3838 = vst [vmem:[#allocation18_spill] sm:$0xff] %v3004_v31  ;;  %v889_v1 = vsel %vm888_vm7, %v887_v8, %v882_v21  ;;  %v908_v46 = vrot.slane %v2924_v0, %v3004_v31 }
 0x21b   :  { %v1005_v5 = vrot.slane %v2947_v28, %v3026_v33 }
 0x21d   :  { %v820_v51 = vpop.permute.xlu0 %819 }
 0x21e   :  { %v995_v61 = vrot.slane %v820_v51, %v2993_v44  ;;  %v894_v51 = vrot.slane %v2912_v49, %v3000_v37  ;;  %v946_v49 = vadd.s32 4294967176, %v2927_v4  ;;  %v915_v4 = vrot.slane %v2916_v53, %v3026_v33 }
 0x220   :  { %v896_v21 = vsel %vm895_vm8, %v894_v51, %v889_v1  ;;  %v3044_v1 = vsub.s32 %v932_v7, %v2642_v23 }
 0x221   :  { %v2977_v22 = vpop.permute.xlu0 %828  ;;  %v903_v0 = vsel %vm902_vm9, %v901_v58, %v896_v21 }
 0x225   :  { %v823_v29 = vpop.permute.xlu0 %822 }
 0x226   :  { %v1000_v56 = vrot.slane %v823_v29, %v3004_v31  ;;  %v991_v29 = vsel %vm895_vm8, %v990_v18, %v986_v9  ;;  %v3035_v31 = vsub.s32 %v925_v17, %v2642_v23  ;;  %v3040_v18 = vsub.s32 %v918_v47, %v2642_v23 }
 0x227   :  { %v996_v50 = vsel %vm902_vm9, %v995_v61, %v991_v29  ;;  %v910_v61 = vsel %vm909_vm10, %v908_v46, %v903_v0  ;;  %v3054_v17 = vsub.s32 %v946_v49, %v2642_v23  ;;  %v793_v46 = vpop.permute.xlu1 %792 }
 0x228   :  { %v1001_v8 = vsel %vm909_vm10, %v1000_v56, %v996_v50  ;;  %v3049_v56 = vsub.s32 %v939_v40, %v2642_v23  ;;  %v1010_v47 = vrot.slane %v2977_v22, %v3040_v18  ;;  %v917_v51 = vsel %vm916_vm11, %v915_v4, %v910_v61 }
 0x229   :  { %v838_v19 = vpop.permute.xlu0 %837  ;;  %v1006_v58 = vsel %vm916_vm11, %v1005_v5, %v1001_v8  ;;  %3839 = vst [vmem:[#allocation19_spill] sm:$0xff] %v3054_v17  ;;  %v929_v53 = vrot.slane %v2969_v35, %v3035_v31  ;;  %v922_v29 = vrot.slane %v2920_v60, %v3040_v18  ;;  %v936_v40 = vrot.slane %v2997_v32, %v3044_v1 }
 0x22a   :  { %v1011_v50 = vsel %vm3807_vm12, %v1010_v47, %v1006_v58  ;;  %v943_v22 = vrot.slane %v790_v54, %v3049_v56  ;;  %v950_v35 = vrot.slane %v793_v46, %v3054_v17  ;;  %v1025_v32 = vrot.slane %v838_v19, %v3049_v56 }
 0x22b   :  { %v924_v8 = vsel %vm3807_vm12, %v922_v29, %v917_v51  ;;  %vm1035_vm12 = vcmask 1041408   ;;  %v3808_v51 = vsub.s32 1, %v2642_v23 }
 0x22c   :  { %v931_v60 = vsel %vm930_vm13, %v929_v53, %v924_v8 }
 0x22d   :  { %v832_v9 = vpop.permute.xlu0 %831 }
 0x22e   :  { %v1015_v28 = vrot.slane %v832_v9, %v3035_v31  ;;  %v938_v9 = vsel %vm937_vm14, %v936_v40, %v931_v60 }
 0x22f   :  { %v945_v54 = vsel %vm944_vm15, %v943_v22, %v938_v9 }
 0x230   :  { %v1016_v49 = vsel %vm930_vm13, %v1015_v28, %v1011_v50  ;;  %v952_v58 = vsel %vm951_vm0, %v950_v35, %v945_v54 }
 0x231   :  { %v835_v7 = vpop.permute.xlu0 %834 }
 0x232   :  { %v1020_v21 = vrot.slane %v835_v7, %v3044_v1 }
 0x234   :  { %v1021_v0 = vsel %vm937_vm14, %v1020_v21, %v1016_v49 }
 0x235   :  { %v841_v5 = vpop.permute.xlu0 %840  ;;  %v1026_v4 = vsel %vm944_vm15, %v1025_v32, %v1021_v0 }
 0x236   :  { %v1030_v61 = vrot.slane %v841_v5, %v3054_v17 }
 0x238   :  { %v1031_v28 = vsel %vm951_vm0, %v1030_v61, %v1026_v4 }
 0x239   :  { %v1033_v47 = vsel %vm1032_vm1, %v1031_v28, %v952_v58 }
 0x23a   :  { %v1036_v19 = vsel %vm1035_vm12, %v1033_v47, -inf }
 0x23b   :  { %1037 = vmax.xlane.f32.xlu1 %v1036_v19 }
 0x2c4   :  { %v1038_v53 = vpop.xlane.xlu1 %1037 }
 0x2c5   :  { %v3084_v46 = vrot.slane %v1038_v53, %v2649_v27  ;;  %v3088_v7 = vrot.slane %v1038_v53, %v3808_v51 }
 0x2c7   :  { %v1070_v29 = vsub.f32 %v2850_v6, %v3088_v7  ;;  %v1050_v40 = vsub.f32 %v2782_v30, %v3084_v46  ;;  %v1073_v50 = vsub.f32 %v2858_v10, %v3088_v7  ;;  %v1051_v21 = vsub.f32 %v2790_v36, %v3084_v46 }
 0x2c8   :  { %v1074_v35 = vsub.f32 %v2879_v20, %v3088_v7  ;;  %v1066_v6 = vsub.f32 %v2839_v2, %v3088_v7  ;;  %v1075_v10 = vsub.f32 %v2887_v16, %v3088_v7  ;;  %v1067_v36 = vsub.f32 %v2834_v63, %v3088_v7 }
 0x2c9   :  { %v1122_v22 = vmul.f32 1.442695, %v1070_v29  ;;  %v1082_v49 = vmul.f32 1.442695, %v1050_v40  ;;  %v1128_v8 = vmul.f32 1.442695, %v1073_v50  ;;  %v1076_v20 = vsub.f32 %v2874_v14, %v3088_v7 }
 0x2ca   :  { %v1084_v0 = vmul.f32 1.442695, %v1051_v21  ;;  %v1130_v30 = vmul.f32 1.442695, %v1074_v35  ;;  %v1114_v60 = vmul.f32 1.442695, %v1066_v6  ;;  %v1052_v2 = vsub.f32 %v2776_v25, %v3084_v46 }
 0x2cb   :  { %2401 = vpow2.f32 %v1122_v22  ;;  %v1132_v32 = vmul.f32 1.442695, %v1075_v10  ;;  %v1116_v5 = vmul.f32 1.442695, %v1067_v36  ;;  %v1134_v9 = vmul.f32 1.442695, %v1076_v20 }
 0x2cc   :  { %2403 = vpow2.f32 %v1082_v49  ;;  %v1077_v16 = vsub.f32 %v2883_v24, %v3088_v7  ;;  %v1086_v54 = vmul.f32 1.442695, %v1052_v2  ;;  %v1068_v63 = vsub.f32 %v2816_v52, %v3088_v7 }
 0x2cd   :  { %2405 = vpow2.f32 %v1128_v8  ;;  %v1078_v14 = vsub.f32 %v2895_v41, %v3088_v7  ;;  %v1053_v28 = vsub.f32 %v2787_v34, %v3084_v46  ;;  %v1079_v19 = vsub.f32 %v2899_v43, %v3088_v7 }
 0x2ce   :  { %2407 = vpow2.f32 %v1084_v0  ;;  %v1136_v25 = vmul.f32 1.442695, %v1077_v16  ;;  %v1118_v24 = vmul.f32 1.442695, %v1068_v63  ;;  %v1069_v29 = vsub.f32 %v2827_v59, %v3088_v7 }
 0x2cf   :  { %2409 = vpow2.f32 %v1130_v30  ;;  %v1138_v52 = vmul.f32 1.442695, %v1078_v14  ;;  %v1088_v41 = vmul.f32 1.442695, %v1053_v28  ;;  %v1140_v34 = vmul.f32 1.442695, %v1079_v19 }
 0x2d0   :  { %2411 = vpow2.f32 %v1114_v60  ;;  %v1080_v50 = vsub.f32 %v2891_v38, %v3088_v7  ;;  %v1120_v43 = vmul.f32 1.442695, %v1069_v29  ;;  %v1054_v22 = vsub.f32 %v2802_v42, %v3084_v46  ;;  %v3847_v19 = vld [vmem:[#allocation8_spill] sm:$0xff] }
 0x2d1   :  { %2413 = vpow2.f32 %v1132_v32  ;;  %v1081_v8 = vsub.f32 %v2903_v26, %v3088_v7  ;;  %v1055_v0 = vsub.f32 %v2810_v48, %v3084_v46  ;;  %v1071_v26 = vsub.f32 %v2866_v12, %v3088_v7 }
 0x2d2   :  { %2415 = vpow2.f32 %v1116_v5  ;;  %v1142_v59 = vmul.f32 1.442695, %v1080_v50  ;;  %v1090_v38 = vmul.f32 1.442695, %v1054_v22  ;;  %v1056_v32 = vsub.f32 %v2796_v39, %v3084_v46  ;;  %v3850_v22 = vld [vmem:[#allocation10_spill] sm:$0xff] }
 0x2d3   :  { %2417 = vpow2.f32 %v1134_v9  ;;  %v1144_v42 = vmul.f32 1.442695, %v1081_v8  ;;  %v1092_v10 = vmul.f32 1.442695, %v1055_v0  ;;  %v1124_v36 = vmul.f32 1.442695, %v1071_v26 }
 0x2d4   :  { %2419 = vpow2.f32 %v1086_v54  ;;  %v1094_v5 = vmul.f32 1.442695, %v1056_v32  ;;  %v1072_v2 = vsub.f32 %v2842_v3, %v3088_v7  ;;  %v1057_v54 = vsub.f32 %v2806_v45, %v3084_v46  ;;  %v3852_v0 = vld [vmem:[#allocation11_spill] sm:$0xff] }
 0x2d5   :  { %2421 = vpow2.f32 %v1136_v25  ;;  %v1058_v25 = vsub.f32 %v2821_v55, %v3084_v46  ;;  %v1060_v55 = vsub.f32 %v3847_v19, %v3084_v46 }
 0x2d6   :  { %2423 = vpow2.f32 %v1118_v24  ;;  %v1126_v16 = vmul.f32 1.442695, %v1072_v2  ;;  %v1096_v7 = vmul.f32 1.442695, %v1057_v54  ;;  %v1059_v24 = vsub.f32 %v2832_v62, %v3084_v46 }
 0x2d7   :  { %2425 = vpow2.f32 %v1138_v52  ;;  %v1098_v45 = vmul.f32 1.442695, %v1058_v25  ;;  %v1102_v29 = vmul.f32 1.442695, %v1060_v55 }
 0x2d8   :  { %v3112_v61 = vpop.eup %2401  ;;  %2427 = vpow2.f32 %v1088_v41  ;;  %v1100_v52 = vmul.f32 1.442695, %v1059_v24 }
 0x2d9   :  { %v3116_v4 = vpop.eup %2403  ;;  %1239 = vperm.xlu1 %2381, %v3112_v61   ;;  %2429 = vpow2.f32 %v1140_v34  ;;  %v3849_v34 = vld [vmem:[#allocation9_spill] sm:$0xff] }
 0x2da   :  { %1179 = vperm.xlu0 %2382, %v3116_v4   ;;  %v3122_v58 = vpop.eup %2405  ;;  %2431 = vpow2.f32 %v1120_v43  ;;  %v1061_v50 = vsub.f32 %v3849_v34, %v3084_v46 }
 0x2db   :  { %v3126_v47 = vpop.eup %2407  ;;  %2433 = vpow2.f32 %v1142_v59  ;;  %v1062_v59 = vsub.f32 %v3850_v22, %v3084_v46 }
 0x2dc   :  { %v3132_v53 = vpop.eup %2409  ;;  %2435 = vpow2.f32 %v1090_v38  ;;  %v1104_v62 = vmul.f32 1.442695, %v1061_v50  ;;  %v3859_v50 = vld [vmem:[#allocation15_spill] sm:$0xff] }
 0x2dd   :  { %1248 = vperm.xlu1 %2381, %v3122_v58   ;;  %v3136_v40 = vpop.eup %2411  ;;  %2437 = vpow2.f32 %v1144_v42  ;;  %v1106_v38 = vmul.f32 1.442695, %v1062_v59  ;;  %v1063_v42 = vsub.f32 %v3852_v0, %v3084_v46 }
 0x2de   :  { %1182 = vperm.xlu0 %2382, %v3126_v47   ;;  %v3142_v21 = vpop.eup %2413  ;;  %2439 = vpow2.f32 %v1092_v10 }
 0x2df   :  { %3840 = vst [vmem:[#allocation20_spill] sm:$0xff] %v3142_v21  ;;  %v3146_v49 = vpop.eup %2415  ;;  %2441 = vpow2.f32 %v1124_v36  ;;  %v1108_v26 = vmul.f32 1.442695, %v1063_v42  ;;  %v3853_v36 = vld [vmem:[#allocation12_spill] sm:$0xff] }
 0x2e0   :  { %v3152_v35 = vpop.eup %2417  ;;  %2443 = vpow2.f32 %v1094_v5  ;;  %v1064_v32 = vsub.f32 %v3853_v36, %v3084_v46 }
 0x2e1   :  { %1251 = vperm.xlu1 %2381, %v3132_v53   ;;  %3841 = vst [vmem:[#allocation21_spill] sm:$0xff] %v3152_v35  ;;  %v3156_v6 = vpop.eup %2419  ;;  %2445 = vpow2.f32 %v1126_v16  ;;  %v3854_v16 = vld [vmem:[#allocation13_spill] sm:$0xff] }
 0x2e2   :  { %1227 = vperm.xlu0 %2382, %v3136_v40   ;;  %v3160_v30 = vpop.eup %2421  ;;  %2447 = vpow2.f32 %v1096_v7  ;;  %v1110_v2 = vmul.f32 1.442695, %v1064_v32  ;;  %v1065_v54 = vsub.f32 %v3854_v16, %v3084_v46 }
 0x2e3   :  { %3842 = vst [vmem:[#allocation22_spill] sm:$0xff] %v3160_v30  ;;  %v3164_v60 = vpop.eup %2423  ;;  %2449 = vpow2.f32 %v1098_v45 }
 0x2e4   :  { %v3168_v48 = vpop.eup %2425  ;;  %2451 = vpow2.f32 %v1100_v52  ;;  %v1112_v25 = vmul.f32 1.442695, %v1065_v54 }
 0x2e5   :  { %1254 = vperm.xlu1 %2381, %v3142_v21   ;;  %3843 = vst [vmem:[#allocation23_spill] sm:$0xff] %v3168_v48  ;;  %v3172_v20 = vpop.eup %2427  ;;  %2453 = vpow2.f32 %v1102_v29 }
 0x2e6   :  { %1230 = vperm.xlu0 %2382, %v3146_v49   ;;  %v3176_v12 = vpop.eup %2429  ;;  %2455 = vpow2.f32 %v1104_v62 }
 0x2e7   :  { %3844 = vst [vmem:[#allocation24_spill] sm:$0xff] %v3176_v12  ;;  %v3180_v9 = vpop.eup %2431  ;;  %2457 = vpow2.f32 %v1106_v38 }
 0x2e8   :  { %v3184_v39 = vpop.eup %2433  ;;  %2459 = vpow2.f32 %v1108_v26 }
 0x2e9   :  { %1257 = vperm.xlu1 %2381, %v3152_v35   ;;  %3845 = vst [vmem:[#allocation25_spill] sm:$0xff] %v3184_v39  ;;  %v3188_v63 = vpop.eup %2435  ;;  %2461 = vpow2.f32 %v1110_v2 }
 0x2ea   :  { %1185 = vperm.xlu0 %2382, %v3156_v6   ;;  %v3192_v3 = vpop.eup %2437  ;;  %2463 = vpow2.f32 %v1112_v25 }
 0x2eb   :  { %3846 = vst [vmem:[#allocation26_spill] sm:$0xff] %v3192_v3  ;;  %v3196_v14 = vpop.eup %2439 }
 0x2ec   :  { %v3202_v28 = vpop.eup %2441 }
 0x2ed   :  { %1260 = vperm.xlu1 %2381, %v3160_v30   ;;  %v3207_v41 = vpop.eup %2443  ;;  %v3860_v30 = vld [vmem:[#allocation17_spill] sm:$0xff] }
 0x2ee   :  { %1233 = vperm.xlu0 %2382, %v3164_v60   ;;  %3848 = vst [vmem:[#allocation8_spill] sm:$0xff] %v3207_v41  ;;  %v3212_v43 = vpop.eup %2445 }
 0x2ef   :  { %v3217_v8 = vpop.eup %2447 }
 0x2f0   :  { %3851 = vst [vmem:[#allocation9_spill] sm:$0xff] %v3217_v8  ;;  %v3222_v10 = vpop.eup %2449 }
 0x2f1   :  { %1263 = vperm.xlu1 %2381, %v3168_v48   ;;  %v3227_v5 = vpop.eup %2451 }
 0x2f2   :  { %1188 = vperm.xlu0 %2382, %v3172_v20   ;;  %v3232_v7 = vpop.eup %2453 }
 0x2f3   :  { %3855 = vst [vmem:[#allocation10_spill] sm:$0xff] %v3232_v7  ;;  %v3235_v45 = vpop.eup %2455 }
 0x2f4   :  { %3856 = vst [vmem:[#allocation11_spill] sm:$0xff] %v3235_v45  ;;  %v3238_v24 = vpop.eup %2457 }
 0x2f5   :  { %1266 = vperm.xlu1 %2381, %v3176_v12   ;;  %3857 = vst [vmem:[#allocation12_spill] sm:$0xff] %v3238_v24  ;;  %v3241_v52 = vpop.eup %2459 }
 0x2f6   :  { %1236 = vperm.xlu0 %2382, %v3180_v9   ;;  %3858 = vst [vmem:[#allocation13_spill] sm:$0xff] %v3241_v52  ;;  %v3244_v46 = vpop.eup %2461 }
 0x2f7   :  { %v3247_v19 = vpop.eup %2463 }
 0x2f9   :  { %1269 = vperm.xlu1 %2381, %v3184_v39  }
 0x2fa   :  { %1191 = vperm.xlu0 %2382, %v3188_v63  }
 0x2fd   :  { %1272 = vperm.xlu1 %2381, %v3192_v3  }
 0x2fe   :  { %1194 = vperm.xlu0 %2382, %v3196_v14  }
 0x302   :  { %1242 = vperm.xlu0 %2382, %v3202_v28  }
 0x306   :  { %1197 = vperm.xlu0 %2382, %v3207_v41  }
 0x30a   :  { %1245 = vperm.xlu0 %2382, %v3212_v43  }
 0x30e   :  { %1200 = vperm.xlu0 %2382, %v3217_v8   ;;  %v3861_v8 = vld [vmem:[#allocation16_spill] sm:$0xff] }
 0x312   :  { %1203 = vperm.xlu0 %2382, %v3222_v10  }
 0x316   :  { %1206 = vperm.xlu0 %2382, %v3227_v5  }
 0x31a   :  { %1209 = vperm.xlu0 %2382, %v3232_v7  }
 0x31e   :  { %1212 = vperm.xlu0 %2382, %v3235_v45  }
 0x322   :  { %1215 = vperm.xlu0 %2382, %v3238_v24  }
 0x326   :  { %1218 = vperm.xlu0 %2382, %v3241_v52  }
 0x32a   :  { %1221 = vperm.xlu0 %2382, %v3244_v46  }
 0x32e   :  { %1224 = vperm.xlu0 %2382, %v3247_v19  }
 0x354   :  { %v1240_v36 = vpop.permute.xlu1 %1239 }
 0x355   :  { %v1180_v55 = vpop.permute.xlu0 %1179  ;;  %v1375_v41 = vrot.slane %v1240_v36, %v3861_v8 }
 0x356   :  { %v1277_v34 = vrot.slane %v1180_v55, %v2934_v13 }
 0x358   :  { %v1249_v16 = vpop.permute.xlu1 %1248 }
 0x359   :  { %v1183_v29 = vpop.permute.xlu0 %1182 }
 0x35a   :  { %v1281_v62 = vrot.slane %v1183_v29, %v3859_v50 }
 0x35c   :  { %v1282_v22 = vsel %vm3825_vm2, %v1281_v62, %v1277_v34  ;;  %v1252_v25 = vpop.permute.xlu1 %1251 }
 0x35d   :  { %v1228_v59 = vpop.permute.xlu0 %1227 }
 0x35e   :  { %v1356_v34 = vrot.slane %v1228_v59, %v2934_v13 }
 0x360   :  { %v1255_v24 = vpop.permute.xlu1 %1254 }
 0x361   :  { %v1231_v38 = vpop.permute.xlu0 %1230 }
 0x362   :  { %v1360_v55 = vrot.slane %v1231_v38, %v3859_v50 }
 0x364   :  { %v1258_v7 = vpop.permute.xlu1 %1257  ;;  %v1361_v39 = vsel %vm3825_vm2, %v1360_v55, %v1356_v34  ;;  %v1390_v55 = vrot.slane %v1249_v16, %v3000_v37  ;;  %vm3863_vm2 = vcmask 786112  }
 0x365   :  { %v1186_v0 = vpop.permute.xlu0 %1185 }
 0x369   :  { %v1234_v42 = vpop.permute.xlu0 %1233 }
 0x36a   :  { %v1365_v29 = vrot.slane %v1234_v42, %v2944_v15  ;;  %v1261_v42 = vpop.permute.xlu1 %1260 }
 0x36c   :  { %v1366_v12 = vsel %vm860_vm3, %v1365_v29, %v1361_v39 }
 0x36d   :  { %v1189_v26 = vpop.permute.xlu0 %1188 }
 0x36e   :  { %v1291_v16 = vrot.slane %v1189_v26, %v2955_v57 }
 0x371   :  { %v1237_v32 = vpop.permute.xlu0 %1236 }
 0x372   :  { %v1370_v62 = vrot.slane %v1237_v32, %v2955_v57 }
 0x374   :  { %v1371_v48 = vsel %vm867_vm4, %v1370_v62, %v1366_v12  ;;  %v1395_v12 = vrot.slane %v1252_v25, %v2993_v44 }
 0x375   :  { %v1192_v2 = vpop.permute.xlu0 %1191  ;;  %v1376_v59 = vsel %vm874_vm5, %v1375_v41, %v1371_v48  ;;  %v1286_v41 = vrot.slane %v1186_v0, %v2944_v15 }
 0x379   :  { %v1195_v54 = vpop.permute.xlu0 %1194 }
 0x37d   :  { %v1243_v51 = vpop.permute.xlu0 %1242 }
 0x37e   :  { %v1380_v35 = vrot.slane %v1243_v51, %v3860_v30  ;;  %v1264_v51 = vpop.permute.xlu1 %1263 }
 0x37f   :  { %v1415_v26 = vrot.slane %v1264_v51, %v3035_v31 }
 0x380   :  { %v1381_v32 = vsel %vm881_vm6, %v1380_v35, %v1376_v59  ;;  %v1405_v35 = vrot.slane %v1258_v7, %v3026_v33 }
 0x381   :  { %v1198_v52 = vpop.permute.xlu0 %1197 }
 0x385   :  { %v1246_v45 = vpop.permute.xlu0 %1245 }
 0x386   :  { %v1385_v38 = vrot.slane %v1246_v45, %v2986_v11  ;;  %v3862_v45 = vld [vmem:[#allocation18_spill] sm:$0xff] }
 0x387   :  { %v1400_v34 = vrot.slane %v1255_v24, %v3862_v45  ;;  %v1287_v24 = vsel %vm860_vm3, %v1286_v41, %v1282_v22 }
 0x388   :  { %v1386_v13 = vsel %vm888_vm7, %v1385_v38, %v1381_v32  ;;  %v1267_v38 = vpop.permute.xlu1 %1266  ;;  %v1410_v32 = vrot.slane %v1261_v42, %v3040_v18  ;;  %v1292_v7 = vsel %vm867_vm4, %v1291_v16, %v1287_v24 }
 0x389   :  { %v1201_v3 = vpop.permute.xlu0 %1200  ;;  %v1391_v39 = vsel %vm895_vm8, %v1390_v55, %v1386_v13  ;;  %v1296_v13 = vrot.slane %v1192_v2, %v3861_v8  ;;  %v1301_v55 = vrot.slane %v1195_v54, %v3860_v30 }
 0x38a   :  { %v1396_v36 = vsel %vm902_vm9, %v1395_v12, %v1391_v39  ;;  %v1306_v39 = vrot.slane %v1198_v52, %v2986_v11  ;;  %v1311_v0 = vrot.slane %v1201_v3, %v3000_v37 }
 0x38b   :  { %v1401_v48 = vsel %vm909_vm10, %v1400_v34, %v1396_v36  ;;  %v1297_v36 = vsel %vm874_vm5, %v1296_v13, %v1292_v7 }
 0x38c   :  { %v1406_v25 = vsel %vm916_vm11, %v1405_v35, %v1401_v48  ;;  %v1270_v2 = vpop.permute.xlu1 %1269  ;;  %v1302_v54 = vsel %vm881_vm6, %v1301_v55, %v1297_v36  ;;  %v1420_v35 = vrot.slane %v1267_v38, %v3044_v1 }
 0x38d   :  { %v1204_v50 = vpop.permute.xlu0 %1203  ;;  %v1411_v12 = vsel %vm3863_vm2, %v1410_v32, %v1406_v25  ;;  %v1307_v52 = vsel %vm888_vm7, %v1306_v39, %v1302_v54 }
 0x38e   :  { %v1316_v34 = vrot.slane %v1204_v50, %v2993_v44  ;;  %v1416_v3 = vsel %vm930_vm13, %v1415_v26, %v1411_v12  ;;  %v1312_v51 = vsel %vm895_vm8, %v1311_v0, %v1307_v52 }
 0x38f   :  { %v1421_v32 = vsel %vm937_vm14, %v1420_v35, %v1416_v3 }
 0x390   :  { %v1317_v16 = vsel %vm902_vm9, %v1316_v34, %v1312_v51  ;;  %v1273_v55 = vpop.permute.xlu1 %1272 }
 0x391   :  { %v1207_v21 = vpop.permute.xlu0 %1206  ;;  %v1430_v0 = vrot.slane %v1273_v55, %v3054_v17 }
 0x392   :  { %v1321_v22 = vrot.slane %v1207_v21, %v3862_v45 }
 0x394   :  { %v1322_v25 = vsel %vm909_vm10, %v1321_v22, %v1317_v16 }
 0x395   :  { %v1210_v29 = vpop.permute.xlu0 %1209 }
 0x396   :  { %v1326_v48 = vrot.slane %v1210_v29, %v3026_v33  ;;  %v1425_v29 = vrot.slane %v1270_v2, %v3049_v56 }
 0x398   :  { %v1327_v38 = vsel %vm916_vm11, %v1326_v48, %v1322_v25 }
 0x399   :  { %v1213_v62 = vpop.permute.xlu0 %1212 }
 0x39a   :  { %v1331_v41 = vrot.slane %v1213_v62, %v3040_v18 }
 0x39c   :  { %v1332_v62 = vsel %vm3863_vm2, %v1331_v41, %v1327_v38  ;;  %v3864_v41 = vsub.s32 1, %v2642_v23  ;;  %vm3880_vm2 = vcmask 130112  }
 0x39d   :  { %v1216_v59 = vpop.permute.xlu0 %1215 }
 0x39e   :  { %v1336_v50 = vrot.slane %v1216_v59, %v3035_v31  ;;  %v1426_v59 = vsel %vm944_vm15, %v1425_v29, %v1421_v32 }
 0x39f   :  { %v1431_v34 = vsel %vm951_vm0, %v1430_v0, %v1426_v59 }
 0x3a0   :  { %v1337_v39 = vsel %vm930_vm13, %v1336_v50, %v1332_v62 }
 0x3a1   :  { %v1219_v42 = vpop.permute.xlu0 %1218 }
 0x3a2   :  { %v1341_v21 = vrot.slane %v1219_v42, %v3044_v1 }
 0x3a4   :  { %v1342_v12 = vsel %vm937_vm14, %v1341_v21, %v1337_v39 }
 0x3a5   :  { %v1222_v13 = vpop.permute.xlu0 %1221 }
 0x3a6   :  { %v1346_v24 = vrot.slane %v1222_v13, %v3049_v56 }
 0x3a8   :  { %v1347_v2 = vsel %vm944_vm15, %v1346_v24, %v1342_v12 }
 0x3a9   :  { %v1225_v7 = vpop.permute.xlu0 %1224 }
 0x3aa   :  { %v1351_v26 = vrot.slane %v1225_v7, %v3054_v17 }
 0x3ac   :  { %v1352_v36 = vsel %vm951_vm0, %v1351_v26, %v1347_v2 }
 0x3ad   :  { %v1432_v42 = vsel %vm1032_vm1, %v1431_v34, %v1352_v36  ;;  %v3865_v36 = vld [vmem:[#allocation20_spill] sm:$0xff] }
 0x3ae   :  { %v1434_v54 = vsel %vm1035_vm12, %v1432_v42, 0.0  ;;  %v3866_v42 = vld [vmem:[#allocation8_spill] sm:$0xff]  ;;  %vm2530_vm12 = vmmov 0  }
 0x3af   :  { %1435 = vadd.xlane.f32.xlu0 %v1434_v54 }
 0x438   :  { %v1436_v22 = vpop.xlane.xlu0 %1435 }
 0x439   :  { %2465 = vrcp.f32 %v1436_v22 }
 0x446   :  { %v2466_v52 = vpop.eup %2465 }
 0x447   :  { %v1438_v48 = vmul.f32 %v2466_v52, %v1436_v22 }
 0x449   :  { %v1439_v3 = vsub.f32 2.0, %v1438_v48 }
 0x44b   :  { %v1440_v35 = vmul.f32 %v2466_v52, %v1439_v3  ;;  %v3867_v52 = vld [vmem:[#allocation9_spill] sm:$0xff] }
 0x44c   :  { %v3868_v3 = vld [vmem:[#allocation21_spill] sm:$0xff] }
 0x44d   :  { %v3315_v51 = vrot.slane %v1440_v35, %v2649_v27  ;;  %v3319_v16 = vrot.slane %v1440_v35, %v3864_v41 }
 0x44f   :  { %v3323_v50 = vmul.f32 %v3222_v10, %v3315_v51  ;;  %v3327_v13 = vmul.f32 %v3227_v5, %v3315_v51  ;;  %v3331_v25 = vmul.f32 %v3116_v4, %v3315_v51  ;;  %v3335_v27 = vmul.f32 %v3126_v47, %v3315_v51 }
 0x450   :  { %v3339_v23 = vmul.f32 %v3244_v46, %v3315_v51  ;;  %v3343_v10 = vmul.f32 %v3247_v19, %v3315_v51  ;;  %v3353_v21 = vmul.f32 %v3136_v40, %v3319_v16  ;;  %v3357_v47 = vmul.f32 %v3146_v49, %v3319_v16 }
 0x451   :  { %v3347_v5 = vpack.c.bf16 %v3327_v13, %v3323_v50  ;;  %v1484_v4 = vpack.c.bf16 %v3335_v27, %v3331_v25  ;;  %v3361_v46 = vmul.f32 %v3156_v6, %v3315_v51  ;;  %v3370_v55 = vmul.f32 %v3172_v20, %v3315_v51 }
 0x452   :  { %v3366_v29 = vpack.c.bf16 %v3343_v10, %v3339_v23  ;;  %v3374_v40 = vpack.c.bf16 %v3357_v47, %v3353_v21  ;;  %v3378_v49 = vmul.f32 %v3164_v60, %v3319_v16  ;;  %v3382_v6 = vmul.f32 %v3180_v9, %v3319_v16 }
 0x453   :  { %v1516_v19 = vunpack.c.l.b16 %v3347_v5  ;;  %v1508_v32 = vunpack.c.l.b16 %v1484_v4  ;;  %v1509_v24 = vunpack.c.h.b16 %v1484_v4  ;;  %v1485_v20 = vpack.c.bf16 %v3370_v55, %v3361_v46 }
 0x454   :  { %v1523_v38 = vunpack.c.h.b16 %v3366_v29  ;;  %v1710_v62 = vunpack.c.h.b16 %v3374_v40  ;;  %v3390_v39 = vpack.c.bf16 %v3382_v6, %v3378_v49  ;;  %v3394_v60 = vmul.f32 %v3112_v61, %v3319_v16 }
 0x455   :  { %1549 = vperm.xlu0 %2382, %v1516_v19   ;;  %1525 = vperm.xlu1 %2381, %v1508_v32   ;;  %v1510_v9 = vunpack.c.l.b16 %v1485_v20  ;;  %v3398_v7 = vmul.f32 %v3202_v28, %v3319_v16  ;;  %v3402_v59 = vmul.f32 %v3188_v63, %v3315_v51  ;;  %v3406_v0 = vmul.f32 %v3196_v14, %v3315_v51  ;;  %v3869_v32 = vld [vmem:[#allocation22_spill] sm:$0xff] }
 0x456   :  { %v1712_v12 = vunpack.c.h.b16 %v3390_v39  ;;  %v1511_v26 = vunpack.c.h.b16 %v1485_v20  ;;  %v3417_v63 = vmul.f32 %v3212_v43, %v3319_v16  ;;  %v3421_v14 = vmul.f32 %v3122_v58, %v3319_v16  ;;  %v3870_v20 = vld [vmem:[#allocation23_spill] sm:$0xff] }
 0x457   :  { %v3411_v61 = vpack.c.bf16 %v3398_v7, %v3394_v60  ;;  %v1486_v28 = vpack.c.bf16 %v3406_v0, %v3402_v59  ;;  %v3425_v2 = vmul.f32 %v3132_v53, %v3319_v16  ;;  %v3429_v34 = vmul.f32 %v3865_v36, %v3319_v16 }
 0x458   :  { %v3433_v54 = vmul.f32 %v3866_v42, %v3315_v51  ;;  %v3438_v58 = vpack.c.bf16 %v3421_v14, %v3417_v63  ;;  %v3442_v48 = vmul.f32 %v3867_v52, %v3315_v51  ;;  %v3450_v35 = vmul.f32 %v3868_v3, %v3319_v16  ;;  %v3873_v52 = vld [vmem:[#allocation26_spill] sm:$0xff] }
 0x459   :  { %1570 = vperm.xlu0 %2382, %v1523_v38   ;;  %1528 = vperm.xlu1 %2381, %v1509_v24   ;;  %v1714_v43 = vunpack.c.h.b16 %v3411_v61  ;;  %v1512_v22 = vunpack.c.l.b16 %v1486_v28  ;;  %v3446_v53 = vpack.c.bf16 %v3429_v34, %v3425_v2  ;;  %v1513_v4 = vunpack.c.h.b16 %v1486_v28 }
 0x45a   :  { %v1716_v41 = vunpack.c.h.b16 %v3438_v58  ;;  %v1487_v19 = vpack.c.bf16 %v3442_v48, %v3433_v54  ;;  %v3457_v38 = vmul.f32 %v3869_v32, %v3319_v16  ;;  %v2529_v36 = vmov 0.0  }
 0x45b   :  { %v1718_v24 = vunpack.c.h.b16 %v3446_v53  ;;  %2335 = vmatprep.subr.bf16.mxu1 %v2529_v36  ;;  %v3479_v3 = vmul.f32 %v3873_v52, %v3319_v16  ;;  %2351 = vmatprep.mubr.msk.bf16.mxu1 %vm2530_vm12, %v2529_v36 }
 0x45c   :  { %v1515_v42 = vunpack.c.h.b16 %v1487_v19 }
 0x45d   :  { %1729 = vperm.xlu0 %2382, %v1710_v62   ;;  %1531 = vperm.xlu1 %2381, %v1510_v9   ;;  %v3462_v62 = vmul.f32 %v3870_v20, %v3319_v16  ;;  %v1514_v9 = vunpack.c.l.b16 %v1487_v19  ;;  %v3874_v19 = vld [vmem:[#allocation10_spill] sm:$0xff]  ;;  %v3875_v20 = vld [vmem:[#allocation11_spill] sm:$0xff] }
 0x461   :  { %1735 = vperm.xlu0 %2382, %v1712_v12   ;;  %1534 = vperm.xlu1 %2381, %v1511_v26   ;;  %v3466_v12 = vpack.c.bf16 %v3457_v38, %v3450_v35  ;;  %v3871_v26 = vld [vmem:[#allocation24_spill] sm:$0xff] }
 0x462   :  { %v3470_v28 = vmul.f32 %v3871_v26, %v3319_v16 }
 0x464   :  { %v3487_v32 = vpack.c.bf16 %v3470_v28, %v3462_v62 }
 0x465   :  { %1741 = vperm.xlu0 %2382, %v1714_v43   ;;  %1537 = vperm.xlu1 %2381, %v1512_v22   ;;  %v3872_v43 = vld [vmem:[#allocation25_spill] sm:$0xff] }
 0x466   :  { %v3475_v22 = vmul.f32 %v3872_v43, %v3319_v16  ;;  %v2468_v16 = vld [vmem:[%s3786_s0 + $0x30] sm:$0xff]   ;;  %v1722_v26 = vunpack.c.h.b16 %v3487_v32  ;;  %v1517_v43 = vunpack.c.h.b16 %v3347_v5  ;;  %v3876_v5 = vld [vmem:[#allocation12_spill] sm:$0xff] }
 0x468   :  { %v3505_v52 = vpack.c.bf16 %v3479_v3, %v3475_v22 }
 0x469   :  { %1747 = vperm.xlu0 %2382, %v1716_v41   ;;  %1540 = vperm.xlu1 %2381, %v1513_v4   ;;  %v2467_v41 = vld [vmem:[%s3786_s0 + $0x38] sm:$0xff]   ;;  %v1720_v4 = vunpack.c.h.b16 %v3466_v12 }
 0x46a   :  { %2336 = vmatpush3.bf16.msra.mxu1 %v2467_v41 }
 0x46b   :  { %2337 = vmatprep.subr.bf16.mxu1 %v2529_v36 }
 0x46d   :  { %1753 = vperm.xlu0 %2382, %v1718_v24   ;;  %1543 = vperm.xlu1 %2381, %v1514_v9   ;;  %v3491_v24 = vmul.f32 %v3874_v19, %v3315_v51  ;;  %v3495_v9 = vmul.f32 %v3875_v20, %v3315_v51  ;;  %v3516_v20 = vmul.f32 %v3876_v5, %v3315_v51  ;;  %v1522_v5 = vunpack.c.l.b16 %v3366_v29 }
 0x46e   :  { %2338 = vmatpush3.bf16.msra.mxu1 %v2468_v16  ;;  %v3877_v16 = vld [vmem:[#allocation13_spill] sm:$0xff]  ;;  %v1711_v29 = vunpack.c.l.b16 %v3390_v39  ;;  %v1719_v39 = vunpack.c.l.b16 %v3466_v12 }
 0x46f   :  { %v1489_v41 = vpack.c.bf16 %v3495_v9, %v3491_v24  ;;  %2339 = vmatprep.subr.bf16.mxu1 %v2529_v36  ;;  %v3520_v17 = vmul.f32 %v3877_v16, %v3315_v51  ;;  %v2471_v51 = vld [vmem:[%s3786_s0 + $0x18] sm:$0xff]   ;;  %v1717_v16 = vunpack.c.l.b16 %v3446_v53 }
 0x470   :  { %v3878_v53 = vld [vmem:[#allocation15_spill] sm:$0xff] }
 0x471   :  { %1759 = vperm.xlu0 %2382, %v1720_v4   ;;  %1546 = vperm.xlu1 %2381, %v1515_v42   ;;  %v2469_v42 = vld [vmem:[%s3786_s0 + $0x28] sm:$0xff]   ;;  %v1724_v4 = vunpack.c.h.b16 %v3505_v52  ;;  %v1518_v19 = vunpack.c.l.b16 %v1489_v41 }
 0x472   :  { %2340 = vmatpush3.bf16.msra.mxu1 %v2469_v42  ;;  %v1490_v42 = vpack.c.bf16 %v3520_v17, %v3516_v20 }
 0x473   :  { %2341 = vmatprep.subr.bf16.mxu1 %v2529_v36 }
 0x475   :  { %1765 = vperm.xlu0 %2382, %v1722_v26   ;;  %1552 = vperm.xlu1 %2381, %v1517_v43   ;;  %v2470_v26 = vld [vmem:[%s3786_s0 + $0x20] sm:$0xff]   ;;  %v1519_v43 = vunpack.c.h.b16 %v1489_v41  ;;  %v2472_v41 = vld [vmem:[%s3786_s0 + $0x10] sm:$0xff]  }
 0x476   :  { %2342 = vmatpush3.bf16.msra.mxu1 %v2470_v26 }
 0x477   :  { %2343 = vmatprep.subr.bf16.mxu1 %v2529_v36 }
 0x479   :  { %1771 = vperm.xlu0 %2382, %v1724_v4   ;;  %1555 = vperm.xlu1 %2381, %v1518_v19   ;;  %v1520_v4 = vunpack.c.l.b16 %v1490_v42  ;;  %v1521_v19 = vunpack.c.h.b16 %v1490_v42 }
 0x47a   :  { %2344 = vmatpush3.bf16.msra.mxu1 %v2471_v51 }
 0x47b   :  { %2345 = vmatprep.subr.bf16.mxu1 %v2529_v36 }
 0x47d   :  { %1945 = vperm.xlu0 %2382, %v3335_v27   ;;  %1558 = vperm.xlu1 %2381, %v1519_v43   ;;  %v2473_v27 = vld [vmem:[%s3786_s0 + $0x8] sm:$0xff]  }
 0x47e   :  { %2346 = vmatpush3.bf16.msra.mxu1 %v2472_v41 }
 0x47f   :  { %2347 = vmatprep.subr.bf16.mxu1 %v2529_v36 }
 0x481   :  { %1993 = vperm.xlu0 %2382, %v3357_v47   ;;  %1561 = vperm.xlu1 %2381, %v1520_v4   ;;  %v2474_v47 = vld [vmem:[%s3786_s0] sm:$0xff]  }
 0x482   :  { %2348 = vmatpush3.bf16.msra.mxu1 %v2473_v27 }
 0x483   :  { %2349 = vmatprep.subr.bf16.mxu1 %v2529_v36 }
 0x485   :  { %1996 = vperm.xlu0 %2382, %v3378_v49   ;;  %1564 = vperm.xlu1 %2381, %v1521_v19   ;;  %v1709_v49 = vunpack.c.l.b16 %v3374_v40  ;;  %v1715_v40 = vunpack.c.l.b16 %v3438_v58 }
 0x486   :  { %2350 = vmatpush3.bf16.msra.mxu1 %v2474_v47 }
 0x487   :  { %2355 = vmatprep.subr.bf16.mxu1 %v2529_v36 }
 0x489   :  { %1999 = vperm.xlu0 %2382, %v3382_v6   ;;  %1567 = vperm.xlu1 %2381, %v1522_v5   ;;  %v1713_v6 = vunpack.c.l.b16 %v3411_v61 }
 0x48d   :  { %2002 = vperm.xlu0 %2382, %v3394_v60   ;;  %1726 = vperm.xlu1 %2381, %v1709_v49   ;;  %v1721_v60 = vunpack.c.l.b16 %v3487_v32 }
 0x491   :  { %2005 = vperm.xlu0 %2382, %v3398_v7   ;;  %1732 = vperm.xlu1 %2381, %v1711_v29   ;;  %v1723_v7 = vunpack.c.l.b16 %v3505_v52 }
 0x495   :  { %2008 = vperm.xlu0 %2382, %v3417_v63   ;;  %1738 = vperm.xlu1 %2381, %v1713_v6  }
 0x499   :  { %2011 = vperm.xlu0 %2382, %v3421_v14   ;;  %1744 = vperm.xlu1 %2381, %v1715_v40  }
 0x49d   :  { %2014 = vperm.xlu0 %2382, %v3425_v2   ;;  %1750 = vperm.xlu1 %2381, %v1717_v16  }
 0x4a1   :  { %2017 = vperm.xlu0 %2382, %v3429_v34   ;;  %1756 = vperm.xlu1 %2381, %v1719_v39  }
 0x4a5   :  { %2020 = vperm.xlu0 %2382, %v3450_v35   ;;  %1762 = vperm.xlu1 %2381, %v1721_v60  }
 0x4a9   :  { %2023 = vperm.xlu0 %2382, %v3457_v38   ;;  %1768 = vperm.xlu1 %2381, %v1723_v7  }
 0x4ad   :  { %2026 = vperm.xlu0 %2382, %v3462_v62   ;;  %1942 = vperm.xlu1 %2381, %v3331_v25  }
 0x4b1   :  { %2029 = vperm.xlu0 %2382, %v3470_v28   ;;  %1990 = vperm.xlu1 %2381, %v3353_v21  }
 0x4b5   :  { %2032 = vperm.xlu0 %2382, %v3475_v22   ;;  %1948 = vperm.xlu1 %2381, %v3361_v46  }
 0x4b9   :  { %2035 = vperm.xlu0 %2382, %v3479_v3   ;;  %1951 = vperm.xlu1 %2381, %v3370_v55  }
 0x4bd   :  { %1954 = vperm.xlu1 %2381, %v3402_v59  }
 0x4c1   :  { %1957 = vperm.xlu1 %2381, %v3406_v0  }
 0x4c5   :  { %1960 = vperm.xlu1 %2381, %v3433_v54  }
 0x4c9   :  { %1963 = vperm.xlu1 %2381, %v3442_v48  }
 0x4cd   :  { %1966 = vperm.xlu1 %2381, %v3323_v50  }
 0x4d0   :  { %v1550_v25 = vpop.permute.xlu0 %1549  ;;  %v1526_v21 = vpop.permute.xlu1 %1525 }
 0x4d1   :  { %1969 = vperm.xlu1 %2381, %v3327_v13   ;;  %v1614_v27 = vrot.slane %v1550_v25, %v2993_v44 }
 0x4d4   :  { %v1571_v61 = vpop.permute.xlu0 %1570  ;;  %v1529_v46 = vpop.permute.xlu1 %1528 }
 0x4d5   :  { %1972 = vperm.xlu1 %2381, %v3491_v24   ;;  %v1579_v35 = vrot.slane %v1529_v46, %v3878_v53 }
 0x4d8   :  { %v3583_v63 = vpop.permute.xlu0 %1729  ;;  %v1532_v55 = vpop.permute.xlu1 %1531 }
 0x4d9   :  { %1975 = vperm.xlu1 %2381, %v3495_v9   ;;  %v1584_v62 = vrot.slane %v1532_v55, %v2944_v15  ;;  %v3882_v55 = vld [vmem:[#allocation19_spill] sm:$0xff] }
 0x4dc   :  { %v1535_v59 = vpop.permute.xlu1 %1534  ;;  %v3587_v0 = vpop.permute.xlu0 %1735 }
 0x4dd   :  { %1978 = vperm.xlu1 %2381, %v3516_v20   ;;  %v1589_v28 = vrot.slane %v1535_v59, %v2955_v57  ;;  %v1649_v59 = vrot.slane %v1571_v61, %v3882_v55  ;;  %v2475_v61 = vld [vmem:[%s3786_s0 + $0x78] sm:$0xff]  }
 0x4e0   :  { %v1538_v14 = vpop.permute.xlu1 %1537  ;;  %v3590_v50 = vpop.permute.xlu0 %1741 }
 0x4e1   :  { %1981 = vperm.xlu1 %2381, %v3520_v17   ;;  %v3879_v17 = vld [vmem:[#allocation14_spill] sm:$0xff] }
 0x4e2   :  { %v1575_v12 = vrot.slane %v1526_v21, %v3879_v17 }
 0x4e4   :  { %v1541_v13 = vpop.permute.xlu1 %1540  ;;  %v3594_v34 = vpop.permute.xlu0 %1747 }
 0x4e5   :  { %1984 = vperm.xlu1 %2381, %v3339_v23   ;;  %v1594_v23 = vrot.slane %v1538_v14, %v3861_v8  ;;  %v1599_v3 = vrot.slane %v1541_v13, %v3860_v30 }
 0x4e8   :  { %v1544_v2 = vpop.permute.xlu1 %1543  ;;  %v3596_v58 = vpop.permute.xlu0 %1753 }
 0x4e9   :  { %1987 = vperm.xlu1 %2381, %v3343_v10   ;;  %v1580_v10 = vsel %vm3880_vm2, %v1579_v35, %v1575_v12  ;;  %v1604_v9 = vrot.slane %v1544_v2, %v2986_v11  ;;  %vm3881_vm2 = vcmask 786112  }
 0x4ea   :  { %v1585_v24 = vsel %vm860_vm3, %v1584_v62, %v1580_v10  ;;  %v1780_v62 = vrot.slane %v3583_v63, %v3878_v53  ;;  %v1790_v63 = vrot.slane %v3587_v0, %v2955_v57  ;;  %v2477_v0 = vld [vmem:[%s3786_s0 + $0x68] sm:$0xff]  }
 0x4eb   :  { %v1590_v52 = vsel %vm867_vm4, %v1589_v28, %v1585_v24 }
 0x4ec   :  { %v1547_v54 = vpop.permute.xlu1 %1546  ;;  %v3602_v22 = vpop.permute.xlu0 %1759  ;;  %v1595_v26 = vsel %vm874_vm5, %v1594_v23, %v1590_v52 }
 0x4ed   :  { %v1609_v20 = vrot.slane %v1547_v54, %v3000_v37  ;;  %v1600_v43 = vsel %vm881_vm6, %v1599_v3, %v1595_v26  ;;  %v1800_v26 = vrot.slane %v3590_v50, %v3860_v30  ;;  %v2478_v50 = vld [vmem:[%s3786_s0 + $0x60] sm:$0xff]  }
 0x4ee   :  { %v1605_v4 = vsel %vm888_vm7, %v1604_v9, %v1600_v43 }
 0x4ef   :  { %v1610_v41 = vsel %vm895_vm8, %v1609_v20, %v1605_v4 }
 0x4f0   :  { %v1553_v48 = vpop.permute.xlu1 %1552  ;;  %v3613_v42 = vpop.permute.xlu0 %1765  ;;  %v1615_v29 = vsel %vm902_vm9, %v1614_v27, %v1610_v41  ;;  %v1810_v27 = vrot.slane %v3594_v34, %v3000_v37  ;;  %v2479_v34 = vld [vmem:[%s3786_s0 + $0x58] sm:$0xff]  }
 0x4f1   :  { %v1619_v19 = vrot.slane %v1553_v48, %v3862_v45 }
 0x4f3   :  { %v1620_v40 = vsel %vm909_vm10, %v1619_v19, %v1615_v29 }
 0x4f4   :  { %v1556_v38 = vpop.permute.xlu1 %1555  ;;  %v3624_v16 = vpop.permute.xlu0 %1771 }
 0x4f5   :  { %v1624_v5 = vrot.slane %v1556_v38, %v3026_v33 }
 0x4f7   :  { %v1625_v60 = vsel %vm916_vm11, %v1624_v5, %v1620_v40  ;;  %v1820_v40 = vrot.slane %v3596_v58, %v3862_v45  ;;  %v2480_v58 = vld [vmem:[%s3786_s0 + $0x50] sm:$0xff]  }
 0x4f8   :  { %v1559_v32 = vpop.permute.xlu1 %1558  ;;  %v3634_v2 = vpop.permute.xlu0 %1945 }
 0x4f9   :  { %v1629_v47 = vrot.slane %v1559_v32, %v3040_v18  ;;  %v2476_v32 = vld [vmem:[%s3786_s0 + $0x70] sm:$0xff]  }
 0x4fb   :  { %v1630_v7 = vsel %vm3881_vm2, %v1629_v47, %v1625_v60  ;;  %vm3883_vm2 = vcmask 130112  }
 0x4fc   :  { %v1562_v51 = vpop.permute.xlu1 %1561  ;;  %v3647_v23 = vpop.permute.xlu0 %1993 }
 0x4fd   :  { %v1634_v6 = vrot.slane %v1562_v51, %v3035_v31 }
 0x4ff   :  { %v1635_v21 = vsel %vm930_vm13, %v1634_v6, %v1630_v7 }
 0x500   :  { %v1565_v49 = vpop.permute.xlu1 %1564  ;;  %v3662_v43 = vpop.permute.xlu0 %1996 }
 0x501   :  { %v1639_v39 = vrot.slane %v1565_v49, %v3044_v1 }
 0x503   :  { %v1640_v14 = vsel %vm937_vm14, %v1639_v39, %v1635_v21  ;;  %v1830_v21 = vrot.slane %v3602_v22, %v3040_v18  ;;  %v2481_v22 = vld [vmem:[%s3786_s0 + $0x48] sm:$0xff]  }
 0x504   :  { %v1568_v25 = vpop.permute.xlu1 %1567  ;;  %v2000_v49 = vpop.permute.xlu0 %1999 }
 0x505   :  { %v1644_v46 = vrot.slane %v1568_v25, %v3049_v56 }
 0x507   :  { %v1645_v13 = vsel %vm944_vm15, %v1644_v46, %v1640_v14 }
 0x508   :  { %v1727_v54 = vpop.permute.xlu1 %1726  ;;  %v1650_v48 = vsel %vm951_vm0, %v1649_v59, %v1645_v13  ;;  %v2003_v46 = vpop.permute.xlu0 %2002 }
 0x509   :  { %v1651_v35 = vpack.c.b16 %v1650_v48, %v1650_v48  ;;  %v1776_v38 = vrot.slane %v1727_v54, %v3879_v17  ;;  %v1840_v48 = vrot.slane %v3613_v42, %v3044_v1 }
 0x50b   :  { %2352 = vmatmul.mubr.bf16.vlgmr.msra.gmra.mxu1 %v1651_v35  ;;  %v1781_v10 = vsel %vm3883_vm2, %v1780_v62, %v1776_v38  ;;  %v1850_v62 = vrot.slane %v3624_v16, %v3882_v55 }
 0x50c   :  { %2356 = vmatpush3.bf16.msra.mxu1 %v2475_v61  ;;  %v1733_v12 = vpop.permute.xlu1 %1732  ;;  %2371 = vmatprep.mubr.msk.bf16.mxu1 %vm2530_vm12, %v2529_v36  ;;  %vm3884_vm12 = vcmask 786112   ;;  %v2006_v61 = vpop.permute.xlu0 %2005 }
 0x50d   :  { %v1785_v28 = vrot.slane %v1733_v12, %v2944_v15  ;;  %2357 = vmatprep.subr.bf16.mxu1 %v2529_v36 }
 0x50f   :  { %v1786_v3 = vsel %vm860_vm3, %v1785_v28, %v1781_v10  ;;  %v2482_v10 = vld [vmem:[%s3786_s0 + $0x40] sm:$0xff]   ;;  %s2531_s0 = smov [#allocation4]  }
 0x510   :  { %2358 = vmatpush3.bf16.msra.mxu1 %v2476_v32  ;;  %v1739_v24 = vpop.permute.xlu1 %1738  ;;  %v1791_v52 = vsel %vm867_vm4, %v1790_v63, %v1786_v3  ;;  %v2009_v32 = vpop.permute.xlu0 %2008  ;;  %s2214_s14 = sshll.u32 %s2531_s0, 4  ;;  %s2215_s14 = int_to_ptr.vmem [resolvable:$true] %s2214_s14 }
 0x511   :  { %v1795_v9 = vrot.slane %v1739_v24, %v3861_v8  ;;  %2359 = vmatprep.subr.bf16.mxu1 %v2529_v36  ;;  %s2483_s15 = scalar_lea.vmem %s2215_s14, 32  ;;  %p2488_p1 = scmp.lt.s32.totalorder %s2215_s14, %s2215_s14 }
 0x512   :  { %p2484_p0 = scmp.ne.s32.totalorder %s2215_s14, %s2483_s15  ;;  %p2489_p2 = scmp.lt.s32.totalorder %s2483_s15, %s2483_s15 }
 0x513   :  { %v1796_v20 = vsel %vm874_vm5, %v1795_v9, %v1791_v52 }
 0x514   :  { %2360 = vmatpush3.bf16.msra.mxu1 %v2477_v0  ;;  %v1745_v51 = vpop.permute.xlu1 %1744  ;;  %v1801_v41 = vsel %vm881_vm6, %v1800_v26, %v1796_v20  ;;  %v2012_v9 = vpop.permute.xlu0 %2011  ;;  %v2123_v0 = vrot.slane %v3647_v23, %v3878_v53  ;;  %p2490_p3 = por %p2489_p2, %p2488_p1 }
 0x515   :  { %v1805_v4 = vrot.slane %v1745_v51, %v2986_v11  ;;  %2361 = vmatprep.subr.bf16.mxu1 %v2529_v36 }
 0x516   :  { %p2491_p4 = pnand %p2490_p3, %p2484_p0 }
 0x517   :  { %v1806_v19 = vsel %vm888_vm7, %v1805_v4, %v1801_v41  ;;  %v2128_v41 = vrot.slane %v3662_v43, %v2944_v15  ;;  %v2148_v43 = vrot.slane %v2009_v32, %v2986_v11 }
 0x518   :  { %2362 = vmatpush3.bf16.msra.mxu1 %v2478_v50  ;;  %v1751_v5 = vpop.permute.xlu1 %1750  ;;  %v1811_v29 = vsel %vm895_vm8, %v1810_v27, %v1806_v19  ;;  %v2015_v52 = vpop.permute.xlu0 %2014 }
 0x519   :  { %v1815_v47 = vrot.slane %v1751_v5, %v2993_v44  ;;  %2363 = vmatprep.subr.bf16.mxu1 %v2529_v36  ;;  %v2133_v5 = vrot.slane %v2000_v49, %v2955_v57  ;;  %v2153_v49 = vrot.slane %v2012_v9, %v3000_v37 }
 0x51b   :  { %v1816_v6 = vsel %vm902_vm9, %v1815_v47, %v1811_v29  ;;  %v2138_v29 = vrot.slane %v2003_v46, %v3861_v8  ;;  %v2158_v46 = vrot.slane %v2015_v52, %v2993_v44 }
 0x51c   :  { %2364 = vmatpush3.bf16.msra.mxu1 %v2479_v34  ;;  %v1757_v39 = vpop.permute.xlu1 %1756  ;;  %v1821_v7 = vsel %vm909_vm10, %v1820_v40, %v1816_v6  ;;  %v2018_v19 = vpop.permute.xlu0 %2017  ;;  %v2143_v34 = vrot.slane %v2006_v61, %v3860_v30 }
 0x51d   :  { %v1825_v60 = vrot.slane %v1757_v39, %v3026_v33  ;;  %2365 = vmatprep.subr.bf16.mxu1 %v2529_v36 }
 0x51f   :  { %v1826_v25 = vsel %vm916_vm11, %v1825_v60, %v1821_v7 }
 0x520   :  { %2366 = vmatpush3.bf16.msra.mxu1 %v2480_v58  ;;  %v1763_v59 = vpop.permute.xlu1 %1762  ;;  %v1831_v13 = vsel %vm3884_vm12, %v1830_v21, %v1826_v25  ;;  %v2021_v6 = vpop.permute.xlu0 %2020  ;;  %vm3885_vm12 = vmmov %vm3883_vm2 }
 0x521   :  { %v1835_v14 = vrot.slane %v1763_v59, %v3035_v31  ;;  %2367 = vmatprep.subr.bf16.mxu1 %v2529_v36 }
 0x523   :  { %v1836_v54 = vsel %vm930_vm13, %v1835_v14, %v1831_v13 }
 0x524   :  { %2368 = vmatpush3.bf16.msra.mxu1 %v2481_v22  ;;  %v1769_v35 = vpop.permute.xlu1 %1768  ;;  %v1841_v12 = vsel %vm937_vm14, %v1840_v48, %v1836_v54  ;;  %v2024_v7 = vpop.permute.xlu0 %2023  ;;  %v2163_v54 = vrot.slane %v2018_v19, %v3862_v45 }
 0x525   :  { %v1845_v38 = vrot.slane %v1769_v35, %v3049_v56  ;;  %2369 = vmatprep.subr.bf16.mxu1 %v2529_v36  ;;  %v2173_v32 = vrot.slane %v2024_v7, %v3040_v18 }
 0x527   :  { %v1846_v28 = vsel %vm944_vm15, %v1845_v38, %v1841_v12  ;;  %v2168_v38 = vrot.slane %v2021_v6, %v3026_v33  ;;  %v2044_v12 = vrot.slane %v3634_v2, %v3878_v53 }
 0x528   :  { %v1851_v42 = vsel %vm951_vm0, %v1850_v62, %v1846_v28  ;;  %2370 = vmatpush3.bf16.msra.mxu1 %v2482_v10  ;;  %v1943_v3 = vpop.permute.xlu1 %1942  ;;  %v2027_v59 = vpop.permute.xlu0 %2026 }
 0x529   :  { %v1852_v63 = vpack.c.b16 %v1851_v42, %v1851_v42  ;;  %v2040_v22 = vrot.slane %v1943_v3, %v3879_v17  ;;  %v2178_v2 = vrot.slane %v2027_v59, %v3035_v31 }
 0x52b   :  { %2372 = vmatmul.mubr.bf16.vlgmr.msra.gmra.mxu1 %v1852_v63 }
 0x52c   :  { %v1991_v36 = vpop.permute.xlu1 %1990  ;;  %v2030_v62 = vpop.permute.xlu0 %2029 }
 0x52d   :  { %v2119_v26 = vrot.slane %v1991_v36, %v3879_v17  ;;  %v2045_v17 = vsel %vm3885_vm12, %v2044_v12, %v2040_v22 }
 0x52f   :  { %v2124_v4 = vsel %vm3883_vm2, %v2123_v0, %v2119_v26  ;;  %vm3886_vm2 = vcmask 786112  }
 0x530   :  { %v1949_v24 = vpop.permute.xlu1 %1948  ;;  %v2129_v27 = vsel %vm860_vm3, %v2128_v41, %v2124_v4 }
 0x531   :  { %v2134_v47 = vsel %vm867_vm4, %v2133_v5, %v2129_v27  ;;  %v2049_v61 = vrot.slane %v1949_v24, %v2944_v15 }
 0x532   :  { %v2139_v23 = vsel %vm874_vm5, %v2138_v29, %v2134_v47 }
 0x533   :  { %v2144_v60 = vsel %vm881_vm6, %v2143_v34, %v2139_v23  ;;  %v2050_v36 = vsel %vm860_vm3, %v2049_v61, %v2045_v17  ;;  %vm3887_vm3 = vmmov %vm3886_vm2 }
 0x534   :  { %v1952_v16 = vpop.permute.xlu1 %1951  ;;  %v2149_v25 = vsel %vm888_vm7, %v2148_v43, %v2144_v60 }
 0x535   :  { %v2154_v58 = vsel %vm895_vm8, %v2153_v49, %v2149_v25  ;;  %v2054_v28 = vrot.slane %v1952_v16, %v2955_v57 }
 0x536   :  { %v2159_v13 = vsel %vm902_vm9, %v2158_v46, %v2154_v58 }
 0x537   :  { %v2164_v35 = vsel %vm909_vm10, %v2163_v54, %v2159_v13  ;;  %v2055_v53 = vsel %vm867_vm4, %v2054_v28, %v2050_v36 }
 0x538   :  { %v1955_v20 = vpop.permute.xlu1 %1954  ;;  %v2169_v42 = vsel %vm916_vm11, %v2168_v38, %v2164_v35 }
 0x539   :  { %v2059_v10 = vrot.slane %v1955_v20, %v3861_v8  ;;  %v2174_v24 = vsel %vm3886_vm2, %v2173_v32, %v2169_v42  ;;  %v2033_v8 = vpop.permute.xlu0 %2032 }
 0x53a   :  { %v2188_v5 = vrot.slane %v2033_v8, %v3049_v56 }
 0x53b   :  { %v2060_v9 = vsel %vm874_vm5, %v2059_v10, %v2055_v53 }
 0x53c   :  { %v1958_v51 = vpop.permute.xlu1 %1957 }
 0x53d   :  { %v2064_v3 = vrot.slane %v1958_v51, %v3860_v30 }
 0x53f   :  { %v2065_v30 = vsel %vm881_vm6, %v2064_v3, %v2060_v9 }
 0x540   :  { %v1961_v50 = vpop.permute.xlu1 %1960 }
 0x541   :  { %v2069_v15 = vrot.slane %v1961_v50, %v2986_v11  ;;  %v2179_v11 = vsel %vm930_vm13, %v2178_v2, %v2174_v24 }
 0x543   :  { %v2070_v26 = vsel %vm888_vm7, %v2069_v15, %v2065_v30 }
 0x544   :  { %v1964_v40 = vpop.permute.xlu1 %1963 }
 0x545   :  { %v2074_v57 = vrot.slane %v1964_v40, %v3000_v37  ;;  %v2183_v37 = vrot.slane %v2030_v62, %v3044_v1 }
 0x547   :  { %v2075_v51 = vsel %vm895_vm8, %v2074_v57, %v2070_v26  ;;  %v2184_v27 = vsel %vm937_vm14, %v2183_v37, %v2179_v11 }
 0x548   :  { %v1967_v39 = vpop.permute.xlu1 %1966  ;;  %v2189_v6 = vsel %vm944_vm15, %v2188_v5, %v2184_v27 }
 0x549   :  { %v2079_v16 = vrot.slane %v1967_v39, %v2993_v44 }
 0x54b   :  { %v2080_v41 = vsel %vm902_vm9, %v2079_v16, %v2075_v51 }
 0x54c   :  { %v1970_v21 = vpop.permute.xlu1 %1969 }
 0x54d   :  { %v2084_v20 = vrot.slane %v1970_v21, %v3862_v45 }
 0x54f   :  { %v2085_v45 = vsel %vm909_vm10, %v2084_v20, %v2080_v41 }
 0x550   :  { %v1973_v14 = vpop.permute.xlu1 %1972 }
 0x551   :  { %v2089_v0 = vrot.slane %v1973_v14, %v3026_v33  ;;  %v2036_v33 = vpop.permute.xlu0 %2035 }
 0x552   :  { %v2193_v23 = vrot.slane %v2036_v33, %v3882_v55 }
 0x553   :  { %v2090_v47 = vsel %vm916_vm11, %v2089_v0, %v2085_v45 }
 0x554   :  { %v1976_v48 = vpop.permute.xlu1 %1975  ;;  %v2194_v43 = vsel %vm951_vm0, %v2193_v23, %v2189_v6 }
 0x555   :  { %v2094_v4 = vrot.slane %v1976_v48, %v3040_v18 }
 0x557   :  { %v2095_v18 = vsel %vm3887_vm3, %v2094_v4, %v2090_v47 }
 0x558   :  { %v1979_v63 = vpop.permute.xlu1 %1978 }
 0x559   :  { %v2099_v44 = vrot.slane %v1979_v63, %v3035_v31 }
 0x55b   :  { %v2100_v31 = vsel %vm930_vm13, %v2099_v44, %v2095_v18 }
 0x55c   :  { %v1982_v52 = vpop.permute.xlu1 %1981 }
 0x55d   :  { %v2104_v50 = vrot.slane %v1982_v52, %v3044_v1 }
 0x55f   :  { %v2105_v34 = vsel %vm937_vm14, %v2104_v50, %v2100_v31 }
 0x560   :  { %v1985_v19 = vpop.permute.xlu1 %1984 }
 0x561   :  { %v2109_v29 = vrot.slane %v1985_v19, %v3049_v56 }
 0x563   :  { %v2110_v39 = vsel %vm944_vm15, %v2109_v29, %v2105_v34 }
 0x564   :  { %v1988_v40 = vpop.permute.xlu1 %1987 }
 0x565   :  { %v2114_v1 = vrot.slane %v1988_v40, %v3882_v55 }
 0x567   :  { %v2115_v60 = vsel %vm951_vm0, %v2114_v1, %v2110_v39 }
 0x568   :  { %v2195_v56 = vsel %vm1032_vm1, %v2194_v43, %v2115_v60 }
 0x569   :  { %2197 = vst [vmem:[#allocation4] sm:$0x3] %v2195_v56 }
 0x56a   :  { %2494 = shalt.err (!%p2491_p4)
}
 0x56b   :  { %2217 = dma.vmem_to_hbm [thread:$0]  %s2215_s14, 32, %s3792_s6, [#allocation5]   ;;  %vm1907_vm4 = vcmask 254976  }
 0x56c   :  { %s2532_s17 = smov [#allocation2]  }
 0x56d   :  { %s2204_s18 = sshll.u32 %s2532_s17, 4  ;;  %s2205_s18 = int_to_ptr.vmem [resolvable:$true] %s2204_s18 }
 0x56e   :  { %s2503_s19 = scalar_lea.vmem %s2205_s18, 32  ;;  %p2508_p6 = scmp.lt.s32.totalorder %s2205_s18, %s2205_s18 }
 0x56f   :  { %p2504_p5 = scmp.ne.s32.totalorder %s2205_s18, %s2503_s19  ;;  %p2509_p7 = scmp.lt.s32.totalorder %s2503_s19, %s2503_s19 }
 0x571   :  { %p2510_p8 = por %p2509_p7, %p2508_p6 }
 0x573   :  { %p2511_p9 = pnand %p2510_p8, %p2504_p5 }
 0x5cb   :  { %v1695_v55 = vpop.f32.mrf.mxu1 }
 0x5cd   :  { %v2353_v7 = vpop.f32.mrf.mxu1 }
 0x5cf   :  { %v1698_v25 = vpop.f32.mrf.mxu1 }
 0x5d1   :  { %v2354_v21 = vpop.f32.mrf.mxu1 }
 0x5eb   :  { %v1896_v49 = vpop.f32.mrf.mxu1 }
 0x5ec   :  { %v1904_v58 = vrot.slane %v1896_v49, 7 }
 0x5ed   :  { %v2373_v46 = vpop.f32.mrf.mxu1 }
 0x5ee   :  { %v1905_v59 = vsel %vm1032_vm1, %v1904_v58, %v1695_v55 }
 0x5ef   :  { %v1899_v14 = vpop.f32.mrf.mxu1  ;;  %1908 = vst.msk [vmem:[#allocation2] sm:$0x3] %vm1907_vm4, %v1905_v59 }
 0x5f0   :  { %2514 = shalt.err (!%p2511_p9)
}
 0x5f1   :  { %2207 = dma.vmem_to_hbm [thread:$0]  %s2205_s18, 32, %s3791_s5, [#allocation3]   ;;  %v2374_v13 = vpop.f32.mrf.mxu1 }
 0x5f2   :  { %2523 = dma.done.wait [#allocation3], 32  }
 0x5f3   :  { %2524 = vsyncadd [#allocation3], 4294967264 }
 0x5f4   :  { %2525 = dma.done.wait [#allocation5], 32  }
 0x5f5   :  { %2526 = vsyncadd [#allocation5], 4294967264 }
 0x5f6   :  { %2224 = vsyncpa [#allocation3], 1 }
 0x5f7   :  { %2225 = vsyncpa [#allocation5], 1 }

</bundles_post_ra>
